<compile_context>
chip_gen: v6e
topology: v6e:2x2x1
jax: 0.10.0
libtpu: 0.0.40
codegen_flags: <defaults>
</compile_context>

<pallas_src>
import functools

import jax
import jax.numpy as jnp
from jax.experimental import pallas as pl
from jax.experimental.pallas import tpu as pltpu

KH = KW = 3
PAD = 1
EPS = 1e-5          # nn.BatchNorm2d default eps
NEG_SLOPE = 0.1     # nn.LeakyReLU(0.1)
LANE = 128          # TPU lane width: keep channel (minor) dims multiples of this


def _round_up(x, m):
    return (x + m - 1) // m * m


def _conv_tile(x_ref, w_ref, H, W, TCO):
    """3x3 conv of one spatially padded image tile as 9 shifted 2-D MXU matmuls.

    x_ref: (1, H+2, W+2, Cin)   padded image tile (bf16 or f32)
    w_ref: (KH, KW, Cin, TCO)   weight tile
    returns (H*W, TCO) f32 accumulator.
    """
    Cin = x_ref.shape[-1]
    acc = jnp.zeros((H * W, TCO), jnp.float32)
    for kh in range(KH):
        for kw in range(KW):
            patch = x_ref[0, kh:kh + H, kw:kw + W, :]            # (H, W, Cin)
            acc = acc + jnp.dot(patch.reshape(H * W, Cin), w_ref[kh, kw],
                                preferred_element_type=jnp.float32)
    return acc


def _stats_kernel(x_ref, w_ref, stats_ref):
    """Pass 1: conv + per-image per-channel sum / sum-of-squares partials."""
    H = x_ref.shape[1] - 2 * PAD
    W = x_ref.shape[2] - 2 * PAD
    TCO = stats_ref.shape[-1]
    acc = _conv_tile(x_ref, w_ref, H, W, TCO)                    # (H*W, TCO) f32
    stats_ref[0, 0:1, :] = jnp.sum(acc, axis=0, keepdims=True)
    stats_ref[0, 1:2, :] = jnp.sum(acc * acc, axis=0, keepdims=True)


def _apply_kernel(x_ref, w_ref, scale_ref, shift_ref, o_ref):
    """Pass 2: conv recompute + fused BN affine + LeakyReLU, lane-dense store."""
    _, H, W, TCO = o_ref.shape
    acc = _conv_tile(x_ref, w_ref, H, W, TCO)                    # (H*W, TCO) f32
    y = acc * scale_ref[...] + shift_ref[...]                    # f32 elementwise (v5e-safe)
    y = jnp.where(y > 0, y, NEG_SLOPE * y)
    o_ref[0] = y.reshape(H, W, TCO).astype(o_ref.dtype)


def _vmem_limit(single_copy_block_bytes):
    # 2x for double-buffered pipelining, 1.5x + 2 MiB headroom for compiler scratch,
    # clamped to a range that is safe on v5e/v6e (128 MiB) and v7x (64 MiB physical).
    need = int(single_copy_block_bytes * 2 * 1.5) + (2 << 20)
    return max(4 << 20, min(need, 48 << 20))


@functools.partial(jax.jit, static_argnames=("compute_dtype",))
def cnn_block_forward(x_nchw, w_oihw, gamma, beta, *, compute_dtype=jnp.bfloat16):
    """NCHW in / NCHW out (PyTorch convention).

    compute_dtype: dtype fed to the MXU (bf16 for v6e/v7x throughput, f32 for
    strict numerics).  Accumulation, BN statistics and LeakyReLU are always f32.
    """
    N, Cin, H, W = x_nchw.shape
    Cout = w_oihw.shape[0]

    Cinp = _round_up(Cin, LANE)
    Coutp = _round_up(Cout, LANE)
    TCO = min(Coutp, LANE)                       # lane-dense Cout tile
    num_co = Coutp // TCO
    Hp, Wp = H + 2 * PAD, W + 2 * PAD
    dt_size = jnp.dtype(compute_dtype).itemsize

    # ---- layout glue: NCHW -> NHWC, zero spatial halo + channel padding ----
    # TODO(synk): in a full network keep activations NHWC / channel-padded end-to-end
    # (and fuse the halo into a tiled index_map) so this transpose+pad does not add
    # an extra HBM pass per layer.
    x_nhwc = jnp.transpose(x_nchw, (0, 2, 3, 1)).astype(jnp.float32)
    x_pad = jnp.pad(x_nhwc, ((0, 0), (PAD, PAD), (PAD, PAD), (0, Cinp - Cin)))
    x_pad = x_pad.astype(compute_dtype)
    w_hwio = jnp.transpose(w_oihw, (2, 3, 1, 0)).astype(jnp.float32)   # (KH,KW,Cin,Cout)
    w_p = jnp.pad(w_hwio, ((0, 0), (0, 0), (0, Cinp - Cin), (0, Coutp - Cout)))
    w_p = w_p.astype(compute_dtype)

    conv_flops = 2 * N * H * W * KH * KW * Cinp * Coutp
    x_block = Hp * Wp * Cinp * dt_size
    w_block = KH * KW * Cinp * TCO * dt_size

    # ---- pass 1: conv + per-image per-channel sum / sumsq partials ----
    stats_partial = pl.pallas_call(
        _stats_kernel,
        out_shape=jax.ShapeDtypeStruct((N, 2, Coutp), jnp.float32),
        grid_spec=pltpu.PrefetchScalarGridSpec(
            num_scalar_prefetch=0,
            grid=(N, num_co),
            in_specs=[
                pl.BlockSpec((1, Hp, Wp, Cinp), lambda n, c: (n, 0, 0, 0)),
                pl.BlockSpec((KH, KW, Cinp, TCO), lambda n, c: (0, 0, 0, c)),
            ],
            out_specs=pl.BlockSpec((1, 2, TCO), lambda n, c: (n, 0, c)),
        ),
        compiler_params=pltpu.CompilerParams(
            dimension_semantics=("parallel", "parallel"),
            vmem_limit_bytes=_vmem_limit(x_block + w_block + 2 * TCO * 4),
        ),
        cost_estimate=pl.CostEstimate(
            flops=conv_flops, transcendentals=0,
            bytes_accessed=x_pad.size * dt_size + w_p.size * dt_size + N * 2 * Coutp * 4),
    )(x_pad, w_p)

    # ---- training-mode batch statistics + fused BN affine coefficients ----
    stats = jnp.sum(stats_partial, axis=0)                       # (2, Coutp) f32
    m = float(N * H * W)
    mean = stats[0] / m
    var = jnp.maximum(stats[1] / m - mean * mean, 0.0)           # biased variance
    inv_std = jax.lax.rsqrt(var + EPS)
    gamma_p = jnp.pad(gamma.astype(jnp.float32), (0, Coutp - Cout), constant_values=1.0)
    beta_p = jnp.pad(beta.astype(jnp.float32), (0, Coutp - Cout))
    scale = (gamma_p * inv_std).reshape(1, Coutp)
    shift = (beta_p - mean * gamma_p * inv_std).reshape(1, Coutp)

    # ---- pass 2: conv recompute + normalize + LeakyReLU, lane-dense output ----
    out_block = H * W * TCO * 4
    out_nhwc = pl.pallas_call(
        _apply_kernel,
        out_shape=jax.ShapeDtypeStruct((N, H, W, Coutp), jnp.float32),
        grid_spec=pltpu.PrefetchScalarGridSpec(
            num_scalar_prefetch=0,
            grid=(N, num_co),
            in_specs=[
                pl.BlockSpec((1, Hp, Wp, Cinp), lambda n, c: (n, 0, 0, 0)),
                pl.BlockSpec((KH, KW, Cinp, TCO), lambda n, c: (0, 0, 0, c)),
                pl.BlockSpec((1, TCO), lambda n, c: (0, c)),
                pl.BlockSpec((1, TCO), lambda n, c: (0, c)),
            ],
            out_specs=pl.BlockSpec((1, H, W, TCO), lambda n, c: (n, 0, 0, c)),
        ),
        compiler_params=pltpu.CompilerParams(
            dimension_semantics=("parallel", "parallel"),
            vmem_limit_bytes=_vmem_limit(x_block + w_block + out_block + 2 * TCO * 4),
        ),
        cost_estimate=pl.CostEstimate(
            flops=conv_flops, transcendentals=0,
            bytes_accessed=x_pad.size * dt_size + w_p.size * dt_size
                           + N * H * W * Coutp * 4),
    )(x_pad, w_p, scale, shift)

    return jnp.transpose(out_nhwc[..., :Cout], (0, 3, 1, 2))     # back to NCHW


def cnn_block_ref(x_nchw, w_oihw, gamma, beta):
    """Pure-JAX reference matching the PyTorch forward in training mode."""
    conv = jax.lax.conv_general_dilated(
        x_nchw.astype(jnp.float32), w_oihw.astype(jnp.float32),
        window_strides=(1, 1), padding=((PAD, PAD), (PAD, PAD)),
        dimension_numbers=("NCHW", "OIHW", "NCHW"))
    mean = jnp.mean(conv, axis=(0, 2, 3), keepdims=True)
    var = jnp.mean((conv - mean) ** 2, axis=(0, 2, 3), keepdims=True)
    y = (conv - mean) * jax.lax.rsqrt(var + EPS) * gamma.reshape(1, -1, 1, 1) \
        + beta.reshape(1, -1, 1, 1)
    return jnp.where(y > 0, y, NEG_SLOPE * y)


if __name__ == "__main__":
    key = jax.random.PRNGKey(0)
    k_x, k_w, k_g, k_b = jax.random.split(key, 4)

    N, Cin, H, W = 2, 4, 16, 16
    Cout = 8

    x = jax.random.normal(k_x, (N, Cin, H, W), dtype=jnp.float32)
    # nn.Conv2d weight shape: (Cout, Cin, KH, KW), bias=False
    w = jax.random.normal(k_w, (Cout, Cin, KH, KW), dtype=jnp.float32) * 0.1
    # nn.BatchNorm2d affine params
    gamma = 1.0 + 0.1 * jax.random.normal(k_g, (Cout,), dtype=jnp.float32)
    beta = 0.1 * jax.random.normal(k_b, (Cout,), dtype=jnp.float32)

    ref = jax.block_until_ready(cnn_block_ref(x, w, gamma, beta))

    # strict-numerics path (f32 MXU operands)
    out_f32 = jax.block_until_ready(
        cnn_block_forward(x, w, gamma, beta, compute_dtype=jnp.float32))
    assert out_f32.shape == (N, Cout, H, W), out_f32.shape
    assert jnp.allclose(out_f32, ref, rtol=1e-3, atol=1e-3), \
        f"f32 path max abs err = {jnp.max(jnp.abs(out_f32 - ref))}"

    # production path (bf16 MXU operands, f32 accumulate / BN / LeakyReLU)
    out_bf16 = jax.block_until_ready(cnn_block_forward(x, w, gamma, beta))
    assert out_bf16.shape == (N, Cout, H, W), out_bf16.shape
    assert jnp.allclose(out_bf16, ref, rtol=5e-2, atol=5e-2), \
        f"bf16 path max abs err = {jnp.max(jnp.abs(out_bf16 - ref))}"

    print("KERNEL_OK")
</pallas_src>

<mosaic_0001>
module attributes {stable_mosaic.version = 11 : i64} {
  func.func @_stats_kernel(%arg0: i32, %arg1: i32, %arg2: memref<1x18x18x128xf32, #tpu.memory_space<vmem>>, %arg3: memref<3x3x128x128xf32, #tpu.memory_space<vmem>>, %arg4: memref<1x2x128xf32, #tpu.memory_space<vmem>>) attributes {dimension_semantics = [#tpu.dimension_semantics<parallel>, #tpu.dimension_semantics<parallel>], iteration_bounds = array<i64: 2, 1>, scalar_prefetch = 0 : i64, scratch_operands = 0 : i64, tpu.core_type = #tpu.core_type<tc>, window_params = [{transform_indices = @transform_0, window_bounds = array<i64: 1, 18, 18, 128>}, {transform_indices = @transform_1, window_bounds = array<i64: 3, 3, 128, 128>}, {transform_indices = @transform_2, window_bounds = array<i64: 1, 2, 128>}]} {
    %cst = arith.constant 0.000000e+00 : f32
    %0 = vector.broadcast %cst : f32 to vector<256x128xf32>
    %c0 = arith.constant 0 : index
    %c0_0 = arith.constant 0 : index
    %c0_1 = arith.constant 0 : index
    %c0_2 = arith.constant 0 : index
    %1 = vector.load %arg2[%c0, %c0_0, %c0_1, %c0_2] : memref<1x18x18x128xf32, #tpu.memory_space<vmem>>, vector<1x16x16x128xf32>
    %2 = vector.shape_cast %1 : vector<1x16x16x128xf32> to vector<16x16x128xf32>
    %3 = vector.shape_cast %2 : vector<16x16x128xf32> to vector<256x128xf32>
    %c0_3 = arith.constant 0 : index
    %c0_4 = arith.constant 0 : index
    %c0_5 = arith.constant 0 : index
    %c0_6 = arith.constant 0 : index
    %4 = vector.load %arg3[%c0_3, %c0_4, %c0_5, %c0_6] : memref<3x3x128x128xf32, #tpu.memory_space<vmem>>, vector<1x1x128x128xf32>
    %5 = vector.shape_cast %4 : vector<1x1x128x128xf32> to vector<128x128xf32>
    %cst_7 = arith.constant dense<0.000000e+00> : vector<256x128xf32>
    %6 = tpu.matmul %3, %5, %cst_7 {dimension_numbers = #tpu.dot_dimension_numbers<[1], [0], [0], [1], [0, 0, 1, 1], [], []>} : vector<256x128xf32>, vector<128x128xf32>, vector<256x128xf32> -> vector<256x128xf32>
    %7 = arith.addf %0, %6 : vector<256x128xf32>
    %c0_8 = arith.constant 0 : index
    %c0_9 = arith.constant 0 : index
    %c1 = arith.constant 1 : index
    %c0_10 = arith.constant 0 : index
    %8 = vector.load %arg2[%c0_8, %c0_9, %c1, %c0_10] : memref<1x18x18x128xf32, #tpu.memory_space<vmem>>, vector<1x16x16x128xf32>
    %9 = vector.shape_cast %8 : vector<1x16x16x128xf32> to vector<16x16x128xf32>
    %10 = vector.shape_cast %9 : vector<16x16x128xf32> to vector<256x128xf32>
    %c0_11 = arith.constant 0 : index
    %c1_12 = arith.constant 1 : index
    %c0_13 = arith.constant 0 : index
    %c0_14 = arith.constant 0 : index
    %11 = vector.load %arg3[%c0_11, %c1_12, %c0_13, %c0_14] : memref<3x3x128x128xf32, #tpu.memory_space<vmem>>, vector<1x1x128x128xf32>
    %12 = vector.shape_cast %11 : vector<1x1x128x128xf32> to vector<128x128xf32>
    %cst_15 = arith.constant dense<0.000000e+00> : vector<256x128xf32>
    %13 = tpu.matmul %10, %12, %cst_15 {dimension_numbers = #tpu.dot_dimension_numbers<[1], [0], [0], [1], [0, 0, 1, 1], [], []>} : vector<256x128xf32>, vector<128x128xf32>, vector<256x128xf32> -> vector<256x128xf32>
    %14 = arith.addf %7, %13 : vector<256x128xf32>
    %c0_16 = arith.constant 0 : index
    %c0_17 = arith.constant 0 : index
    %c2 = arith.constant 2 : index
    %c0_18 = arith.constant 0 : index
    %15 = vector.load %arg2[%c0_16, %c0_17, %c2, %c0_18] : memref<1x18x18x128xf32, #tpu.memory_space<vmem>>, vector<1x16x16x128xf32>
    %16 = vector.shape_cast %15 : vector<1x16x16x128xf32> to vector<16x16x128xf32>
    %17 = vector.shape_cast %16 : vector<16x16x128xf32> to vector<256x128xf32>
    %c0_19 = arith.constant 0 : index
    %c2_20 = arith.constant 2 : index
    %c0_21 = arith.constant 0 : index
    %c0_22 = arith.constant 0 : index
    %18 = vector.load %arg3[%c0_19, %c2_20, %c0_21, %c0_22] : memref<3x3x128x128xf32, #tpu.memory_space<vmem>>, vector<1x1x128x128xf32>
    %19 = vector.shape_cast %18 : vector<1x1x128x128xf32> to vector<128x128xf32>
    %cst_23 = arith.constant dense<0.000000e+00> : vector<256x128xf32>
    %20 = tpu.matmul %17, %19, %cst_23 {dimension_numbers = #tpu.dot_dimension_numbers<[1], [0], [0], [1], [0, 0, 1, 1], [], []>} : vector<256x128xf32>, vector<128x128xf32>, vector<256x128xf32> -> vector<256x128xf32>
    %21 = arith.addf %14, %20 : vector<256x128xf32>
    %c0_24 = arith.constant 0 : index
    %c1_25 = arith.constant 1 : index
    %c0_26 = arith.constant 0 : index
    %c0_27 = arith.constant 0 : index
    %22 = vector.load %arg2[%c0_24, %c1_25, %c0_26, %c0_27] : memref<1x18x18x128xf32, #tpu.memory_space<vmem>>, vector<1x16x16x128xf32>
    %23 = vector.shape_cast %22 : vector<1x16x16x128xf32> to vector<16x16x128xf32>
    %24 = vector.shape_cast %23 : vector<16x16x128xf32> to vector<256x128xf32>
    %c1_28 = arith.constant 1 : index
    %c0_29 = arith.constant 0 : index
    %c0_30 = arith.constant 0 : index
    %c0_31 = arith.constant 0 : index
    %25 = vector.load %arg3[%c1_28, %c0_29, %c0_30, %c0_31] : memref<3x3x128x128xf32, #tpu.memory_space<vmem>>, vector<1x1x128x128xf32>
    %26 = vector.shape_cast %25 : vector<1x1x128x128xf32> to vector<128x128xf32>
    %cst_32 = arith.constant dense<0.000000e+00> : vector<256x128xf32>
    %27 = tpu.matmul %24, %26, %cst_32 {dimension_numbers = #tpu.dot_dimension_numbers<[1], [0], [0], [1], [0, 0, 1, 1], [], []>} : vector<256x128xf32>, vector<128x128xf32>, vector<256x128xf32> -> vector<256x128xf32>
    %28 = arith.addf %21, %27 : vector<256x128xf32>
    %c0_33 = arith.constant 0 : index
    %c1_34 = arith.constant 1 : index
    %c1_35 = arith.constant 1 : index
    %c0_36 = arith.constant 0 : index
    %29 = vector.load %arg2[%c0_33, %c1_34, %c1_35, %c0_36] : memref<1x18x18x128xf32, #tpu.memory_space<vmem>>, vector<1x16x16x128xf32>
    %30 = vector.shape_cast %29 : vector<1x16x16x128xf32> to vector<16x16x128xf32>
    %31 = vector.shape_cast %30 : vector<16x16x128xf32> to vector<256x128xf32>
    %c1_37 = arith.constant 1 : index
    %c1_38 = arith.constant 1 : index
    %c0_39 = arith.constant 0 : index
    %c0_40 = arith.constant 0 : index
    %32 = vector.load %arg3[%c1_37, %c1_38, %c0_39, %c0_40] : memref<3x3x128x128xf32, #tpu.memory_space<vmem>>, vector<1x1x128x128xf32>
    %33 = vector.shape_cast %32 : vector<1x1x128x128xf32> to vector<128x128xf32>
    %cst_41 = arith.constant dense<0.000000e+00> : vector<256x128xf32>
    %34 = tpu.matmul %31, %33, %cst_41 {dimension_numbers = #tpu.dot_dimension_numbers<[1], [0], [0], [1], [0, 0, 1, 1], [], []>} : vector<256x128xf32>, vector<128x128xf32>, vector<256x128xf32> -> vector<256x128xf32>
    %35 = arith.addf %28, %34 : vector<256x128xf32>
    %c0_42 = arith.constant 0 : index
    %c1_43 = arith.constant 1 : index
    %c2_44 = arith.constant 2 : index
    %c0_45 = arith.constant 0 : index
    %36 = vector.load %arg2[%c0_42, %c1_43, %c2_44, %c0_45] : memref<1x18x18x128xf32, #tpu.memory_space<vmem>>, vector<1x16x16x128xf32>
    %37 = vector.shape_cast %36 : vector<1x16x16x128xf32> to vector<16x16x128xf32>
    %38 = vector.shape_cast %37 : vector<16x16x128xf32> to vector<256x128xf32>
    %c1_46 = arith.constant 1 : index
    %c2_47 = arith.constant 2 : index
    %c0_48 = arith.constant 0 : index
    %c0_49 = arith.constant 0 : index
    %39 = vector.load %arg3[%c1_46, %c2_47, %c0_48, %c0_49] : memref<3x3x128x128xf32, #tpu.memory_space<vmem>>, vector<1x1x128x128xf32>
    %40 = vector.shape_cast %39 : vector<1x1x128x128xf32> to vector<128x128xf32>
    %cst_50 = arith.constant dense<0.000000e+00> : vector<256x128xf32>
    %41 = tpu.matmul %38, %40, %cst_50 {dimension_numbers = #tpu.dot_dimension_numbers<[1], [0], [0], [1], [0, 0, 1, 1], [], []>} : vector<256x128xf32>, vector<128x128xf32>, vector<256x128xf32> -> vector<256x128xf32>
    %42 = arith.addf %35, %41 : vector<256x128xf32>
    %c0_51 = arith.constant 0 : index
    %c2_52 = arith.constant 2 : index
    %c0_53 = arith.constant 0 : index
    %c0_54 = arith.constant 0 : index
    %43 = vector.load %arg2[%c0_51, %c2_52, %c0_53, %c0_54] : memref<1x18x18x128xf32, #tpu.memory_space<vmem>>, vector<1x16x16x128xf32>
    %44 = vector.shape_cast %43 : vector<1x16x16x128xf32> to vector<16x16x128xf32>
    %45 = vector.shape_cast %44 : vector<16x16x128xf32> to vector<256x128xf32>
    %c2_55 = arith.constant 2 : index
    %c0_56 = arith.constant 0 : index
    %c0_57 = arith.constant 0 : index
    %c0_58 = arith.constant 0 : index
    %46 = vector.load %arg3[%c2_55, %c0_56, %c0_57, %c0_58] : memref<3x3x128x128xf32, #tpu.memory_space<vmem>>, vector<1x1x128x128xf32>
    %47 = vector.shape_cast %46 : vector<1x1x128x128xf32> to vector<128x128xf32>
    %cst_59 = arith.constant dense<0.000000e+00> : vector<256x128xf32>
    %48 = tpu.matmul %45, %47, %cst_59 {dimension_numbers = #tpu.dot_dimension_numbers<[1], [0], [0], [1], [0, 0, 1, 1], [], []>} : vector<256x128xf32>, vector<128x128xf32>, vector<256x128xf32> -> vector<256x128xf32>
    %49 = arith.addf %42, %48 : vector<256x128xf32>
    %c0_60 = arith.constant 0 : index
    %c2_61 = arith.constant 2 : index
    %c1_62 = arith.constant 1 : index
    %c0_63 = arith.constant 0 : index
    %50 = vector.load %arg2[%c0_60, %c2_61, %c1_62, %c0_63] : memref<1x18x18x128xf32, #tpu.memory_space<vmem>>, vector<1x16x16x128xf32>
    %51 = vector.shape_cast %50 : vector<1x16x16x128xf32> to vector<16x16x128xf32>
    %52 = vector.shape_cast %51 : vector<16x16x128xf32> to vector<256x128xf32>
    %c2_64 = arith.constant 2 : index
    %c1_65 = arith.constant 1 : index
    %c0_66 = arith.constant 0 : index
    %c0_67 = arith.constant 0 : index
    %53 = vector.load %arg3[%c2_64, %c1_65, %c0_66, %c0_67] : memref<3x3x128x128xf32, #tpu.memory_space<vmem>>, vector<1x1x128x128xf32>
    %54 = vector.shape_cast %53 : vector<1x1x128x128xf32> to vector<128x128xf32>
    %cst_68 = arith.constant dense<0.000000e+00> : vector<256x128xf32>
    %55 = tpu.matmul %52, %54, %cst_68 {dimension_numbers = #tpu.dot_dimension_numbers<[1], [0], [0], [1], [0, 0, 1, 1], [], []>} : vector<256x128xf32>, vector<128x128xf32>, vector<256x128xf32> -> vector<256x128xf32>
    %56 = arith.addf %49, %55 : vector<256x128xf32>
    %c0_69 = arith.constant 0 : index
    %c2_70 = arith.constant 2 : index
    %c2_71 = arith.constant 2 : index
    %c0_72 = arith.constant 0 : index
    %57 = vector.load %arg2[%c0_69, %c2_70, %c2_71, %c0_72] : memref<1x18x18x128xf32, #tpu.memory_space<vmem>>, vector<1x16x16x128xf32>
    %58 = vector.shape_cast %57 : vector<1x16x16x128xf32> to vector<16x16x128xf32>
    %59 = vector.shape_cast %58 : vector<16x16x128xf32> to vector<256x128xf32>
    %c2_73 = arith.constant 2 : index
    %c2_74 = arith.constant 2 : index
    %c0_75 = arith.constant 0 : index
    %c0_76 = arith.constant 0 : index
    %60 = vector.load %arg3[%c2_73, %c2_74, %c0_75, %c0_76] : memref<3x3x128x128xf32, #tpu.memory_space<vmem>>, vector<1x1x128x128xf32>
    %61 = vector.shape_cast %60 : vector<1x1x128x128xf32> to vector<128x128xf32>
    %cst_77 = arith.constant dense<0.000000e+00> : vector<256x128xf32>
    %62 = tpu.matmul %59, %61, %cst_77 {dimension_numbers = #tpu.dot_dimension_numbers<[1], [0], [0], [1], [0, 0, 1, 1], [], []>} : vector<256x128xf32>, vector<128x128xf32>, vector<256x128xf32> -> vector<256x128xf32>
    %63 = arith.addf %56, %62 : vector<256x128xf32>
    %cst_78 = arith.constant dense<0.000000e+00> : vector<128xf32>
    %64 = vector.multi_reduction <add>, %63, %cst_78 [0] : vector<256x128xf32> to vector<128xf32>
    %65 = vector.shape_cast %64 : vector<128xf32> to vector<1x128xf32>
    %c0_79 = arith.constant 0 : index
    %c0_80 = arith.constant 0 : index
    %c0_81 = arith.constant 0 : index
    %66 = vector.load %arg4[%c0_79, %c0_80, %c0_81] : memref<1x2x128xf32, #tpu.memory_space<vmem>>, vector<1x1x128xf32>
    %67 = vector.shape_cast %66 : vector<1x1x128xf32> to vector<1x128xf32>
    %68 = vector.shape_cast %65 : vector<1x128xf32> to vector<1x1x128xf32>
    tpu.vector_store %arg4[%c0_79, %c0_80, %c0_81], %68 {strides = array<i32>} : memref<1x2x128xf32, #tpu.memory_space<vmem>>, vector<1x1x128xf32>,
    %69 = arith.mulf %63, %63 : vector<256x128xf32>
    %cst_82 = arith.constant dense<0.000000e+00> : vector<128xf32>
    %70 = vector.multi_reduction <add>, %69, %cst_82 [0] : vector<256x128xf32> to vector<128xf32>
    %71 = vector.shape_cast %70 : vector<128xf32> to vector<1x128xf32>
    %c0_83 = arith.constant 0 : index
    %c1_84 = arith.constant 1 : index
    %c0_85 = arith.constant 0 : index
    %72 = vector.load %arg4[%c0_83, %c1_84, %c0_85] : memref<1x2x128xf32, #tpu.memory_space<vmem>>, vector<1x1x128xf32>
    %73 = vector.shape_cast %72 : vector<1x1x128xf32> to vector<1x128xf32>
    %74 = vector.shape_cast %71 : vector<1x128xf32> to vector<1x1x128xf32>
    tpu.vector_store %arg4[%c0_83, %c1_84, %c0_85], %74 {strides = array<i32>} : memref<1x2x128xf32, #tpu.memory_space<vmem>>, vector<1x1x128xf32>,
    return
  }
  func.func @transform_0(%arg0: i32, %arg1: i32) -> (i32, i32, i32, i32) {
    %c0_i32 = arith.constant 0 : i32
    %c0_i32_0 = arith.constant 0 : i32
    %c0_i32_1 = arith.constant 0 : i32
    %c0_i32_2 = arith.constant 0 : i32
    return %arg0, %c0_i32, %c0_i32_0, %c0_i32_1 : i32, i32, i32, i32
  }
  func.func @transform_1(%arg0: i32, %arg1: i32) -> (i32, i32, i32, i32) {
    %c0_i32 = arith.constant 0 : i32
    %c0_i32_0 = arith.constant 0 : i32
    %c0_i32_1 = arith.constant 0 : i32
    %c0_i32_2 = arith.constant 0 : i32
    return %c0_i32, %c0_i32_0, %c0_i32_1, %arg1 : i32, i32, i32, i32
  }
  func.func @transform_2(%arg0: i32, %arg1: i32) -> (i32, i32, i32) {
    %c0_i32 = arith.constant 0 : i32
    %c0_i32_0 = arith.constant 0 : i32
    return %arg0, %c0_i32, %arg1 : i32, i32, i32
  }
}

module attributes {stable_mosaic.version = 11 : i64} {
  func.func @_apply_kernel(%arg0: i32, %arg1: i32, %arg2: memref<1x18x18x128xf32, #tpu.memory_space<vmem>>, %arg3: memref<3x3x128x128xf32, #tpu.memory_space<vmem>>, %arg4: memref<1x128xf32, #tpu.memory_space<vmem>>, %arg5: memref<1x128xf32, #tpu.memory_space<vmem>>, %arg6: memref<1x16x16x128xf32, #tpu.memory_space<vmem>>) attributes {dimension_semantics = [#tpu.dimension_semantics<parallel>, #tpu.dimension_semantics<parallel>], iteration_bounds = array<i64: 2, 1>, scalar_prefetch = 0 : i64, scratch_operands = 0 : i64, tpu.core_type = #tpu.core_type<tc>, window_params = [{transform_indices = @transform_0, window_bounds = array<i64: 1, 18, 18, 128>}, {transform_indices = @transform_1, window_bounds = array<i64: 3, 3, 128, 128>}, {transform_indices = @transform_2, window_bounds = array<i64: 1, 128>}, {transform_indices = @transform_3, window_bounds = array<i64: 1, 128>}, {transform_indices = @transform_4, window_bounds = array<i64: 1, 16, 16, 128>}]} {
    %cst = arith.constant 0.000000e+00 : f32
    %0 = vector.broadcast %cst : f32 to vector<256x128xf32>
    %c0 = arith.constant 0 : index
    %c0_0 = arith.constant 0 : index
    %c0_1 = arith.constant 0 : index
    %c0_2 = arith.constant 0 : index
    %1 = vector.load %arg2[%c0, %c0_0, %c0_1, %c0_2] : memref<1x18x18x128xf32, #tpu.memory_space<vmem>>, vector<1x16x16x128xf32>
    %2 = vector.shape_cast %1 : vector<1x16x16x128xf32> to vector<16x16x128xf32>
    %3 = vector.shape_cast %2 : vector<16x16x128xf32> to vector<256x128xf32>
    %c0_3 = arith.constant 0 : index
    %c0_4 = arith.constant 0 : index
    %c0_5 = arith.constant 0 : index
    %c0_6 = arith.constant 0 : index
    %4 = vector.load %arg3[%c0_3, %c0_4, %c0_5, %c0_6] : memref<3x3x128x128xf32, #tpu.memory_space<vmem>>, vector<1x1x128x128xf32>
    %5 = vector.shape_cast %4 : vector<1x1x128x128xf32> to vector<128x128xf32>
    %cst_7 = arith.constant dense<0.000000e+00> : vector<256x128xf32>
    %6 = tpu.matmul %3, %5, %cst_7 {dimension_numbers = #tpu.dot_dimension_numbers<[1], [0], [0], [1], [0, 0, 1, 1], [], []>} : vector<256x128xf32>, vector<128x128xf32>, vector<256x128xf32> -> vector<256x128xf32>
    %7 = arith.addf %0, %6 : vector<256x128xf32>
    %c0_8 = arith.constant 0 : index
    %c0_9 = arith.constant 0 : index
    %c1 = arith.constant 1 : index
    %c0_10 = arith.constant 0 : index
    %8 = vector.load %arg2[%c0_8, %c0_9, %c1, %c0_10] : memref<1x18x18x128xf32, #tpu.memory_space<vmem>>, vector<1x16x16x128xf32>
    %9 = vector.shape_cast %8 : vector<1x16x16x128xf32> to vector<16x16x128xf32>
    %10 = vector.shape_cast %9 : vector<16x16x128xf32> to vector<256x128xf32>
    %c0_11 = arith.constant 0 : index
    %c1_12 = arith.constant 1 : index
    %c0_13 = arith.constant 0 : index
    %c0_14 = arith.constant 0 : index
    %11 = vector.load %arg3[%c0_11, %c1_12, %c0_13, %c0_14] : memref<3x3x128x128xf32, #tpu.memory_space<vmem>>, vector<1x1x128x128xf32>
    %12 = vector.shape_cast %11 : vector<1x1x128x128xf32> to vector<128x128xf32>
    %cst_15 = arith.constant dense<0.000000e+00> : vector<256x128xf32>
    %13 = tpu.matmul %10, %12, %cst_15 {dimension_numbers = #tpu.dot_dimension_numbers<[1], [0], [0], [1], [0, 0, 1, 1], [], []>} : vector<256x128xf32>, vector<128x128xf32>, vector<256x128xf32> -> vector<256x128xf32>
    %14 = arith.addf %7, %13 : vector<256x128xf32>
    %c0_16 = arith.constant 0 : index
    %c0_17 = arith.constant 0 : index
    %c2 = arith.constant 2 : index
    %c0_18 = arith.constant 0 : index
    %15 = vector.load %arg2[%c0_16, %c0_17, %c2, %c0_18] : memref<1x18x18x128xf32, #tpu.memory_space<vmem>>, vector<1x16x16x128xf32>
    %16 = vector.shape_cast %15 : vector<1x16x16x128xf32> to vector<16x16x128xf32>
    %17 = vector.shape_cast %16 : vector<16x16x128xf32> to vector<256x128xf32>
    %c0_19 = arith.constant 0 : index
    %c2_20 = arith.constant 2 : index
    %c0_21 = arith.constant 0 : index
    %c0_22 = arith.constant 0 : index
    %18 = vector.load %arg3[%c0_19, %c2_20, %c0_21, %c0_22] : memref<3x3x128x128xf32, #tpu.memory_space<vmem>>, vector<1x1x128x128xf32>
    %19 = vector.shape_cast %18 : vector<1x1x128x128xf32> to vector<128x128xf32>
    %cst_23 = arith.constant dense<0.000000e+00> : vector<256x128xf32>
    %20 = tpu.matmul %17, %19, %cst_23 {dimension_numbers = #tpu.dot_dimension_numbers<[1], [0], [0], [1], [0, 0, 1, 1], [], []>} : vector<256x128xf32>, vector<128x128xf32>, vector<256x128xf32> -> vector<256x128xf32>
    %21 = arith.addf %14, %20 : vector<256x128xf32>
    %c0_24 = arith.constant 0 : index
    %c1_25 = arith.constant 1 : index
    %c0_26 = arith.constant 0 : index
    %c0_27 = arith.constant 0 : index
    %22 = vector.load %arg2[%c0_24, %c1_25, %c0_26, %c0_27] : memref<1x18x18x128xf32, #tpu.memory_space<vmem>>, vector<1x16x16x128xf32>
    %23 = vector.shape_cast %22 : vector<1x16x16x128xf32> to vector<16x16x128xf32>
    %24 = vector.shape_cast %23 : vector<16x16x128xf32> to vector<256x128xf32>
    %c1_28 = arith.constant 1 : index
    %c0_29 = arith.constant 0 : index
    %c0_30 = arith.constant 0 : index
    %c0_31 = arith.constant 0 : index
    %25 = vector.load %arg3[%c1_28, %c0_29, %c0_30, %c0_31] : memref<3x3x128x128xf32, #tpu.memory_space<vmem>>, vector<1x1x128x128xf32>
    %26 = vector.shape_cast %25 : vector<1x1x128x128xf32> to vector<128x128xf32>
    %cst_32 = arith.constant dense<0.000000e+00> : vector<256x128xf32>
    %27 = tpu.matmul %24, %26, %cst_32 {dimension_numbers = #tpu.dot_dimension_numbers<[1], [0], [0], [1], [0, 0, 1, 1], [], []>} : vector<256x128xf32>, vector<128x128xf32>, vector<256x128xf32> -> vector<256x128xf32>
    %28 = arith.addf %21, %27 : vector<256x128xf32>
    %c0_33 = arith.constant 0 : index
    %c1_34 = arith.constant 1 : index
    %c1_35 = arith.constant 1 : index
    %c0_36 = arith.constant 0 : index
    %29 = vector.load %arg2[%c0_33, %c1_34, %c1_35, %c0_36] : memref<1x18x18x128xf32, #tpu.memory_space<vmem>>, vector<1x16x16x128xf32>
    %30 = vector.shape_cast %29 : vector<1x16x16x128xf32> to vector<16x16x128xf32>
    %31 = vector.shape_cast %30 : vector<16x16x128xf32> to vector<256x128xf32>
    %c1_37 = arith.constant 1 : index
    %c1_38 = arith.constant 1 : index
    %c0_39 = arith.constant 0 : index
    %c0_40 = arith.constant 0 : index
    %32 = vector.load %arg3[%c1_37, %c1_38, %c0_39, %c0_40] : memref<3x3x128x128xf32, #tpu.memory_space<vmem>>, vector<1x1x128x128xf32>
    %33 = vector.shape_cast %32 : vector<1x1x128x128xf32> to vector<128x128xf32>
    %cst_41 = arith.constant dense<0.000000e+00> : vector<256x128xf32>
    %34 = tpu.matmul %31, %33, %cst_41 {dimension_numbers = #tpu.dot_dimension_numbers<[1], [0], [0], [1], [0, 0, 1, 1], [], []>} : vector<256x128xf32>, vector<128x128xf32>, vector<256x128xf32> -> vector<256x128xf32>
    %35 = arith.addf %28, %34 : vector<256x128xf32>
    %c0_42 = arith.constant 0 : index
    %c1_43 = arith.constant 1 : index
    %c2_44 = arith.constant 2 : index
    %c0_45 = arith.constant 0 : index
    %36 = vector.load %arg2[%c0_42, %c1_43, %c2_44, %c0_45] : memref<1x18x18x128xf32, #tpu.memory_space<vmem>>, vector<1x16x16x128xf32>
    %37 = vector.shape_cast %36 : vector<1x16x16x128xf32> to vector<16x16x128xf32>
    %38 = vector.shape_cast %37 : vector<16x16x128xf32> to vector<256x128xf32>
    %c1_46 = arith.constant 1 : index
    %c2_47 = arith.constant 2 : index
    %c0_48 = arith.constant 0 : index
    %c0_49 = arith.constant 0 : index
    %39 = vector.load %arg3[%c1_46, %c2_47, %c0_48, %c0_49] : memref<3x3x128x128xf32, #tpu.memory_space<vmem>>, vector<1x1x128x128xf32>
    %40 = vector.shape_cast %39 : vector<1x1x128x128xf32> to vector<128x128xf32>
    %cst_50 = arith.constant dense<0.000000e+00> : vector<256x128xf32>
    %41 = tpu.matmul %38, %40, %cst_50 {dimension_numbers = #tpu.dot_dimension_numbers<[1], [0], [0], [1], [0, 0, 1, 1], [], []>} : vector<256x128xf32>, vector<128x128xf32>, vector<256x128xf32> -> vector<256x128xf32>
    %42 = arith.addf %35, %41 : vector<256x128xf32>
    %c0_51 = arith.constant 0 : index
    %c2_52 = arith.constant 2 : index
    %c0_53 = arith.constant 0 : index
    %c0_54 = arith.constant 0 : index
    %43 = vector.load %arg2[%c0_51, %c2_52, %c0_53, %c0_54] : memref<1x18x18x128xf32, #tpu.memory_space<vmem>>, vector<1x16x16x128xf32>
    %44 = vector.shape_cast %43 : vector<1x16x16x128xf32> to vector<16x16x128xf32>
    %45 = vector.shape_cast %44 : vector<16x16x128xf32> to vector<256x128xf32>
    %c2_55 = arith.constant 2 : index
    %c0_56 = arith.constant 0 : index
    %c0_57 = arith.constant 0 : index
    %c0_58 = arith.constant 0 : index
    %46 = vector.load %arg3[%c2_55, %c0_56, %c0_57, %c0_58] : memref<3x3x128x128xf32, #tpu.memory_space<vmem>>, vector<1x1x128x128xf32>
    %47 = vector.shape_cast %46 : vector<1x1x128x128xf32> to vector<128x128xf32>
    %cst_59 = arith.constant dense<0.000000e+00> : vector<256x128xf32>
    %48 = tpu.matmul %45, %47, %cst_59 {dimension_numbers = #tpu.dot_dimension_numbers<[1], [0], [0], [1], [0, 0, 1, 1], [], []>} : vector<256x128xf32>, vector<128x128xf32>, vector<256x128xf32> -> vector<256x128xf32>
    %49 = arith.addf %42, %48 : vector<256x128xf32>
    %c0_60 = arith.constant 0 : index
    %c2_61 = arith.constant 2 : index
    %c1_62 = arith.constant 1 : index
    %c0_63 = arith.constant 0 : index
    %50 = vector.load %arg2[%c0_60, %c2_61, %c1_62, %c0_63] : memref<1x18x18x128xf32, #tpu.memory_space<vmem>>, vector<1x16x16x128xf32>
    %51 = vector.shape_cast %50 : vector<1x16x16x128xf32> to vector<16x16x128xf32>
    %52 = vector.shape_cast %51 : vector<16x16x128xf32> to vector<256x128xf32>
    %c2_64 = arith.constant 2 : index
    %c1_65 = arith.constant 1 : index
    %c0_66 = arith.constant 0 : index
    %c0_67 = arith.constant 0 : index
    %53 = vector.load %arg3[%c2_64, %c1_65, %c0_66, %c0_67] : memref<3x3x128x128xf32, #tpu.memory_space<vmem>>, vector<1x1x128x128xf32>
    %54 = vector.shape_cast %53 : vector<1x1x128x128xf32> to vector<128x128xf32>
    %cst_68 = arith.constant dense<0.000000e+00> : vector<256x128xf32>
    %55 = tpu.matmul %52, %54, %cst_68 {dimension_numbers = #tpu.dot_dimension_numbers<[1], [0], [0], [1], [0, 0, 1, 1], [], []>} : vector<256x128xf32>, vector<128x128xf32>, vector<256x128xf32> -> vector<256x128xf32>
    %56 = arith.addf %49, %55 : vector<256x128xf32>
    %c0_69 = arith.constant 0 : index
    %c2_70 = arith.constant 2 : index
    %c2_71 = arith.constant 2 : index
    %c0_72 = arith.constant 0 : index
    %57 = vector.load %arg2[%c0_69, %c2_70, %c2_71, %c0_72] : memref<1x18x18x128xf32, #tpu.memory_space<vmem>>, vector<1x16x16x128xf32>
    %58 = vector.shape_cast %57 : vector<1x16x16x128xf32> to vector<16x16x128xf32>
    %59 = vector.shape_cast %58 : vector<16x16x128xf32> to vector<256x128xf32>
    %c2_73 = arith.constant 2 : index
    %c2_74 = arith.constant 2 : index
    %c0_75 = arith.constant 0 : index
    %c0_76 = arith.constant 0 : index
    %60 = vector.load %arg3[%c2_73, %c2_74, %c0_75, %c0_76] : memref<3x3x128x128xf32, #tpu.memory_space<vmem>>, vector<1x1x128x128xf32>
    %61 = vector.shape_cast %60 : vector<1x1x128x128xf32> to vector<128x128xf32>
    %cst_77 = arith.constant dense<0.000000e+00> : vector<256x128xf32>
    %62 = tpu.matmul %59, %61, %cst_77 {dimension_numbers = #tpu.dot_dimension_numbers<[1], [0], [0], [1], [0, 0, 1, 1], [], []>} : vector<256x128xf32>, vector<128x128xf32>, vector<256x128xf32> -> vector<256x128xf32>
    %63 = arith.addf %56, %62 : vector<256x128xf32>
    %c0_78 = arith.constant 0 : index
    %c0_79 = arith.constant 0 : index
    %64 = vector.load %arg4[%c0_78, %c0_79] : memref<1x128xf32, #tpu.memory_space<vmem>>, vector<1x128xf32>
    %65 = vector.broadcast %64 : vector<1x128xf32> to vector<256x128xf32>
    %66 = arith.mulf %63, %65 : vector<256x128xf32>
    %c0_80 = arith.constant 0 : index
    %c0_81 = arith.constant 0 : index
    %67 = vector.load %arg5[%c0_80, %c0_81] : memref<1x128xf32, #tpu.memory_space<vmem>>, vector<1x128xf32>
    %68 = vector.broadcast %67 : vector<1x128xf32> to vector<256x128xf32>
    %69 = arith.addf %66, %68 : vector<256x128xf32>
    %cst_82 = arith.constant 0.000000e+00 : f32
    %70 = vector.broadcast %cst_82 : f32 to vector<256x128xf32>
    %71 = arith.cmpf ogt, %69, %70 : vector<256x128xf32>
    %cst_83 = arith.constant 1.000000e-01 : f32
    %72 = vector.broadcast %cst_83 : f32 to vector<256x128xf32>
    %73 = arith.mulf %72, %69 : vector<256x128xf32>
    %74 = arith.select %71, %69, %73 : vector<256x128xi1>, vector<256x128xf32>
    %75 = vector.shape_cast %74 : vector<256x128xf32> to vector<16x16x128xf32>
    %c0_84 = arith.constant 0 : index
    %c0_85 = arith.constant 0 : index
    %c0_86 = arith.constant 0 : index
    %c0_87 = arith.constant 0 : index
    %76 = vector.load %arg6[%c0_84, %c0_85, %c0_86, %c0_87] : memref<1x16x16x128xf32, #tpu.memory_space<vmem>>, vector<1x16x16x128xf32>
    %77 = vector.shape_cast %76 : vector<1x16x16x128xf32> to vector<16x16x128xf32>
    %78 = vector.shape_cast %75 : vector<16x16x128xf32> to vector<1x16x16x128xf32>
    tpu.vector_store %arg6[%c0_84, %c0_85, %c0_86, %c0_87], %78 {strides = array<i32>} : memref<1x16x16x128xf32, #tpu.memory_space<vmem>>, vector<1x16x16x128xf32>,
    return
  }
  func.func @transform_0(%arg0: i32, %arg1: i32) -> (i32, i32, i32, i32) {
    %c0_i32 = arith.constant 0 : i32
    %c0_i32_0 = arith.constant 0 : i32
    %c0_i32_1 = arith.constant 0 : i32
    %c0_i32_2 = arith.constant 0 : i32
    return %arg0, %c0_i32, %c0_i32_0, %c0_i32_1 : i32, i32, i32, i32
  }
  func.func @transform_1(%arg0: i32, %arg1: i32) -> (i32, i32, i32, i32) {
    %c0_i32 = arith.constant 0 : i32
    %c0_i32_0 = arith.constant 0 : i32
    %c0_i32_1 = arith.constant 0 : i32
    %c0_i32_2 = arith.constant 0 : i32
    return %c0_i32, %c0_i32_0, %c0_i32_1, %arg1 : i32, i32, i32, i32
  }
  func.func @transform_2(%arg0: i32, %arg1: i32) -> (i32, i32) {
    %c0_i32 = arith.constant 0 : i32
    %c0_i32_0 = arith.constant 0 : i32
    return %c0_i32, %arg1 : i32, i32
  }
  func.func @transform_3(%arg0: i32, %arg1: i32) -> (i32, i32) {
    %c0_i32 = arith.constant 0 : i32
    %c0_i32_0 = arith.constant 0 : i32
    return %c0_i32, %arg1 : i32, i32
  }
  func.func @transform_4(%arg0: i32, %arg1: i32) -> (i32, i32, i32, i32) {
    %c0_i32 = arith.constant 0 : i32
    %c0_i32_0 = arith.constant 0 : i32
    %c0_i32_1 = arith.constant 0 : i32
    return %arg0, %c0_i32, %c0_i32_0, %arg1 : i32, i32, i32, i32
  }
}

</mosaic_0001>

<bundles_post_ra>
// kernel: cnn_block_forward.2
= control target key start
LH: loop header
LB: loop body
LE: loop exit
PB: predicated region body
PF: predicated region fallthrough
CT: control target
= control target key end

     0   :  { %s4643_s9 = smov 0   ;;  %s4645_s10 = smov 0   ;;  %s6126_s0 = inlined_call_operand.vmem [shape: f32[2,18,18,128], index: 0, kind: input, shape index: {}]   ;;  %s6127_s1 = inlined_call_operand.vmem [shape: f32[3,3,128,128], index: 1, kind: input, shape index: {}]   ;;  %s6128_s2 = inlined_call_operand.vmem [shape: f32[2,2,128], index: 2, kind: output, shape index: {}]  }
   0x1   :  { %s4647_s11 = smov 0  }
   0x2 LB: > { %s24_s12 = sadd.s32 1, %s4622_s10  ;;  %p3070_p0 = scmp.ge.s32.totalorder %s4626_s11, 1  ;;  %s4626_s11 = sphi %s4647_s11, %s12_s11   ;;  %s4622_s10 = sphi %s4645_s10, %s6248_s10   ;;  %s4618_s9 = sphi %s4643_s9, %s6247_s9  }
   0x3   : > { %p26_p1 = scmp.ge.s32.totalorder %s24_s12, 2  ;;  %p135_p2 = scmp.lt.s32.totalorder %s4626_s11, 3 }
   0x5   : > { %s6250_s12 = smov (%p26_p1, %s24_s12), 0  ;;  %p136_p3 = pnand %p3070_p0, %p135_p2 }
   0x7   : > { %139 = sbr.rel (%p136_p3) target bundleno = 563 (0x233), region = 28 }
   0xc   : > { %v3088_v0 = vld [vmem:[%s6127_s1 + $0xf8] sm:$0xff]  ;;  %v3087_v1 = vld [vmem:[%s6127_s1 + $0xf0] sm:$0xff]  ;;  %v3086_v2 = vld [vmem:[%s6127_s1 + $0xe8] sm:$0xff]  ;;  %p163_p4 = scmp.lt.s32.totalorder %s4618_s9, 1 }
   0xd   : > { %4547 = vmatprep.subr.mxu1 %v3088_v0  ;;  %3827 = vmatprep.subr.mxu0 %v3088_v0  ;;  %v3085_v3 = vld [vmem:[%s6127_s1 + $0xe0] sm:$0xff]  ;;  %v3084_v4 = vld [vmem:[%s6127_s1 + $0xd8] sm:$0xff]  ;;  %v3083_v5 = vld [vmem:[%s6127_s1 + $0xd0] sm:$0xff] }
   0xe   : > { %4563 = vmatpush3.msra.mxu1 %v3088_v0  ;;  %3828 = vmatpush3.msra.mxu0 %v3088_v0  ;;  %v3082_v6 = vld [vmem:[%s6127_s1 + $0xc8] sm:$0xff]  ;;  %v3081_v7 = vld [vmem:[%s6127_s1 + $0xc0] sm:$0xff]  ;;  %v3080_v8 = vld [vmem:[%s6127_s1 + $0xb8] sm:$0xff]  ;;  %s6252_s9 = smov (!%p163_p4, %s4618_s9), 1 }
   0xf   : > { %4548 = vmatprep.subr.mxu1 %v3087_v1  ;;  %3829 = vmatprep.subr.mxu0 %v3087_v1  ;;  %v3079_v9 = vld [vmem:[%s6127_s1 + $0xb0] sm:$0xff]  ;;  %v3078_v10 = vld [vmem:[%s6127_s1 + $0xa8] sm:$0xff]  ;;  %v3077_v11 = vld [vmem:[%s6127_s1 + $0xa0] sm:$0xff]  ;;  %s4579_s15 = smul.u32 432, %s6252_s9 }
  0x10   : > { %4564 = vmatpush3.msra.mxu1 %v3087_v1  ;;  %3830 = vmatpush3.msra.mxu0 %v3087_v1  ;;  %v3076_v12 = vld [vmem:[%s6127_s1 + $0x98] sm:$0xff]  ;;  %v3075_v13 = vld [vmem:[%s6127_s1 + $0x90] sm:$0xff]  ;;  %v3074_v14 = vld [vmem:[%s6127_s1 + $0x88] sm:$0xff] }
  0x11   : > { %4549 = vmatprep.subr.mxu1 %v3086_v2  ;;  %3831 = vmatprep.subr.mxu0 %v3086_v2  ;;  %s4716_s22 = scalar_lea.vmem %s6126_s0, %s4579_s15  ;;  %v3073_v15 = vld [vmem:[%s6127_s1 + $0x80] sm:$0xff]  ;;  %v226_v19 = vld [vmem:[%s6127_s1 + $0x78] sm:$0xff]  ;;  %v225_v22 = vld [vmem:[%s6127_s1 + $0x70] sm:$0xff] }
  0x12   : > { %4565 = vmatpush3.msra.mxu1 %v3086_v2  ;;  %3832 = vmatpush3.msra.mxu0 %v3086_v2  ;;  %v4722_v16 = vld [vmem:[%s4716_s22 + $0xc1] sm:$0xff]  ;;  %v4726_v18 = vld [vmem:[%s4716_s22 + $0xc9] sm:$0xff]  ;;  %v3104_v21 = vld [vmem:[%s6127_s1 + $0x178] sm:$0xff] }
  0x13   : > { %4550 = vmatprep.subr.mxu1 %v3085_v3  ;;  %3833 = vmatprep.subr.mxu0 %v3085_v3  ;;  %v227_v17 = vld [vmem:[%s4716_s22 + $0x1] sm:$0xff]  ;;  %v228_v20 = vld [vmem:[%s4716_s22 + $0x9] sm:$0xff]  ;;  %v4741_v23 = vld [vmem:[%s4716_s22 + $0xd9] sm:$0xff] }
  0x14   : > { %4566 = vmatpush3.msra.mxu1 %v3085_v3  ;;  %3834 = vmatpush3.msra.mxu0 %v3085_v3  ;;  %v3103_v24 = vld [vmem:[%s6127_s1 + $0x170] sm:$0xff]  ;;  %v4747_v25 = vld [vmem:[%s4716_s22 + $0x19] sm:$0xff]  ;;  %v4750_v26 = vld [vmem:[%s4716_s22 + $0xe1] sm:$0xff] }
  0x15   : > { %4551 = vmatprep.subr.mxu1 %v3084_v4  ;;  %3835 = vmatprep.subr.mxu0 %v3084_v4  ;;  %v224_v27 = vld [vmem:[%s6127_s1 + $0x68] sm:$0xff]  ;;  %v223_v30 = vld [vmem:[%s6127_s1 + $0x60] sm:$0xff]  ;;  %v4768_v31 = vld [vmem:[%s4716_s22 + $0xf1] sm:$0xff] }
  0x16   : > { %4567 = vmatpush3.msra.mxu1 %v3084_v4  ;;  %3836 = vmatpush3.msra.mxu0 %v3084_v4  ;;  %v4757_v28 = vld [vmem:[%s4716_s22 + $0x21] sm:$0xff]  ;;  %v4775_v33 = vld [vmem:[%s4716_s22 + $0x31] sm:$0xff]  ;;  %v4778_v34 = vld [vmem:[%s4716_s22 + $0xf9] sm:$0xff] }
  0x17   : > { %4552 = vmatprep.subr.mxu1 %v3083_v5  ;;  %3837 = vmatprep.subr.mxu0 %v3083_v5  ;;  %v3102_v29 = vld [vmem:[%s6127_s1 + $0x168] sm:$0xff]  ;;  %v3101_v32 = vld [vmem:[%s6127_s1 + $0x160] sm:$0xff]  ;;  %v222_v35 = vld [vmem:[%s6127_s1 + $0x58] sm:$0xff] }
  0x18   : > { %4568 = vmatpush3.msra.mxu1 %v3083_v5  ;;  %3838 = vmatpush3.msra.mxu0 %v3083_v5  ;;  %v4785_v36 = vld [vmem:[%s4716_s22 + $0x39] sm:$0xff]  ;;  %v221_v38 = vld [vmem:[%s6127_s1 + $0x50] sm:$0xff]  ;;  %v220_v43 = vld [vmem:[%s6127_s1 + $0x48] sm:$0xff] }
  0x19   : > { %4553 = vmatprep.subr.mxu1 %v3082_v6  ;;  %3839 = vmatprep.subr.mxu0 %v3082_v6  ;;  %v3100_v37 = vld [vmem:[%s6127_s1 + $0x158] sm:$0xff]  ;;  %v4796_v39 = vld [vmem:[%s4716_s22 + $0x109] sm:$0xff]  ;;  %v219_v46 = vld [vmem:[%s6127_s1 + $0x40] sm:$0xff] }
  0x1a   : > { %4569 = vmatpush3.msra.mxu1 %v3082_v6  ;;  %3840 = vmatpush3.msra.mxu0 %v3082_v6  ;;  %v3099_v40 = vld [vmem:[%s6127_s1 + $0x150] sm:$0xff]  ;;  %v3098_v45 = vld [vmem:[%s6127_s1 + $0x148] sm:$0xff]  ;;  %v3097_v48 = vld [vmem:[%s6127_s1 + $0x140] sm:$0xff] }
  0x1b   : > { %4554 = vmatprep.subr.mxu1 %v3081_v7  ;;  %3841 = vmatprep.subr.mxu0 %v3081_v7  ;;  %v4803_v41 = vld [vmem:[%s4716_s22 + $0x49] sm:$0xff]  ;;  %v4806_v42 = vld [vmem:[%s4716_s22 + $0x111] sm:$0xff]  ;;  %v4824_v47 = vld [vmem:[%s4716_s22 + $0x121] sm:$0xff] }
  0x1c   : > { %4570 = vmatpush3.msra.mxu1 %v3081_v7  ;;  %3842 = vmatpush3.msra.mxu0 %v3081_v7  ;;  %v4813_v44 = vld [vmem:[%s4716_s22 + $0x51] sm:$0xff]  ;;  %v4831_v49 = vld [vmem:[%s4716_s22 + $0x61] sm:$0xff]  ;;  %v4834_v50 = vld [vmem:[%s4716_s22 + $0x129] sm:$0xff] }
  0x1d   : > { %4555 = vmatprep.subr.mxu1 %v3080_v8  ;;  %3843 = vmatprep.subr.mxu0 %v3080_v8  ;;  %v218_v51 = vld [vmem:[%s6127_s1 + $0x38] sm:$0xff]  ;;  %v4841_v52 = vld [vmem:[%s4716_s22 + $0x69] sm:$0xff]  ;;  %v4862_v58 = vld [vmem:[%s4716_s22 + $0x141] sm:$0xff] }
  0x1e   : > { %4571 = vmatpush3.msra.mxu1 %v3080_v8  ;;  %3844 = vmatpush3.msra.mxu0 %v3080_v8  ;;  %v3096_v53 = vld [vmem:[%s6127_s1 + $0x138] sm:$0xff]  ;;  %v217_v54 = vld [vmem:[%s6127_s1 + $0x30] sm:$0xff]  ;;  %v216_v59 = vld [vmem:[%s6127_s1 + $0x28] sm:$0xff] }
  0x1f   : > { %4556 = vmatprep.subr.mxu1 %v3079_v9  ;;  %3845 = vmatprep.subr.mxu0 %v3079_v9  ;;  %v4852_v55 = vld [vmem:[%s4716_s22 + $0x139] sm:$0xff]  ;;  %v3095_v56 = vld [vmem:[%s6127_s1 + $0x130] sm:$0xff]  ;;  %v4869_v60 = vld [vmem:[%s4716_s22 + $0x81] sm:$0xff] }
  0x20   : > { %4572 = vmatpush3.msra.mxu1 %v3079_v9  ;;  %3846 = vmatpush3.msra.mxu0 %v3079_v9  ;;  %v4859_v57 = vld [vmem:[%s4716_s22 + $0x79] sm:$0xff]  ;;  %v3094_v61 = vld [vmem:[%s6127_s1 + $0x128] sm:$0xff]  ;;  %v4880_v63 = vld [vmem:[%s4716_s22 + $0x151] sm:$0xff] }
  0x21   : > { %4557 = vmatprep.subr.mxu1 %v3078_v10  ;;  %3847 = vmatprep.subr.mxu0 %v3078_v10  ;;  %v215_v62 = vld [vmem:[%s6127_s1 + $0x20] sm:$0xff]  ;;  %v4887_v1 = vld [vmem:[%s4716_s22 + $0x91] sm:$0xff]  ;;  %v4908_v7 = vld [vmem:[%s4716_s22 + $0x169] sm:$0xff] }
  0x22   : > { %4573 = vmatpush3.msra.mxu1 %v3078_v10  ;;  %3848 = vmatpush3.msra.mxu0 %v3078_v10  ;;  %v3093_v0 = vld [vmem:[%s6127_s1 + $0x120] sm:$0xff]  ;;  %v214_v3 = vld [vmem:[%s6127_s1 + $0x18] sm:$0xff]  ;;  %v213_v6 = vld [vmem:[%s6127_s1 + $0x10] sm:$0xff]  ;;  %6160 = vst [vmem:[#allocation3_spill] sm:$0xff] %v4908_v7 }
  0x23   : > { %4558 = vmatprep.subr.mxu1 %v3077_v11  ;;  %3849 = vmatprep.subr.mxu0 %v3077_v11  ;;  %v4890_v2 = vld [vmem:[%s4716_s22 + $0x159] sm:$0xff]  ;;  %v3091_v8 = vld [vmem:[%s6127_s1 + $0x110] sm:$0xff] }
  0x24   : > { %4574 = vmatpush3.msra.mxu1 %v3077_v11  ;;  %3850 = vmatpush3.msra.mxu0 %v3077_v11  ;;  %6159 = vst [vmem:[#allocation2_spill] sm:$0xff] %v4890_v2  ;;  %v4897_v4 = vld [vmem:[%s4716_s22 + $0x99] sm:$0xff]  ;;  %v4915_v9 = vld [vmem:[%s4716_s22 + $0xa9] sm:$0xff]  ;;  %v4918_v10 = vld [vmem:[%s4716_s22 + $0x171] sm:$0xff] }
  0x25   : > { %4559 = vmatprep.subr.mxu1 %v3076_v12  ;;  %3851 = vmatprep.subr.mxu0 %v3076_v12  ;;  %v3092_v5 = vld [vmem:[%s6127_s1 + $0x118] sm:$0xff]  ;;  %6161 = vst [vmem:[#allocation4_spill] sm:$0xff] %v4918_v10  ;;  %v212_v11 = vld [vmem:[%s6127_s1 + $0x8] sm:$0xff] }
  0x26   : > { %4575 = vmatpush3.msra.mxu1 %v3076_v12  ;;  %3852 = vmatpush3.msra.mxu0 %v3076_v12  ;;  %v4925_v12 = vld [vmem:[%s4716_s22 + $0xb1] sm:$0xff] }
  0x27   : > { %4560 = vmatprep.subr.mxu1 %v3075_v13  ;;  %3853 = vmatprep.subr.mxu0 %v3075_v13 }
  0x28   : > { %4576 = vmatpush3.msra.mxu1 %v3075_v13  ;;  %3854 = vmatpush3.msra.mxu0 %v3075_v13  ;;  %v3090_v13 = vld [vmem:[%s6127_s1 + $0x108] sm:$0xff] }
  0x29   : > { %4561 = vmatprep.subr.mxu1 %v3074_v14  ;;  %3855 = vmatprep.subr.mxu0 %v3074_v14 }
  0x2a   : > { %4577 = vmatpush3.msra.mxu1 %v3074_v14  ;;  %3856 = vmatpush3.msra.mxu0 %v3074_v14  ;;  %v211_v14 = vld [vmem:[%s6127_s1] sm:$0xff] }
  0x2b   : > { %4562 = vmatprep.subr.mxu1 %v3073_v15  ;;  %3857 = vmatprep.subr.mxu0 %v3073_v15 }
  0x2c   : > { %4578 = vmatpush3.msra.mxu1 %v3073_v15  ;;  %3883 = vmatprep.mubr.f32.mxu1 %v4722_v16 }
  0x2d   : > { %3858 = vmatpush3.msra.mxu0 %v3073_v15  ;;  %3859 = vmatprep.mubr.f32.mxu0 %v227_v17  ;;  %v179_v15 = vld [vmem:[%s4716_s22] sm:$0xff] }
  0x2e   : > { %3884 = vmatmul.mubr.f32.vlgmr.msra.gmra.mxu1 %v4726_v18  ;;  %3907 = vmatprep.subr.mxu1 %v226_v19  ;;  %v3089_v17 = vld [vmem:[%s6127_s1 + $0x100] sm:$0xff] }
  0x2f   : > { %3860 = vmatmul.mubr.f32.vlgmr.msra.gmra.mxu0 %v228_v20  ;;  %3908 = vmatpush3.msra.mxu1 %v226_v19  ;;  %v180_v19 = vld [vmem:[%s4716_s22 + $0x8] sm:$0xff] }
  0x30   : > { %3987 = vmatprep.subr.mxu0 %v3104_v21  ;;  %3909 = vmatprep.subr.mxu1 %v225_v22  ;;  %v726_v20 = vld [vmem:[%s4716_s22 + $0x2] sm:$0xff] }
  0x31   : > { %3988 = vmatpush3.msra.mxu0 %v3104_v21  ;;  %3886 = vmatprep.mubr.f32.mxu1 %v4741_v23  ;;  %v3152_v21 = vld [vmem:[%s6127_s1 + $0x1f8] sm:$0xff] }
  0x32   : > { %3910 = vmatpush3.msra.mxu1 %v225_v22  ;;  %3989 = vmatprep.subr.mxu0 %v3103_v24  ;;  %v727_v22 = vld [vmem:[%s4716_s22 + $0xa] sm:$0xff] }
  0x33   : > { %3862 = vmatprep.mubr.f32.mxu0 %v4747_v25  ;;  %3887 = vmatmul.mubr.f32.gmra.mxu1 %v4750_v26 }
  0x34   : > { %3911 = vmatprep.subr.mxu1 %v224_v27  ;;  %3990 = vmatpush3.msra.mxu0 %v3103_v24  ;;  %v3200_v24 = vld [vmem:[%s6127_s1 + $0x278] sm:$0xff] }
  0x35   : > { %3863 = vmatmul.mubr.f32.gmra.mxu0 %v4757_v28  ;;  %3912 = vmatpush3.msra.mxu1 %v224_v27  ;;  %v4950_v27 = vld [vmem:[%s4716_s22 + $0x18] sm:$0xff] }
  0x36   : > { %3991 = vmatprep.subr.mxu0 %v3102_v29  ;;  %3913 = vmatprep.subr.mxu1 %v223_v30 }
  0x37   : > { %3992 = vmatpush3.msra.mxu0 %v3102_v29  ;;  %3889 = vmatprep.mubr.f32.mxu1 %v4768_v31  ;;  %v4953_v29 = vld [vmem:[%s4716_s22 + $0x20] sm:$0xff] }
  0x38   : > { %3914 = vmatpush3.msra.mxu1 %v223_v30  ;;  %3993 = vmatprep.subr.mxu0 %v3101_v32  ;;  %v4956_v30 = vld [vmem:[%s4716_s22 + $0x1a] sm:$0xff] }
  0x39   : > { %3865 = vmatprep.mubr.f32.mxu0 %v4775_v33  ;;  %3890 = vmatmul.mubr.f32.gmra.mxu1 %v4778_v34  ;;  %6162 = vst [vmem:[#allocation5_spill] sm:$0xff] %v4956_v30 }
  0x3a   : > { %3915 = vmatprep.subr.mxu1 %v222_v35  ;;  %3994 = vmatpush3.msra.mxu0 %v3101_v32  ;;  %v3151_v32 = vld [vmem:[%s6127_s1 + $0x1f0] sm:$0xff] }
  0x3b   : > { %3866 = vmatmul.mubr.f32.gmra.mxu0 %v4785_v36  ;;  %3916 = vmatpush3.msra.mxu1 %v222_v35  ;;  %v4963_v35 = vld [vmem:[%s4716_s22 + $0x22] sm:$0xff] }
  0x3c   : > { %3995 = vmatprep.subr.mxu0 %v3100_v37  ;;  %3917 = vmatprep.subr.mxu1 %v221_v38  ;;  %6163 = vst [vmem:[#allocation6_spill] sm:$0xff] %v4963_v35 }
  0x3d   : > { %3996 = vmatpush3.msra.mxu0 %v3100_v37  ;;  %3892 = vmatprep.mubr.f32.mxu1 %v4796_v39  ;;  %v3199_v37 = vld [vmem:[%s6127_s1 + $0x270] sm:$0xff] }
  0x3e   : > { %3918 = vmatpush3.msra.mxu1 %v221_v38  ;;  %3997 = vmatprep.subr.mxu0 %v3099_v40  ;;  %v4970_v38 = vld [vmem:[%s4716_s22 + $0x30] sm:$0xff] }
  0x3f   : > { %3868 = vmatprep.mubr.f32.mxu0 %v4803_v41  ;;  %3893 = vmatmul.mubr.f32.gmra.mxu1 %v4806_v42 }
  0x40   : > { %3919 = vmatprep.subr.mxu1 %v220_v43  ;;  %3998 = vmatpush3.msra.mxu0 %v3099_v40  ;;  %v4974_v40 = vld [vmem:[%s4716_s22 + $0x38] sm:$0xff] }
  0x41   : > { %3869 = vmatmul.mubr.f32.gmra.mxu0 %v4813_v44  ;;  %3920 = vmatpush3.msra.mxu1 %v220_v43  ;;  %v4978_v43 = vld [vmem:[%s4716_s22 + $0x32] sm:$0xff] }
  0x42   : > { %3999 = vmatprep.subr.mxu0 %v3098_v45  ;;  %3921 = vmatprep.subr.mxu1 %v219_v46  ;;  %6164 = vst [vmem:[#allocation7_spill] sm:$0xff] %v4978_v43 }
  0x43   : > { %4000 = vmatpush3.msra.mxu0 %v3098_v45  ;;  %3895 = vmatprep.mubr.f32.mxu1 %v4824_v47  ;;  %v3150_v45 = vld [vmem:[%s6127_s1 + $0x1e8] sm:$0xff] }
  0x44   : > { %3922 = vmatpush3.msra.mxu1 %v219_v46  ;;  %4001 = vmatprep.subr.mxu0 %v3097_v48  ;;  %v4985_v46 = vld [vmem:[%s4716_s22 + $0x3a] sm:$0xff] }
  0x45   : > { %3871 = vmatprep.mubr.f32.mxu0 %v4831_v49  ;;  %3896 = vmatmul.mubr.f32.gmra.mxu1 %v4834_v50  ;;  %6165 = vst [vmem:[#allocation8_spill] sm:$0xff] %v4985_v46 }
  0x46   : > { %3923 = vmatprep.subr.mxu1 %v218_v51  ;;  %4002 = vmatpush3.msra.mxu0 %v3097_v48  ;;  %v3198_v48 = vld [vmem:[%s6127_s1 + $0x268] sm:$0xff] }
  0x47   : > { %3872 = vmatmul.mubr.f32.gmra.mxu0 %v4841_v52  ;;  %3924 = vmatpush3.msra.mxu1 %v218_v51  ;;  %v4992_v51 = vld [vmem:[%s4716_s22 + $0x48] sm:$0xff] }
  0x48   : > { %4003 = vmatprep.subr.mxu0 %v3096_v53  ;;  %3925 = vmatprep.subr.mxu1 %v217_v54 }
  0x49   : > { %4004 = vmatpush3.msra.mxu0 %v3096_v53  ;;  %3898 = vmatprep.mubr.f32.mxu1 %v4852_v55  ;;  %v4996_v53 = vld [vmem:[%s4716_s22 + $0x50] sm:$0xff] }
  0x4a   : > { %3926 = vmatpush3.msra.mxu1 %v217_v54  ;;  %4005 = vmatprep.subr.mxu0 %v3095_v56  ;;  %v5000_v54 = vld [vmem:[%s4716_s22 + $0x4a] sm:$0xff] }
  0x4b   : > { %3874 = vmatprep.mubr.f32.mxu0 %v4859_v57  ;;  %3899 = vmatmul.mubr.f32.gmra.mxu1 %v4862_v58  ;;  %6166 = vst [vmem:[#allocation9_spill] sm:$0xff] %v5000_v54 }
  0x4c   : > { %3927 = vmatprep.subr.mxu1 %v216_v59  ;;  %4006 = vmatpush3.msra.mxu0 %v3095_v56  ;;  %v3149_v56 = vld [vmem:[%s6127_s1 + $0x1e0] sm:$0xff] }
  0x4d   : > { %3875 = vmatmul.mubr.f32.gmra.mxu0 %v4869_v60  ;;  %3928 = vmatpush3.msra.mxu1 %v216_v59  ;;  %v5007_v59 = vld [vmem:[%s4716_s22 + $0x52] sm:$0xff] }
  0x4e   : > { %4007 = vmatprep.subr.mxu0 %v3094_v61  ;;  %3929 = vmatprep.subr.mxu1 %v215_v62  ;;  %6167 = vst [vmem:[#allocation10_spill] sm:$0xff] %v5007_v59 }
  0x4f   : > { %4008 = vmatpush3.msra.mxu0 %v3094_v61  ;;  %3901 = vmatprep.mubr.f32.mxu1 %v4880_v63  ;;  %v3197_v61 = vld [vmem:[%s6127_s1 + $0x260] sm:$0xff] }
  0x50   : > { %3930 = vmatpush3.msra.mxu1 %v215_v62  ;;  %4009 = vmatprep.subr.mxu0 %v3093_v0  ;;  %v5014_v62 = vld [vmem:[%s4716_s22 + $0x60] sm:$0xff] }
  0x51   : > { %3877 = vmatprep.mubr.f32.mxu0 %v4887_v1  ;;  %3902 = vmatmul.mubr.f32.gmra.mxu1 %v4890_v2  ;;  %v5271_v2 = vld [vmem:[%s4716_s22 + $0x172] sm:$0xff] }
  0x52   : > { %3931 = vmatprep.subr.mxu1 %v214_v3  ;;  %4010 = vmatpush3.msra.mxu0 %v3093_v0  ;;  %v5018_v0 = vld [vmem:[%s4716_s22 + $0x68] sm:$0xff] }
  0x53   : > { %3878 = vmatmul.mubr.f32.gmra.mxu0 %v4897_v4  ;;  %3932 = vmatpush3.msra.mxu1 %v214_v3  ;;  %v5022_v3 = vld [vmem:[%s4716_s22 + $0x62] sm:$0xff] }
  0x54   : > { %4011 = vmatprep.subr.mxu0 %v3092_v5  ;;  %3933 = vmatprep.subr.mxu1 %v213_v6  ;;  %6168 = vst [vmem:[#allocation11_spill] sm:$0xff] %v5022_v3 }
  0x55   : > { %4012 = vmatpush3.msra.mxu0 %v3092_v5  ;;  %3904 = vmatprep.mubr.f32.mxu1 %v4908_v7  ;;  %v3148_v5 = vld [vmem:[%s6127_s1 + $0x1d8] sm:$0xff]  ;;  %v5264_v7 = vld [vmem:[%s4716_s22 + $0x16a] sm:$0xff] }
  0x56   : > { %3934 = vmatpush3.msra.mxu1 %v213_v6  ;;  %4013 = vmatprep.subr.mxu0 %v3091_v8  ;;  %v5029_v6 = vld [vmem:[%s4716_s22 + $0x6a] sm:$0xff] }
  0x57   : > { %3880 = vmatprep.mubr.f32.mxu0 %v4915_v9  ;;  %3905 = vmatmul.mubr.f32.gmra.mxu1 %v4918_v10  ;;  %6169 = vst [vmem:[#allocation12_spill] sm:$0xff] %v5029_v6  ;;  %v5249_v10 = vld [vmem:[%s4716_s22 + $0x15a] sm:$0xff] }
  0x58   : > { %3935 = vmatprep.subr.mxu1 %v212_v11  ;;  %4014 = vmatpush3.msra.mxu0 %v3091_v8  ;;  %v3196_v8 = vld [vmem:[%s6127_s1 + $0x258] sm:$0xff] }
  0x59   : > { %3881 = vmatmul.mubr.f32.gmra.mxu0 %v4925_v12  ;;  %3936 = vmatpush3.msra.mxu1 %v212_v11  ;;  %v5036_v11 = vld [vmem:[%s4716_s22 + $0x78] sm:$0xff] }
  0x5a   : > { %4015 = vmatprep.subr.mxu0 %v3090_v13  ;;  %3937 = vmatprep.subr.mxu1 %v211_v14 }
  0x5b   : > { %4016 = vmatpush3.msra.mxu0 %v3090_v13  ;;  %3938 = vmatpush3.msra.mxu1 %v211_v14  ;;  %v5040_v13 = vld [vmem:[%s4716_s22 + $0x80] sm:$0xff] }
  0x5c   : > { %3939 = vmatprep.mubr.f32.mxu1 %v179_v15  ;;  %4017 = vmatprep.subr.mxu0 %v3089_v17  ;;  %v5044_v14 = vld [vmem:[%s4716_s22 + $0x7a] sm:$0xff]  ;;  %v3147_v15 = vld [vmem:[%s6127_s1 + $0x1d0] sm:$0xff] }
  0x5d   : > { %3940 = vmatmul.mubr.f32.vlgmr.msra.gmra.mxu1 %v180_v19  ;;  %4018 = vmatpush3.msra.mxu0 %v3089_v17  ;;  %6170 = vst [vmem:[#allocation13_spill] sm:$0xff] %v5044_v14  ;;  %v5051_v17 = vld [vmem:[%s4716_s22 + $0x82] sm:$0xff]  ;;  %v3195_v19 = vld [vmem:[%s6127_s1 + $0x250] sm:$0xff] }
  0x5e   : > { %4019 = vmatprep.mubr.f32.mxu0 %v726_v20  ;;  %4067 = vmatprep.subr.mxu1 %v3152_v21  ;;  %6171 = vst [vmem:[#allocation14_spill] sm:$0xff] %v5051_v17  ;;  %v5058_v20 = vld [vmem:[%s4716_s22 + $0x90] sm:$0xff] }
  0x5f   : > { %4020 = vmatmul.mubr.f32.vlgmr.msra.gmra.mxu0 %v727_v22  ;;  %4068 = vmatpush3.msra.mxu1 %v3152_v21  ;;  %v5062_v21 = vld [vmem:[%s4716_s22 + $0x98] sm:$0xff] }
  0x60   : > { %4147 = vmatprep.subr.mxu0 %v3200_v24  ;;  %3942 = vmatprep.mubr.f32.mxu1 %v4950_v27  ;;  %v5066_v22 = vld [vmem:[%s4716_s22 + $0x92] sm:$0xff] }
  0x61   : > { %4148 = vmatpush3.msra.mxu0 %v3200_v24  ;;  %3943 = vmatmul.mubr.f32.gmra.mxu1 %v4953_v29  ;;  %6172 = vst [vmem:[#allocation15_spill] sm:$0xff] %v5066_v22  ;;  %v3146_v24 = vld [vmem:[%s6127_s1 + $0x1c8] sm:$0xff] }
  0x62   : > { %4022 = vmatprep.mubr.f32.mxu0 %v4956_v30  ;;  %4069 = vmatprep.subr.mxu1 %v3151_v32  ;;  %v3138_v30 = vld [vmem:[%s6127_s1 + $0x188] sm:$0xff] }
  0x63   : > { %4023 = vmatmul.mubr.f32.gmra.mxu0 %v4963_v35  ;;  %4070 = vmatpush3.msra.mxu1 %v3151_v32  ;;  %v5073_v32 = vld [vmem:[%s4716_s22 + $0x9a] sm:$0xff]  ;;  %v5227_v35 = vld [vmem:[%s4716_s22 + $0x142] sm:$0xff] }
  0x64   : > { %4149 = vmatprep.subr.mxu0 %v3199_v37  ;;  %3945 = vmatprep.mubr.f32.mxu1 %v4970_v38  ;;  %6173 = vst [vmem:[#allocation16_spill] sm:$0xff] %v5073_v32  ;;  %6187 = vst [vmem:[#allocation30_spill] sm:$0xff] %v5227_v35 }
  0x65   : > { %4150 = vmatpush3.msra.mxu0 %v3199_v37  ;;  %3946 = vmatmul.mubr.f32.gmra.mxu1 %v4974_v40  ;;  %v3194_v37 = vld [vmem:[%s6127_s1 + $0x248] sm:$0xff] }
  0x66   : > { %4025 = vmatprep.mubr.f32.mxu0 %v4978_v43  ;;  %4071 = vmatprep.subr.mxu1 %v3150_v45  ;;  %v3139_v43 = vld [vmem:[%s6127_s1 + $0x190] sm:$0xff] }
  0x67   : > { %4026 = vmatmul.mubr.f32.gmra.mxu0 %v4985_v46  ;;  %4072 = vmatpush3.msra.mxu1 %v3150_v45  ;;  %v5080_v45 = vld [vmem:[%s4716_s22 + $0xa8] sm:$0xff] }
  0x68   : > { %4151 = vmatprep.subr.mxu0 %v3198_v48  ;;  %3948 = vmatprep.mubr.f32.mxu1 %v4992_v51  ;;  %v5205_v46 = vld [vmem:[%s4716_s22 + $0x12a] sm:$0xff] }
  0x69   : > { %4152 = vmatpush3.msra.mxu0 %v3198_v48  ;;  %3949 = vmatmul.mubr.f32.gmra.mxu1 %v4996_v53  ;;  %v5084_v48 = vld [vmem:[%s4716_s22 + $0xb0] sm:$0xff]  ;;  %6185 = vst [vmem:[#allocation28_spill] sm:$0xff] %v5205_v46 }
  0x6a   : > { %4028 = vmatprep.mubr.f32.mxu0 %v5000_v54  ;;  %4073 = vmatprep.subr.mxu1 %v3149_v56  ;;  %v3140_v54 = vld [vmem:[%s6127_s1 + $0x198] sm:$0xff] }
  0x6b   : > { %4029 = vmatmul.mubr.f32.gmra.mxu0 %v5007_v59  ;;  %4074 = vmatpush3.msra.mxu1 %v3149_v56  ;;  %v5088_v56 = vld [vmem:[%s4716_s22 + $0xaa] sm:$0xff]  ;;  %v5183_v59 = vld [vmem:[%s4716_s22 + $0x112] sm:$0xff] }
  0x6c   : > { %4153 = vmatprep.subr.mxu0 %v3197_v61  ;;  %3951 = vmatprep.mubr.f32.mxu1 %v5014_v62  ;;  %6174 = vst [vmem:[#allocation17_spill] sm:$0xff] %v5088_v56  ;;  %6183 = vst [vmem:[#allocation26_spill] sm:$0xff] %v5183_v59 }
  0x6d   : > { %4154 = vmatpush3.msra.mxu0 %v3197_v61  ;;  %3952 = vmatmul.mubr.f32.gmra.mxu1 %v5018_v0  ;;  %v3145_v61 = vld [vmem:[%s6127_s1 + $0x1c0] sm:$0xff] }
  0x6e   : > { %4031 = vmatprep.mubr.f32.mxu0 %v5022_v3  ;;  %4075 = vmatprep.subr.mxu1 %v3148_v5  ;;  %v3141_v3 = vld [vmem:[%s6127_s1 + $0x1a0] sm:$0xff] }
  0x6f   : > { %4032 = vmatmul.mubr.f32.gmra.mxu0 %v5029_v6  ;;  %4076 = vmatpush3.msra.mxu1 %v3148_v5  ;;  %v5095_v5 = vld [vmem:[%s4716_s22 + $0xb2] sm:$0xff]  ;;  %v5161_v6 = vld [vmem:[%s4716_s22 + $0xfa] sm:$0xff] }
  0x70   : > { %4155 = vmatprep.subr.mxu0 %v3196_v8  ;;  %3954 = vmatprep.mubr.f32.mxu1 %v5036_v11  ;;  %6175 = vst [vmem:[#allocation18_spill] sm:$0xff] %v5095_v5  ;;  %6181 = vst [vmem:[#allocation24_spill] sm:$0xff] %v5161_v6 }
  0x71   : > { %4156 = vmatpush3.msra.mxu0 %v3196_v8  ;;  %3955 = vmatmul.mubr.f32.gmra.mxu1 %v5040_v13  ;;  %v3193_v8 = vld [vmem:[%s6127_s1 + $0x240] sm:$0xff] }
  0x72   : > { %4034 = vmatprep.mubr.f32.mxu0 %v5044_v14  ;;  %4077 = vmatprep.subr.mxu1 %v3147_v15  ;;  %v3142_v14 = vld [vmem:[%s6127_s1 + $0x1a8] sm:$0xff] }
  0x73   : > { %4035 = vmatmul.mubr.f32.gmra.mxu0 %v5051_v17  ;;  %4078 = vmatpush3.msra.mxu1 %v3147_v15  ;;  %v5102_v15 = vld [vmem:[%s4716_s22 + $0xc0] sm:$0xff] }
  0x74   : > { %4157 = vmatprep.subr.mxu0 %v3195_v19  ;;  %3957 = vmatprep.mubr.f32.mxu1 %v5058_v20  ;;  %v5139_v17 = vld [vmem:[%s4716_s22 + $0xe2] sm:$0xff] }
  0x75   : > { %4158 = vmatpush3.msra.mxu0 %v3195_v19  ;;  %3958 = vmatmul.mubr.f32.gmra.mxu1 %v5062_v21  ;;  %v5106_v19 = vld [vmem:[%s4716_s22 + $0xc8] sm:$0xff]  ;;  %6179 = vst [vmem:[#allocation22_spill] sm:$0xff] %v5139_v17 }
  0x76   : > { %4037 = vmatprep.mubr.f32.mxu0 %v5066_v22  ;;  %4079 = vmatprep.subr.mxu1 %v3146_v24  ;;  %v3143_v22 = vld [vmem:[%s6127_s1 + $0x1b0] sm:$0xff] }
  0x77   : > { %4038 = vmatmul.mubr.f32.gmra.mxu0 %v5073_v32  ;;  %4080 = vmatpush3.msra.mxu1 %v3146_v24  ;;  %v5110_v24 = vld [vmem:[%s4716_s22 + $0xc2] sm:$0xff]  ;;  %v5117_v32 = vld [vmem:[%s4716_s22 + $0xca] sm:$0xff] }
  0x78   : > { %4159 = vmatprep.subr.mxu0 %v3194_v37  ;;  %3960 = vmatprep.mubr.f32.mxu1 %v5080_v45  ;;  %6176 = vst [vmem:[#allocation19_spill] sm:$0xff] %v5110_v24  ;;  %6177 = vst [vmem:[#allocation20_spill] sm:$0xff] %v5117_v32 }
  0x79   : > { %4160 = vmatpush3.msra.mxu0 %v3194_v37  ;;  %3961 = vmatmul.mubr.f32.gmra.mxu1 %v5084_v48  ;;  %v3144_v37 = vld [vmem:[%s6127_s1 + $0x1b8] sm:$0xff] }
  0x7a   : > { %4040 = vmatprep.mubr.f32.mxu0 %v5088_v56  ;;  %4081 = vmatprep.subr.mxu1 %v3145_v61  ;;  %v5128_v56 = vld [vmem:[%s4716_s22 + $0xe0] sm:$0xff] }
  0x7b   : > { %4041 = vmatmul.mubr.f32.gmra.mxu0 %v5095_v5  ;;  %4082 = vmatpush3.msra.mxu1 %v3145_v61  ;;  %v3192_v61 = vld [vmem:[%s6127_s1 + $0x238] sm:$0xff] }
  0x7c   : > { %4161 = vmatprep.subr.mxu0 %v3193_v8  ;;  %3963 = vmatprep.mubr.f32.mxu1 %v5102_v15  ;;  %v5124_v5 = vld [vmem:[%s4716_s22 + $0xd8] sm:$0xff] }
  0x7d   : > { %4162 = vmatpush3.msra.mxu0 %v3193_v8  ;;  %3964 = vmatmul.mubr.f32.gmra.mxu1 %v5106_v19  ;;  %v5132_v8 = vld [vmem:[%s4716_s22 + $0xda] sm:$0xff] }
  0x7e   : > { %4043 = vmatprep.mubr.f32.mxu0 %v5110_v24  ;;  %4083 = vmatprep.subr.mxu1 %v3144_v37  ;;  %6178 = vst [vmem:[#allocation21_spill] sm:$0xff] %v5132_v8  ;;  %v5150_v24 = vld [vmem:[%s4716_s22 + $0xf8] sm:$0xff] }
  0x7f   : > { %4044 = vmatmul.mubr.f32.gmra.mxu0 %v5117_v32  ;;  %4084 = vmatpush3.msra.mxu1 %v3144_v37  ;;  %v3191_v37 = vld [vmem:[%s6127_s1 + $0x230] sm:$0xff] }
  0x80   : > { %4163 = vmatprep.subr.mxu0 %v3192_v61  ;;  %3966 = vmatprep.mubr.f32.mxu1 %v5124_v5  ;;  %v5146_v32 = vld [vmem:[%s4716_s22 + $0xf0] sm:$0xff] }
  0x81   : > { %4164 = vmatpush3.msra.mxu0 %v3192_v61  ;;  %3967 = vmatmul.mubr.f32.gmra.mxu1 %v5128_v56  ;;  %v5154_v61 = vld [vmem:[%s4716_s22 + $0xf2] sm:$0xff] }
  0x82   : > { %4046 = vmatprep.mubr.f32.mxu0 %v5132_v8  ;;  %4085 = vmatprep.subr.mxu1 %v3143_v22  ;;  %6180 = vst [vmem:[#allocation23_spill] sm:$0xff] %v5154_v61  ;;  %v5172_v8 = vld [vmem:[%s4716_s22 + $0x110] sm:$0xff] }
  0x83   : > { %4047 = vmatmul.mubr.f32.gmra.mxu0 %v5139_v17  ;;  %4086 = vmatpush3.msra.mxu1 %v3143_v22  ;;  %v3190_v22 = vld [vmem:[%s6127_s1 + $0x228] sm:$0xff] }
  0x84   : > { %4165 = vmatprep.subr.mxu0 %v3191_v37  ;;  %3969 = vmatprep.mubr.f32.mxu1 %v5146_v32  ;;  %v5168_v17 = vld [vmem:[%s4716_s22 + $0x108] sm:$0xff] }
  0x85   : > { %4166 = vmatpush3.msra.mxu0 %v3191_v37  ;;  %3970 = vmatmul.mubr.f32.gmra.mxu1 %v5150_v24  ;;  %v5176_v37 = vld [vmem:[%s4716_s22 + $0x10a] sm:$0xff] }
  0x86   : > { %4049 = vmatprep.mubr.f32.mxu0 %v5154_v61  ;;  %4087 = vmatprep.subr.mxu1 %v3142_v14  ;;  %6182 = vst [vmem:[#allocation25_spill] sm:$0xff] %v5176_v37  ;;  %v5194_v61 = vld [vmem:[%s4716_s22 + $0x128] sm:$0xff] }
  0x87   : > { %4050 = vmatmul.mubr.f32.gmra.mxu0 %v5161_v6  ;;  %4088 = vmatpush3.msra.mxu1 %v3142_v14  ;;  %v3189_v14 = vld [vmem:[%s6127_s1 + $0x220] sm:$0xff] }
  0x88   : > { %4167 = vmatprep.subr.mxu0 %v3190_v22  ;;  %3972 = vmatprep.mubr.f32.mxu1 %v5168_v17  ;;  %v5190_v6 = vld [vmem:[%s4716_s22 + $0x120] sm:$0xff] }
  0x89   : > { %4168 = vmatpush3.msra.mxu0 %v3190_v22  ;;  %3973 = vmatmul.mubr.f32.gmra.mxu1 %v5172_v8  ;;  %v5198_v22 = vld [vmem:[%s4716_s22 + $0x122] sm:$0xff] }
  0x8a   : > { %4052 = vmatprep.mubr.f32.mxu0 %v5176_v37  ;;  %4089 = vmatprep.subr.mxu1 %v3141_v3  ;;  %6184 = vst [vmem:[#allocation27_spill] sm:$0xff] %v5198_v22  ;;  %v5216_v37 = vld [vmem:[%s4716_s22 + $0x140] sm:$0xff] }
  0x8b   : > { %4053 = vmatmul.mubr.f32.gmra.mxu0 %v5183_v59  ;;  %4090 = vmatpush3.msra.mxu1 %v3141_v3  ;;  %v3188_v3 = vld [vmem:[%s6127_s1 + $0x218] sm:$0xff] }
  0x8c   : > { %4169 = vmatprep.subr.mxu0 %v3189_v14  ;;  %3975 = vmatprep.mubr.f32.mxu1 %v5190_v6  ;;  %v5212_v59 = vld [vmem:[%s4716_s22 + $0x138] sm:$0xff] }
  0x8d   : > { %4170 = vmatpush3.msra.mxu0 %v3189_v14  ;;  %3976 = vmatmul.mubr.f32.gmra.mxu1 %v5194_v61  ;;  %v5220_v14 = vld [vmem:[%s4716_s22 + $0x13a] sm:$0xff] }
  0x8e   : > { %4055 = vmatprep.mubr.f32.mxu0 %v5198_v22  ;;  %4091 = vmatprep.subr.mxu1 %v3140_v54  ;;  %6186 = vst [vmem:[#allocation29_spill] sm:$0xff] %v5220_v14  ;;  %v5238_v22 = vld [vmem:[%s4716_s22 + $0x158] sm:$0xff] }
  0x8f   : > { %4056 = vmatmul.mubr.f32.gmra.mxu0 %v5205_v46  ;;  %4092 = vmatpush3.msra.mxu1 %v3140_v54  ;;  %v3187_v54 = vld [vmem:[%s6127_s1 + $0x210] sm:$0xff] }
  0x90   : > { %4171 = vmatprep.subr.mxu0 %v3188_v3  ;;  %3978 = vmatprep.mubr.f32.mxu1 %v5212_v59  ;;  %v5234_v46 = vld [vmem:[%s4716_s22 + $0x150] sm:$0xff] }
  0x91   : > { %4172 = vmatpush3.msra.mxu0 %v3188_v3  ;;  %3979 = vmatmul.mubr.f32.gmra.mxu1 %v5216_v37  ;;  %v5242_v3 = vld [vmem:[%s4716_s22 + $0x152] sm:$0xff] }
  0x92   : > { %4058 = vmatprep.mubr.f32.mxu0 %v5220_v14  ;;  %4093 = vmatprep.subr.mxu1 %v3139_v43  ;;  %6188 = vst [vmem:[#allocation31_spill] sm:$0xff] %v5242_v3  ;;  %v5260_v14 = vld [vmem:[%s4716_s22 + $0x170] sm:$0xff] }
  0x93   : > { %4059 = vmatmul.mubr.f32.gmra.mxu0 %v5227_v35  ;;  %4094 = vmatpush3.msra.mxu1 %v3139_v43  ;;  %v3186_v35 = vld [vmem:[%s6127_s1 + $0x208] sm:$0xff] }
  0x94   : > { %4173 = vmatprep.subr.mxu0 %v3187_v54  ;;  %3981 = vmatprep.mubr.f32.mxu1 %v5234_v46  ;;  %v5256_v43 = vld [vmem:[%s4716_s22 + $0x168] sm:$0xff] }
  0x95   : > { %4174 = vmatpush3.msra.mxu0 %v3187_v54  ;;  %3982 = vmatmul.mubr.f32.gmra.mxu1 %v5238_v22  ;;  %v3137_v54 = vld [vmem:[%s6127_s1 + $0x180] sm:$0xff] }
  0x96   : > { %4061 = vmatprep.mubr.f32.mxu0 %v5242_v3  ;;  %4095 = vmatprep.subr.mxu1 %v3138_v30  ;;  %v3185_v3 = vld [vmem:[%s6127_s1 + $0x200] sm:$0xff] }
  0x97   : > { %4062 = vmatmul.mubr.f32.gmra.mxu0 %v5249_v10  ;;  %4096 = vmatpush3.msra.mxu1 %v3138_v30  ;;  %v3248_v30 = vld [vmem:[%s6127_s1 + $0x2f8] sm:$0xff] }
  0x98   : > { %4175 = vmatprep.subr.mxu0 %v3186_v35  ;;  %3984 = vmatprep.mubr.f32.mxu1 %v5256_v43 }
  0x99   : > { %4176 = vmatpush3.msra.mxu0 %v3186_v35  ;;  %3985 = vmatmul.mubr.f32.gmra.mxu1 %v5260_v14  ;;  %v3296_v35 = vld [vmem:[%s6127_s1 + $0x378] sm:$0xff] }
  0x9a   : > { %4064 = vmatprep.mubr.f32.mxu0 %v5264_v7  ;;  %4097 = vmatprep.subr.mxu1 %v3137_v54 }
  0x9b   : > { %4065 = vmatmul.mubr.f32.gmra.mxu0 %v5271_v2  ;;  %4098 = vmatpush3.msra.mxu1 %v3137_v54  ;;  %v3247_v54 = vld [vmem:[%s6127_s1 + $0x2f0] sm:$0xff] }
  0x9c   : > { %4177 = vmatprep.subr.mxu0 %v3185_v3  ;;  %4099 = vmatprep.mubr.f32.mxu1 %v4950_v27  ;;  %v3295_v27 = vld [vmem:[%s6127_s1 + $0x370] sm:$0xff] }
  0x9d   : > { %4178 = vmatpush3.msra.mxu0 %v3185_v3  ;;  %4100 = vmatmul.mubr.f32.vlgmr.msra.gmra.mxu1 %v4953_v29  ;;  %v5428_v29 = vld [vmem:[%s4716_s22 + $0x180] sm:$0xff]  ;;  %v6190_v3 = vld [vmem:[#allocation3_spill] sm:$0xff] }
  0x9e   : > { %4179 = vmatprep.mubr.f32.mxu0 %v4747_v25  ;;  %4227 = vmatprep.subr.mxu1 %v3248_v30  ;;  %v3246_v25 = vld [vmem:[%s6127_s1 + $0x2e8] sm:$0xff] }
  0x9f   : > { %4180 = vmatmul.mubr.f32.vlgmr.msra.gmra.mxu0 %v4757_v28  ;;  %4228 = vmatpush3.msra.mxu1 %v3248_v30  ;;  %v3294_v28 = vld [vmem:[%s6127_s1 + $0x368] sm:$0xff] }
  0xa0   : > { %4307 = vmatprep.subr.mxu0 %v3296_v35  ;;  %4102 = vmatprep.mubr.f32.mxu1 %v4970_v38  ;;  %v5432_v30 = vld [vmem:[%s4716_s22 + $0x188] sm:$0xff] }
  0xa1   : > { %4308 = vmatpush3.msra.mxu0 %v3296_v35  ;;  %4103 = vmatmul.mubr.f32.gmra.mxu1 %v4974_v40  ;;  %v6191_v35 = vld [vmem:[#allocation4_spill] sm:$0xff] }
  0xa2   : > { %4182 = vmatprep.mubr.f32.mxu0 %v4775_v33  ;;  %4229 = vmatprep.subr.mxu1 %v3247_v54  ;;  %v3245_v33 = vld [vmem:[%s6127_s1 + $0x2e0] sm:$0xff] }
  0xa3   : > { %4183 = vmatmul.mubr.f32.gmra.mxu0 %v4785_v36  ;;  %4230 = vmatpush3.msra.mxu1 %v3247_v54  ;;  %v3293_v36 = vld [vmem:[%s6127_s1 + $0x360] sm:$0xff] }
  0xa4   : > { %4309 = vmatprep.subr.mxu0 %v3295_v27  ;;  %4105 = vmatprep.mubr.f32.mxu1 %v4992_v51  ;;  %v5436_v54 = vld [vmem:[%s4716_s22 + $0x181] sm:$0xff] }
  0xa5   : > { %4310 = vmatpush3.msra.mxu0 %v3295_v27  ;;  %4106 = vmatmul.mubr.f32.gmra.mxu1 %v4996_v53  ;;  %v3233_v27 = vld [vmem:[%s6127_s1 + $0x280] sm:$0xff] }
  0xa6   : > { %4185 = vmatprep.mubr.f32.mxu0 %v4803_v41  ;;  %4231 = vmatprep.subr.mxu1 %v3246_v25  ;;  %v3244_v41 = vld [vmem:[%s6127_s1 + $0x2d8] sm:$0xff] }
  0xa7   : > { %4186 = vmatmul.mubr.f32.gmra.mxu0 %v4813_v44  ;;  %4232 = vmatpush3.msra.mxu1 %v3246_v25  ;;  %v3292_v44 = vld [vmem:[%s6127_s1 + $0x358] sm:$0xff]  ;;  %v5443_v25 = vld [vmem:[%s4716_s22 + $0x189] sm:$0xff] }
  0xa8   : > { %4311 = vmatprep.subr.mxu0 %v3294_v28  ;;  %4108 = vmatprep.mubr.f32.mxu1 %v5014_v62 }
  0xa9   : > { %4312 = vmatpush3.msra.mxu0 %v3294_v28  ;;  %4109 = vmatmul.mubr.f32.gmra.mxu1 %v5018_v0  ;;  %v3281_v28 = vld [vmem:[%s6127_s1 + $0x300] sm:$0xff] }
  0xaa   : > { %4188 = vmatprep.mubr.f32.mxu0 %v4831_v49  ;;  %4233 = vmatprep.subr.mxu1 %v3245_v33  ;;  %v3243_v49 = vld [vmem:[%s6127_s1 + $0x2d0] sm:$0xff] }
  0xab   : > { %4189 = vmatmul.mubr.f32.gmra.mxu0 %v4841_v52  ;;  %4234 = vmatpush3.msra.mxu1 %v3245_v33  ;;  %v3291_v52 = vld [vmem:[%s6127_s1 + $0x350] sm:$0xff]  ;;  %v3344_v33 = vld [vmem:[%s6127_s1 + $0x3f8] sm:$0xff] }
  0xac   : > { %4313 = vmatprep.subr.mxu0 %v3293_v36  ;;  %4111 = vmatprep.mubr.f32.mxu1 %v5036_v11 }
  0xad   : > { %4314 = vmatpush3.msra.mxu0 %v3293_v36  ;;  %4112 = vmatmul.mubr.f32.gmra.mxu1 %v5040_v13  ;;  %v6192_v36 = vld [vmem:[#allocation5_spill] sm:$0xff] }
  0xae   : > { %4191 = vmatprep.mubr.f32.mxu0 %v4859_v57  ;;  %4235 = vmatprep.subr.mxu1 %v3244_v41  ;;  %v3242_v57 = vld [vmem:[%s6127_s1 + $0x2c8] sm:$0xff] }
  0xaf   : > { %4192 = vmatmul.mubr.f32.gmra.mxu0 %v4869_v60  ;;  %4236 = vmatpush3.msra.mxu1 %v3244_v41  ;;  %v3290_v60 = vld [vmem:[%s6127_s1 + $0x348] sm:$0xff]  ;;  %v6193_v41 = vld [vmem:[#allocation6_spill] sm:$0xff] }
  0xb0   : > { %4315 = vmatprep.subr.mxu0 %v3292_v44  ;;  %4114 = vmatprep.mubr.f32.mxu1 %v5058_v20 }
  0xb1   : > { %4316 = vmatpush3.msra.mxu0 %v3292_v44  ;;  %4115 = vmatmul.mubr.f32.gmra.mxu1 %v5062_v21  ;;  %v3392_v44 = vld [vmem:[%s6127_s1 + $0x478] sm:$0xff] }
  0xb2   : > { %4194 = vmatprep.mubr.f32.mxu0 %v4887_v1  ;;  %4237 = vmatprep.subr.mxu1 %v3243_v49  ;;  %v3241_v1 = vld [vmem:[%s6127_s1 + $0x2c0] sm:$0xff] }
  0xb3   : > { %4195 = vmatmul.mubr.f32.gmra.mxu0 %v4897_v4  ;;  %4238 = vmatpush3.msra.mxu1 %v3243_v49  ;;  %v3289_v4 = vld [vmem:[%s6127_s1 + $0x340] sm:$0xff]  ;;  %v3343_v49 = vld [vmem:[%s6127_s1 + $0x3f0] sm:$0xff] }
  0xb4   : > { %4317 = vmatprep.subr.mxu0 %v3291_v52  ;;  %4117 = vmatprep.mubr.f32.mxu1 %v5080_v45 }
  0xb5   : > { %4318 = vmatpush3.msra.mxu0 %v3291_v52  ;;  %4118 = vmatmul.mubr.f32.gmra.mxu1 %v5084_v48  ;;  %v6194_v52 = vld [vmem:[#allocation7_spill] sm:$0xff] }
  0xb6   : > { %4197 = vmatprep.mubr.f32.mxu0 %v4915_v9  ;;  %4239 = vmatprep.subr.mxu1 %v3242_v57  ;;  %v3240_v9 = vld [vmem:[%s6127_s1 + $0x2b8] sm:$0xff] }
  0xb7   : > { %4198 = vmatmul.mubr.f32.gmra.mxu0 %v4925_v12  ;;  %4240 = vmatpush3.msra.mxu1 %v3242_v57  ;;  %v3288_v12 = vld [vmem:[%s6127_s1 + $0x338] sm:$0xff]  ;;  %v6195_v57 = vld [vmem:[#allocation8_spill] sm:$0xff] }
  0xb8   : > { %4319 = vmatprep.subr.mxu0 %v3290_v60  ;;  %4120 = vmatprep.mubr.f32.mxu1 %v5102_v15 }
  0xb9   : > { %4320 = vmatpush3.msra.mxu0 %v3290_v60  ;;  %4121 = vmatmul.mubr.f32.gmra.mxu1 %v5106_v19  ;;  %v3391_v60 = vld [vmem:[%s6127_s1 + $0x470] sm:$0xff] }
  0xba   : > { %4200 = vmatprep.mubr.f32.mxu0 %v4722_v16  ;;  %4241 = vmatprep.subr.mxu1 %v3241_v1  ;;  %v3239_v16 = vld [vmem:[%s6127_s1 + $0x2b0] sm:$0xff] }
  0xbb   : > { %4201 = vmatmul.mubr.f32.gmra.mxu0 %v4726_v18  ;;  %4242 = vmatpush3.msra.mxu1 %v3241_v1  ;;  %v3287_v18 = vld [vmem:[%s6127_s1 + $0x330] sm:$0xff]  ;;  %v6197_v1 = vld [vmem:[#allocation10_spill] sm:$0xff] }
  0xbc   : > { %4321 = vmatprep.subr.mxu0 %v3289_v4  ;;  %4123 = vmatprep.mubr.f32.mxu1 %v5124_v5 }
  0xbd   : > { %4322 = vmatpush3.msra.mxu0 %v3289_v4  ;;  %4124 = vmatmul.mubr.f32.gmra.mxu1 %v5128_v56  ;;  %v3390_v4 = vld [vmem:[%s6127_s1 + $0x468] sm:$0xff] }
  0xbe   : > { %4203 = vmatprep.mubr.f32.mxu0 %v4741_v23  ;;  %4243 = vmatprep.subr.mxu1 %v3240_v9  ;;  %v3238_v23 = vld [vmem:[%s6127_s1 + $0x2a8] sm:$0xff] }
  0xbf   : > { %4204 = vmatmul.mubr.f32.gmra.mxu0 %v4750_v26  ;;  %4244 = vmatpush3.msra.mxu1 %v3240_v9  ;;  %v3286_v26 = vld [vmem:[%s6127_s1 + $0x328] sm:$0xff]  ;;  %v6199_v9 = vld [vmem:[#allocation12_spill] sm:$0xff] }
  0xc0   : > { %4323 = vmatprep.subr.mxu0 %v3288_v12  ;;  %4126 = vmatprep.mubr.f32.mxu1 %v5146_v32 }
  0xc1   : > { %4324 = vmatpush3.msra.mxu0 %v3288_v12  ;;  %4127 = vmatmul.mubr.f32.gmra.mxu1 %v5150_v24  ;;  %v3389_v12 = vld [vmem:[%s6127_s1 + $0x460] sm:$0xff] }
  0xc2   : > { %4206 = vmatprep.mubr.f32.mxu0 %v4768_v31  ;;  %4245 = vmatprep.subr.mxu1 %v3239_v16  ;;  %v3237_v31 = vld [vmem:[%s6127_s1 + $0x2a0] sm:$0xff] }
  0xc3   : > { %4207 = vmatmul.mubr.f32.gmra.mxu0 %v4778_v34  ;;  %4246 = vmatpush3.msra.mxu1 %v3239_v16  ;;  %v3285_v34 = vld [vmem:[%s6127_s1 + $0x320] sm:$0xff] }
  0xc4   : > { %4325 = vmatprep.subr.mxu0 %v3287_v18  ;;  %4129 = vmatprep.mubr.f32.mxu1 %v5168_v17  ;;  %v6201_v16 = vld [vmem:[#allocation14_spill] sm:$0xff] }
  0xc5   : > { %4326 = vmatpush3.msra.mxu0 %v3287_v18  ;;  %4130 = vmatmul.mubr.f32.gmra.mxu1 %v5172_v8  ;;  %v3388_v18 = vld [vmem:[%s6127_s1 + $0x458] sm:$0xff] }
  0xc6   : > { %4209 = vmatprep.mubr.f32.mxu0 %v4796_v39  ;;  %4247 = vmatprep.subr.mxu1 %v3238_v23  ;;  %v3236_v39 = vld [vmem:[%s6127_s1 + $0x298] sm:$0xff] }
  0xc7   : > { %4210 = vmatmul.mubr.f32.gmra.mxu0 %v4806_v42  ;;  %4248 = vmatpush3.msra.mxu1 %v3238_v23  ;;  %v3284_v42 = vld [vmem:[%s6127_s1 + $0x318] sm:$0xff] }
  0xc8   : > { %4327 = vmatprep.subr.mxu0 %v3286_v26  ;;  %4132 = vmatprep.mubr.f32.mxu1 %v5190_v6 }
  0xc9   : > { %4328 = vmatpush3.msra.mxu0 %v3286_v26  ;;  %4133 = vmatmul.mubr.f32.gmra.mxu1 %v5194_v61  ;;  %v6202_v26 = vld [vmem:[#allocation15_spill] sm:$0xff] }
  0xca   : > { %4212 = vmatprep.mubr.f32.mxu0 %v4824_v47  ;;  %4249 = vmatprep.subr.mxu1 %v3237_v31  ;;  %v3235_v47 = vld [vmem:[%s6127_s1 + $0x290] sm:$0xff] }
  0xcb   : > { %4213 = vmatmul.mubr.f32.gmra.mxu0 %v4834_v50  ;;  %4250 = vmatpush3.msra.mxu1 %v3237_v31  ;;  %v3283_v50 = vld [vmem:[%s6127_s1 + $0x310] sm:$0xff] }
  0xcc   : > { %4329 = vmatprep.subr.mxu0 %v3285_v34  ;;  %4135 = vmatprep.mubr.f32.mxu1 %v5212_v59 }
  0xcd   : > { %4330 = vmatpush3.msra.mxu0 %v3285_v34  ;;  %4136 = vmatmul.mubr.f32.gmra.mxu1 %v5216_v37  ;;  %v6203_v34 = vld [vmem:[#allocation16_spill] sm:$0xff] }
  0xce   : > { %4215 = vmatprep.mubr.f32.mxu0 %v4852_v55  ;;  %4251 = vmatprep.subr.mxu1 %v3236_v39  ;;  %v6189_v55 = vld [vmem:[#allocation2_spill] sm:$0xff] }
  0xcf   : > { %4216 = vmatmul.mubr.f32.gmra.mxu0 %v4862_v58  ;;  %4252 = vmatpush3.msra.mxu1 %v3236_v39  ;;  %v3234_v58 = vld [vmem:[%s6127_s1 + $0x288] sm:$0xff] }
  0xd0   : > { %4331 = vmatprep.subr.mxu0 %v3284_v42  ;;  %4138 = vmatprep.mubr.f32.mxu1 %v5234_v46  ;;  %v3338_v39 = vld [vmem:[%s6127_s1 + $0x3c8] sm:$0xff] }
  0xd1   : > { %4332 = vmatpush3.msra.mxu0 %v3284_v42  ;;  %4139 = vmatmul.mubr.f32.gmra.mxu1 %v5238_v22 }
  0xd2   : > { %4218 = vmatprep.mubr.f32.mxu0 %v4880_v63  ;;  %4253 = vmatprep.subr.mxu1 %v3235_v47  ;;  %v3282_v63 = vld [vmem:[%s6127_s1 + $0x308] sm:$0xff] }
  0xd3   : > { %4219 = vmatmul.mubr.f32.gmra.mxu0 %v6189_v55  ;;  %4254 = vmatpush3.msra.mxu1 %v3235_v47  ;;  %v6204_v47 = vld [vmem:[#allocation17_spill] sm:$0xff] }
  0xd4   : > { %4333 = vmatprep.subr.mxu0 %v3283_v50  ;;  %4141 = vmatprep.mubr.f32.mxu1 %v5256_v43 }
  0xd5   : > { %4334 = vmatpush3.msra.mxu0 %v3283_v50  ;;  %4142 = vmatmul.mubr.f32.gmra.mxu1 %v5260_v14  ;;  %v6205_v50 = vld [vmem:[#allocation18_spill] sm:$0xff] }
  0xd6   : > { %4221 = vmatprep.mubr.f32.mxu0 %v6190_v3  ;;  %4255 = vmatprep.subr.mxu1 %v3234_v58  ;;  %v6206_v3 = vld [vmem:[#allocation19_spill] sm:$0xff] }
  0xd7   : > { %4222 = vmatmul.mubr.f32.gmra.mxu0 %v6191_v35  ;;  %4256 = vmatpush3.msra.mxu1 %v3234_v58  ;;  %v3337_v58 = vld [vmem:[%s6127_s1 + $0x3c0] sm:$0xff]  ;;  %v6207_v35 = vld [vmem:[#allocation20_spill] sm:$0xff] }
  0xd8   : > { %4335 = vmatprep.subr.mxu0 %v3282_v63  ;;  %4144 = vmatprep.mubr.f32.mxu1 %v5428_v29 }
  0xd9   : > { %4336 = vmatpush3.msra.mxu0 %v3282_v63  ;;  %4145 = vmatmul.mubr.f32.gmra.mxu1 %v5432_v30 }
  0xda   : > { %4224 = vmatprep.mubr.f32.mxu0 %v5436_v54  ;;  %4257 = vmatprep.subr.mxu1 %v3233_v27 }
  0xdb   : > { %4225 = vmatmul.mubr.f32.gmra.mxu0 %v5443_v25  ;;  %4258 = vmatpush3.msra.mxu1 %v3233_v27 }
  0xdc   : > { %4337 = vmatprep.subr.mxu0 %v3281_v28  ;;  %4259 = vmatprep.mubr.f32.mxu1 %v6192_v36  ;;  %v6208_v36 = vld [vmem:[#allocation21_spill] sm:$0xff] }
  0xdd   : > { %4338 = vmatpush3.msra.mxu0 %v3281_v28  ;;  %4260 = vmatmul.mubr.f32.vlgmr.msra.gmra.mxu1 %v6193_v41  ;;  %v6209_v41 = vld [vmem:[#allocation22_spill] sm:$0xff] }
  0xde   : > { %4339 = vmatprep.mubr.f32.mxu0 %v4970_v38  ;;  %4387 = vmatprep.subr.mxu1 %v3344_v33  ;;  %v3342_v38 = vld [vmem:[%s6127_s1 + $0x3e8] sm:$0xff] }
  0xdf   : > { %4340 = vmatmul.mubr.f32.vlgmr.msra.gmra.mxu0 %v4974_v40  ;;  %4388 = vmatpush3.msra.mxu1 %v3344_v33  ;;  %v6196_v40 = vld [vmem:[#allocation9_spill] sm:$0xff] }
  0xe0   : > { %4467 = vmatprep.subr.mxu0 %v3392_v44  ;;  %4262 = vmatprep.mubr.f32.mxu1 %v6194_v52  ;;  %v6210_v52 = vld [vmem:[#allocation23_spill] sm:$0xff] }
  0xe1   : > { %4468 = vmatpush3.msra.mxu0 %v3392_v44  ;;  %4263 = vmatmul.mubr.f32.gmra.mxu1 %v6195_v57  ;;  %v3335_v44 = vld [vmem:[%s6127_s1 + $0x3b0] sm:$0xff] }
  0xe2   : > { %4342 = vmatprep.mubr.f32.mxu0 %v4992_v51  ;;  %4389 = vmatprep.subr.mxu1 %v3343_v49  ;;  %v3341_v51 = vld [vmem:[%s6127_s1 + $0x3e0] sm:$0xff]  ;;  %v6211_v57 = vld [vmem:[#allocation24_spill] sm:$0xff] }
  0xe3   : > { %4343 = vmatmul.mubr.f32.gmra.mxu0 %v4996_v53  ;;  %4390 = vmatpush3.msra.mxu1 %v3343_v49  ;;  %v6198_v53 = vld [vmem:[#allocation11_spill] sm:$0xff] }
  0xe4   : > { %4469 = vmatprep.subr.mxu0 %v3391_v60  ;;  %4265 = vmatprep.mubr.f32.mxu1 %v6196_v40 }
  0xe5   : > { %4470 = vmatpush3.msra.mxu0 %v3391_v60  ;;  %4266 = vmatmul.mubr.f32.gmra.mxu1 %v6197_v1  ;;  %v6212_v1 = vld [vmem:[#allocation25_spill] sm:$0xff] }
  0xe6   : > { %4345 = vmatprep.mubr.f32.mxu0 %v5014_v62  ;;  %4391 = vmatprep.subr.mxu1 %v3342_v38  ;;  %v3340_v62 = vld [vmem:[%s6127_s1 + $0x3d8] sm:$0xff] }
  0xe7   : > { %4346 = vmatmul.mubr.f32.gmra.mxu0 %v5018_v0  ;;  %4392 = vmatpush3.msra.mxu1 %v3342_v38  ;;  %v6200_v0 = vld [vmem:[#allocation13_spill] sm:$0xff]  ;;  %v3334_v38 = vld [vmem:[%s6127_s1 + $0x3a8] sm:$0xff] }
  0xe8   : > { %4471 = vmatprep.subr.mxu0 %v3390_v4  ;;  %4268 = vmatprep.mubr.f32.mxu1 %v6198_v53 }
  0xe9   : > { %4472 = vmatpush3.msra.mxu0 %v3390_v4  ;;  %4269 = vmatmul.mubr.f32.gmra.mxu1 %v6199_v9  ;;  %v6213_v4 = vld [vmem:[#allocation26_spill] sm:$0xff] }
  0xea   : > { %4348 = vmatprep.mubr.f32.mxu0 %v5036_v11  ;;  %4393 = vmatprep.subr.mxu1 %v3341_v51 }
  0xeb   : > { %4349 = vmatmul.mubr.f32.gmra.mxu0 %v5040_v13  ;;  %4394 = vmatpush3.msra.mxu1 %v3341_v51  ;;  %v3339_v13 = vld [vmem:[%s6127_s1 + $0x3d0] sm:$0xff] }
  0xec   : > { %4473 = vmatprep.subr.mxu0 %v3389_v12  ;;  %4271 = vmatprep.mubr.f32.mxu1 %v6200_v0  ;;  %v3332_v0 = vld [vmem:[%s6127_s1 + $0x398] sm:$0xff] }
  0xed   : > { %4474 = vmatpush3.msra.mxu0 %v3389_v12  ;;  %4272 = vmatmul.mubr.f32.gmra.mxu1 %v6201_v16  ;;  %v6214_v12 = vld [vmem:[#allocation27_spill] sm:$0xff] }
  0xee   : > { %4351 = vmatprep.mubr.f32.mxu0 %v5058_v20  ;;  %4395 = vmatprep.subr.mxu1 %v3340_v62  ;;  %v5500_v11 = vpop.f32.mrf.mxu1  ;;  %v3387_v20 = vld [vmem:[%s6127_s1 + $0x450] sm:$0xff] }
  0xef   : > { %4352 = vmatmul.mubr.f32.gmra.mxu0 %v5062_v21  ;;  %4396 = vmatpush3.msra.mxu1 %v3340_v62  ;;  %v5506_v23 = vpop.f32.mrf.mxu0  ;;  %v6215_v62 = vld [vmem:[#allocation28_spill] sm:$0xff] }
  0xf0   : > { %4475 = vmatprep.subr.mxu0 %v3388_v18  ;;  %4274 = vmatprep.mubr.f32.mxu1 %v6202_v26  ;;  %v5509_v31 = vpop.f32.mrf.mxu1 }
  0xf1   : > { %4476 = vmatpush3.msra.mxu0 %v3388_v18  ;;  %4275 = vmatmul.mubr.f32.gmra.mxu1 %v6203_v34  ;;  %v5515_v21 = vpop.f32.mrf.mxu0  ;;  %v6216_v18 = vld [vmem:[#allocation29_spill] sm:$0xff]  ;;  %v3331_v34 = vld [vmem:[%s6127_s1 + $0x390] sm:$0xff] }
  0xf2   : > { %4354 = vmatprep.mubr.f32.mxu0 %v5080_v45  ;;  %4397 = vmatprep.subr.mxu1 %v3339_v13  ;;  %v3386_v45 = vld [vmem:[%s6127_s1 + $0x448] sm:$0xff] }
  0xf3   : > { %4355 = vmatmul.mubr.f32.gmra.mxu0 %v5084_v48  ;;  %4398 = vmatpush3.msra.mxu1 %v3339_v13  ;;  %v5522_v42 = vpop.f32.mrf.mxu1  ;;  %v6217_v13 = vld [vmem:[#allocation30_spill] sm:$0xff] }
  0xf4   : > { %4477 = vmatprep.subr.mxu0 %v3387_v20  ;;  %4277 = vmatprep.mubr.f32.mxu1 %v6204_v47 }
  0xf5   : > { %4478 = vmatpush3.msra.mxu0 %v3387_v20  ;;  %4278 = vmatmul.mubr.f32.gmra.mxu1 %v6205_v50  ;;  %v5529_v55 = vpop.f32.mrf.mxu0  ;;  %v5531_v48 = vpop.f32.mrf.mxu1 }
  0xf6   : > { %4357 = vmatprep.mubr.f32.mxu0 %v5102_v15  ;;  %4399 = vmatprep.subr.mxu1 %v3338_v39  ;;  %v3385_v15 = vld [vmem:[%s6127_s1 + $0x440] sm:$0xff] }
  0xf7   : > { %4358 = vmatmul.mubr.f32.gmra.mxu0 %v5106_v19  ;;  %4400 = vmatpush3.msra.mxu1 %v3338_v39  ;;  %v5538_v63 = vpop.f32.mrf.mxu0  ;;  %v3336_v19 = vld [vmem:[%s6127_s1 + $0x3b8] sm:$0xff]  ;;  %v6218_v39 = vld [vmem:[#allocation31_spill] sm:$0xff] }
  0xf8   : > { %4479 = vmatprep.subr.mxu0 %v3386_v45  ;;  %4280 = vmatprep.mubr.f32.mxu1 %v6206_v3  ;;  %v3329_v3 = vld [vmem:[%s6127_s1 + $0x380] sm:$0xff] }
  0xf9   : > { %4480 = vmatpush3.msra.mxu0 %v3386_v45  ;;  %4281 = vmatmul.mubr.f32.gmra.mxu1 %v6207_v35  ;;  %v5545_v27 = vpop.f32.mrf.mxu1  ;;  %v5656_v45 = vld [vmem:[%s4716_s22 + $0x182] sm:$0xff] }
  0xfa   : > { %4360 = vmatprep.mubr.f32.mxu0 %v5124_v5  ;;  %4401 = vmatprep.subr.mxu1 %v3337_v58  ;;  %v3384_v5 = vld [vmem:[%s6127_s1 + $0x438] sm:$0xff] }
  0xfb   : > { %4361 = vmatmul.mubr.f32.gmra.mxu0 %v5128_v56  ;;  %4402 = vmatpush3.msra.mxu1 %v3337_v58  ;;  %v5552_v28 = vpop.f32.mrf.mxu0  ;;  %v5554_v33 = vpop.f32.mrf.mxu1  ;;  %v5660_v58 = vld [vmem:[%s4716_s22 + $0x18a] sm:$0xff] }
  0xfc   : > { %4481 = vmatprep.subr.mxu0 %v3385_v15  ;;  %4283 = vmatprep.mubr.f32.mxu1 %v6208_v36  ;;  %v3298_v36 = vld [vmem:[%s4716_s22 + $0x39] sm:$0xff] }
  0xfd   : > { %4482 = vmatpush3.msra.mxu0 %v3385_v15  ;;  %4284 = vmatmul.mubr.f32.gmra.mxu1 %v6209_v41  ;;  %v5561_v56 = vpop.f32.mrf.mxu0  ;;  %v3377_v15 = vld [vmem:[%s6127_s1 + $0x400] sm:$0xff] }
  0xfe   : > { %4363 = vmatprep.mubr.f32.mxu0 %v5146_v32  ;;  %4403 = vmatprep.subr.mxu1 %v3336_v19  ;;  %v3383_v32 = vld [vmem:[%s6127_s1 + $0x430] sm:$0xff] }
  0xff   : > { %4364 = vmatmul.mubr.f32.gmra.mxu0 %v5150_v24  ;;  %4404 = vmatpush3.msra.mxu1 %v3336_v19  ;;  %v5568_v49 = vpop.f32.mrf.mxu1  ;;  %v3297_v19 = vld [vmem:[%s4716_s22 + $0x31] sm:$0xff] }
 0x100   : > { %4483 = vmatprep.subr.mxu0 %v3384_v5  ;;  %4286 = vmatprep.mubr.f32.mxu1 %v6210_v52  ;;  %v3346_v52 = vld [vmem:[%s4716_s22 + $0x3a] sm:$0xff] }
 0x101   : > { %4484 = vmatpush3.msra.mxu0 %v3384_v5  ;;  %4287 = vmatmul.mubr.f32.gmra.mxu1 %v6211_v57  ;;  %v5575_v60 = vpop.f32.mrf.mxu0  ;;  %v5577_v24 = vpop.f32.mrf.mxu1  ;;  %v3345_v5 = vld [vmem:[%s4716_s22 + $0x32] sm:$0xff] }
 0x102   : > { %4366 = vmatprep.mubr.f32.mxu0 %v5168_v17  ;;  %4405 = vmatprep.subr.mxu1 %v3335_v44  ;;  %v3382_v17 = vld [vmem:[%s6127_s1 + $0x428] sm:$0xff] }
 0x103   : > { %4367 = vmatmul.mubr.f32.gmra.mxu0 %v5172_v8  ;;  %4406 = vmatpush3.msra.mxu1 %v3335_v44  ;;  %v5584_v40 = vpop.f32.mrf.mxu0  ;;  %v3333_v8 = vld [vmem:[%s6127_s1 + $0x3a0] sm:$0xff]  ;;  %v3299_v44 = vld [vmem:[%s4716_s22 + $0x49] sm:$0xff] }
 0x104   : > { %4485 = vmatprep.subr.mxu0 %v3383_v32  ;;  %4289 = vmatprep.mubr.f32.mxu1 %v6212_v1  ;;  %v3300_v1 = vld [vmem:[%s4716_s22 + $0x51] sm:$0xff] }
 0x105   : > { %4486 = vmatpush3.msra.mxu0 %v3383_v32  ;;  %4290 = vmatmul.mubr.f32.gmra.mxu1 %v6213_v4  ;;  %v5591_v51 = vpop.f32.mrf.mxu1  ;;  %v3347_v32 = vld [vmem:[%s4716_s22 + $0x4a] sm:$0xff] }
 0x106   : > { %4369 = vmatprep.mubr.f32.mxu0 %v5190_v6  ;;  %4407 = vmatprep.subr.mxu1 %v3334_v38  ;;  %v3381_v6 = vld [vmem:[%s6127_s1 + $0x420] sm:$0xff] }
 0x107   : > { %4370 = vmatmul.mubr.f32.gmra.mxu0 %v5194_v61  ;;  %4408 = vmatpush3.msra.mxu1 %v3334_v38  ;;  %v5598_v53 = vpop.f32.mrf.mxu0  ;;  %v5600_v9 = vpop.f32.mrf.mxu1 }
 0x108   : > { %4487 = vmatprep.subr.mxu0 %v3382_v17  ;;  %4292 = vmatprep.mubr.f32.mxu1 %v6214_v12 }
 0x109   : > { %4488 = vmatpush3.msra.mxu0 %v3382_v17  ;;  %4293 = vmatmul.mubr.f32.gmra.mxu1 %v6215_v62  ;;  %v5607_v61 = vpop.f32.mrf.mxu0 }
 0x10a   : > { %4372 = vmatprep.mubr.f32.mxu0 %v5212_v59  ;;  %4409 = vmatprep.subr.mxu1 %v3333_v8  ;;  %v3380_v59 = vld [vmem:[%s6127_s1 + $0x418] sm:$0xff] }
 0x10b   : > { %4373 = vmatmul.mubr.f32.gmra.mxu0 %v5216_v37  ;;  %4410 = vmatpush3.msra.mxu1 %v3333_v8  ;;  %v5614_v16 = vpop.f32.mrf.mxu1  ;;  %v3301_v8 = vld [vmem:[%s4716_s22 + $0x61] sm:$0xff] }
 0x10c   : > { %4489 = vmatprep.subr.mxu0 %v3381_v6  ;;  %4295 = vmatprep.mubr.f32.mxu1 %v6216_v18 }
 0x10d   : > { %4490 = vmatpush3.msra.mxu0 %v3381_v6  ;;  %4296 = vmatmul.mubr.f32.gmra.mxu1 %v6217_v13  ;;  %v5621_v26 = vpop.f32.mrf.mxu0  ;;  %v5623_v37 = vpop.f32.mrf.mxu1  ;;  %v3348_v6 = vld [vmem:[%s4716_s22 + $0x52] sm:$0xff] }
 0x10e   : > { %4375 = vmatprep.mubr.f32.mxu0 %v5234_v46  ;;  %4411 = vmatprep.subr.mxu1 %v3332_v0  ;;  %v3379_v46 = vld [vmem:[%s6127_s1 + $0x410] sm:$0xff] }
 0x10f   : > { %4376 = vmatmul.mubr.f32.gmra.mxu0 %v5238_v22  ;;  %4412 = vmatpush3.msra.mxu1 %v3332_v0  ;;  %v5630_v20 = vpop.f32.mrf.mxu0  ;;  %v3330_v22 = vld [vmem:[%s6127_s1 + $0x388] sm:$0xff] }
 0x110   : > { %4491 = vmatprep.subr.mxu0 %v3380_v59  ;;  %4298 = vmatprep.mubr.f32.mxu1 %v6218_v39 }
 0x111   : > { %4492 = vmatpush3.msra.mxu0 %v3380_v59  ;;  %4299 = vmatmul.mubr.f32.gmra.mxu1 %v5249_v10  ;;  %v5637_v47 = vpop.f32.mrf.mxu1 }
 0x112   : > { %4378 = vmatprep.mubr.f32.mxu0 %v5256_v43  ;;  %4413 = vmatprep.subr.mxu1 %v3331_v34 }
 0x113   : > { %4379 = vmatmul.mubr.f32.gmra.mxu0 %v5260_v14  ;;  %4414 = vmatpush3.msra.mxu1 %v3331_v34  ;;  %v5644_v10 = vpop.f32.mrf.mxu0  ;;  %v5646_v50 = vpop.f32.mrf.mxu1  ;;  %v3378_v14 = vld [vmem:[%s6127_s1 + $0x408] sm:$0xff] }
 0x114   : > { %4493 = vmatprep.subr.mxu0 %v3379_v46  ;;  %4301 = vmatprep.mubr.f32.mxu1 %v5264_v7  ;;  %v3302_v34 = vld [vmem:[%s4716_s22 + $0x69] sm:$0xff] }
 0x115   : > { %4494 = vmatpush3.msra.mxu0 %v3379_v46  ;;  %4302 = vmatmul.mubr.f32.gmra.mxu1 %v5271_v2  ;;  %v5653_v43 = vpop.f32.mrf.mxu0  ;;  %v3279_v2 = vld [vmem:[%s4716_s22 + $0x198] sm:$0xff] }
 0x116   : > { %4381 = vmatprep.mubr.f32.mxu0 %v5428_v29  ;;  %4415 = vmatprep.subr.mxu1 %v3330_v22  ;;  %v3280_v29 = vld [vmem:[%s4716_s22 + $0x1a0] sm:$0xff] }
 0x117   : > { %4382 = vmatmul.mubr.f32.gmra.mxu0 %v5432_v30  ;;  %4416 = vmatpush3.msra.mxu1 %v3330_v22  ;;  %v5663_v7 = vpop.f32.mrf.mxu1  ;;  %v3303_v22 = vld [vmem:[%s4716_s22 + $0x79] sm:$0xff] }
 0x118   : > { %4495 = vmatprep.subr.mxu0 %v3378_v14  ;;  %4304 = vmatprep.mubr.f32.mxu1 %v5656_v45 }
 0x119   : > { %4496 = vmatpush3.msra.mxu0 %v3378_v14  ;;  %4305 = vmatmul.mubr.f32.gmra.mxu1 %v5660_v58  ;;  %v5672_v30 = vpop.f32.mrf.mxu0  ;;  %v5674_v35 = vpop.f32.mrf.mxu1 }
 0x11a   : > { %4384 = vmatprep.mubr.f32.mxu0 %v3279_v2  ;;  %4417 = vmatprep.subr.mxu1 %v3329_v3  ;;  %v3350_v2 = vld [vmem:[%s4716_s22 + $0x6a] sm:$0xff] }
 0x11b   : > { %4385 = vmatmul.mubr.f32.gmra.mxu0 %v3280_v29  ;;  %4418 = vmatpush3.msra.mxu1 %v3329_v3  ;;  %v5681_v41 = vpop.f32.mrf.mxu0 }
 0x11c   : > { %4497 = vmatprep.subr.mxu0 %v3377_v15  ;;  %4419 = vmatprep.mubr.f32.mxu1 %v3297_v19 }
 0x11d   : > { %4498 = vmatpush3.msra.mxu0 %v3377_v15  ;;  %v3941_v57 = vpop.f32.mrf.mxu1  ;;  %4420 = vmatmul.mubr.f32.vlgmr.msra.gmra.mxu1 %v3298_v36  ;;  %v3351_v15 = vld [vmem:[%s4716_s22 + $0x7a] sm:$0xff] }
 0x11e   : > { %v573_v38 = vadd.f32 %v3941_v57, %v5506_v23  ;;  %4499 = vmatprep.mubr.f32.mxu0 %v3345_v5  ;;  %4422 = vmatprep.mubr.f32.mxu1 %v3299_v44  ;;  %v3349_v23 = vld [vmem:[%s4716_s22 + $0x62] sm:$0xff] }
 0x11f   : > { %v4021_v4 = vpop.f32.mrf.mxu0  ;;  %4500 = vmatmul.mubr.f32.vlgmr.msra.gmra.mxu0 %v3346_v52  ;;  %v567_v17 = vpop.f32.mrf.mxu1  ;;  %v3304_v36 = vld [vmem:[%s4716_s22 + $0x81] sm:$0xff]  ;;  %v3305_v52 = vld [vmem:[%s4716_s22 + $0x91] sm:$0xff] }
 0x120   : > { %v5690_v12 = vadd.f32 %v4021_v4, %v573_v38  ;;  %v568_v62 = vadd.f32 %v567_v17, %v5515_v21  ;;  %4502 = vmatprep.mubr.f32.mxu0 %v3347_v32  ;;  %v3352_v32 = vld [vmem:[%s4716_s22 + $0x82] sm:$0xff]  ;;  %v3353_v4 = vld [vmem:[%s4716_s22 + $0x92] sm:$0xff] }
 0x121   : > { %v841_v0 = vpop.f32.mrf.mxu0  ;;  %v3944_v18 = vpop.f32.mrf.mxu1  ;;  %4423 = vmatmul.mubr.f32.gmra.mxu1 %v3300_v1 }
 0x122   : > { %v5695_v13 = vadd.f32 %v841_v0, %v568_v62  ;;  %v583_v59 = vadd.f32 %v3944_v18, %v5529_v55  ;;  %4425 = vmatprep.mubr.f32.mxu1 %v3301_v8  ;;  %v3306_v8 = vld [vmem:[%s4716_s22 + $0x99] sm:$0xff]  ;;  %v3307_v0 = vld [vmem:[%s4716_s22 + $0xa9] sm:$0xff] }
 0x123   : > { %v4024_v39 = vpop.f32.mrf.mxu0  ;;  %4503 = vmatmul.mubr.f32.gmra.mxu0 %v3348_v6  ;;  %v577_v46 = vpop.f32.mrf.mxu1 }
 0x124   : > { %v5700_v21 = vadd.f32 %v4024_v39, %v583_v59  ;;  %v578_v14 = vadd.f32 %v577_v46, %v5538_v63  ;;  %4505 = vmatprep.mubr.f32.mxu0 %v3349_v23  ;;  %v3354_v23 = vld [vmem:[%s4716_s22 + $0x9a] sm:$0xff]  ;;  %v3355_v39 = vld [vmem:[%s4716_s22 + $0xaa] sm:$0xff] }
 0x125   : > { %v851_v3 = vpop.f32.mrf.mxu0  ;;  %v3947_v29 = vpop.f32.mrf.mxu1  ;;  %4426 = vmatmul.mubr.f32.gmra.mxu1 %v3302_v34 }
 0x126   : > { %v5705_v55 = vadd.f32 %v851_v3, %v578_v14  ;;  %v593_v19 = vadd.f32 %v3947_v29, %v5552_v28  ;;  %4428 = vmatprep.mubr.f32.mxu1 %v3303_v22  ;;  %v3308_v22 = vld [vmem:[%s4716_s22 + $0xb1] sm:$0xff]  ;;  %v3309_v3 = vld [vmem:[%s4716_s22 + $0xc1] sm:$0xff] }
 0x127   : > { %v4027_v5 = vpop.f32.mrf.mxu0  ;;  %4506 = vmatmul.mubr.f32.gmra.mxu0 %v3350_v2  ;;  %v587_v44 = vpop.f32.mrf.mxu1 }
 0x128   : > { %v5710_v63 = vadd.f32 %v4027_v5, %v593_v19  ;;  %v588_v57 = vadd.f32 %v587_v44, %v5561_v56  ;;  %4508 = vmatprep.mubr.f32.mxu0 %v3351_v15  ;;  %v3356_v15 = vld [vmem:[%s4716_s22 + $0xb2] sm:$0xff]  ;;  %v3357_v5 = vld [vmem:[%s4716_s22 + $0xc2] sm:$0xff] }
 0x129   : > { %v861_v38 = vpop.f32.mrf.mxu0  ;;  %v3950_v1 = vpop.f32.mrf.mxu1  ;;  %4429 = vmatmul.mubr.f32.gmra.mxu1 %v3304_v36 }
 0x12a   : > { %v5715_v28 = vadd.f32 %v861_v38, %v588_v57  ;;  %v603_v17 = vadd.f32 %v3950_v1, %v5575_v60  ;;  %4431 = vmatprep.mubr.f32.mxu1 %v3305_v52  ;;  %v3310_v52 = vld [vmem:[%s4716_s22 + $0xc9] sm:$0xff]  ;;  %v3311_v38 = vld [vmem:[%s4716_s22 + $0xd9] sm:$0xff] }
 0x12b   : > { %v4030_v62 = vpop.f32.mrf.mxu0  ;;  %4509 = vmatmul.mubr.f32.gmra.mxu0 %v3352_v32  ;;  %v597_v6 = vpop.f32.mrf.mxu1 }
 0x12c   : > { %v5720_v56 = vadd.f32 %v4030_v62, %v603_v17  ;;  %v598_v18 = vadd.f32 %v597_v6, %v5584_v40  ;;  %4511 = vmatprep.mubr.f32.mxu0 %v3353_v4  ;;  %v3358_v4 = vld [vmem:[%s4716_s22 + $0xca] sm:$0xff]  ;;  %v3359_v62 = vld [vmem:[%s4716_s22 + $0xda] sm:$0xff] }
 0x12d   : > { %v871_v59 = vpop.f32.mrf.mxu0  ;;  %v3953_v34 = vpop.f32.mrf.mxu1  ;;  %4432 = vmatmul.mubr.f32.gmra.mxu1 %v3306_v8 }
 0x12e   : > { %v5725_v60 = vadd.f32 %v871_v59, %v598_v18  ;;  %v613_v46 = vadd.f32 %v3953_v34, %v5598_v53  ;;  %4434 = vmatprep.mubr.f32.mxu1 %v3307_v0  ;;  %v3312_v0 = vld [vmem:[%s4716_s22 + $0xe1] sm:$0xff]  ;;  %v3313_v59 = vld [vmem:[%s4716_s22 + $0xf1] sm:$0xff] }
 0x12f   : > { %v4033_v14 = vpop.f32.mrf.mxu0  ;;  %4512 = vmatmul.mubr.f32.gmra.mxu0 %v3354_v23  ;;  %v607_v2 = vpop.f32.mrf.mxu1 }
 0x130   : > { %v5730_v40 = vadd.f32 %v4033_v14, %v613_v46  ;;  %v608_v29 = vadd.f32 %v607_v2, %v5607_v61  ;;  %4514 = vmatprep.mubr.f32.mxu0 %v3355_v39  ;;  %v3360_v39 = vld [vmem:[%s4716_s22 + $0xe2] sm:$0xff]  ;;  %v3361_v14 = vld [vmem:[%s4716_s22 + $0xf2] sm:$0xff] }
 0x131   : > { %v881_v19 = vpop.f32.mrf.mxu0  ;;  %v3956_v36 = vpop.f32.mrf.mxu1  ;;  %4435 = vmatmul.mubr.f32.gmra.mxu1 %v3308_v22 }
 0x132   : > { %v5735_v53 = vadd.f32 %v881_v19, %v608_v29  ;;  %v623_v44 = vadd.f32 %v3956_v36, %v5621_v26  ;;  %4437 = vmatprep.mubr.f32.mxu1 %v3309_v3  ;;  %v3314_v3 = vld [vmem:[%s4716_s22 + $0xf9] sm:$0xff]  ;;  %v3315_v19 = vld [vmem:[%s4716_s22 + $0x109] sm:$0xff] }
 0x133   : > { %v4036_v57 = vpop.f32.mrf.mxu0  ;;  %4515 = vmatmul.mubr.f32.gmra.mxu0 %v3356_v15  ;;  %v617_v32 = vpop.f32.mrf.mxu1 }
 0x134   : > { %v5740_v61 = vadd.f32 %v4036_v57, %v623_v44  ;;  %v618_v1 = vadd.f32 %v617_v32, %v5630_v20  ;;  %4517 = vmatprep.mubr.f32.mxu0 %v3357_v5  ;;  %v3362_v5 = vld [vmem:[%s4716_s22 + $0xfa] sm:$0xff]  ;;  %v3363_v57 = vld [vmem:[%s4716_s22 + $0x10a] sm:$0xff] }
 0x135   : > { %v891_v17 = vpop.f32.mrf.mxu0  ;;  %v3959_v8 = vpop.f32.mrf.mxu1  ;;  %4438 = vmatmul.mubr.f32.gmra.mxu1 %v3310_v52 }
 0x136   : > { %v5745_v26 = vadd.f32 %v891_v17, %v618_v1  ;;  %v633_v6 = vadd.f32 %v3959_v8, %v5644_v10  ;;  %4440 = vmatprep.mubr.f32.mxu1 %v3311_v38  ;;  %v3316_v38 = vld [vmem:[%s4716_s22 + $0x111] sm:$0xff]  ;;  %v3317_v17 = vld [vmem:[%s4716_s22 + $0x121] sm:$0xff] }
 0x137   : > { %v4039_v18 = vpop.f32.mrf.mxu0  ;;  %4518 = vmatmul.mubr.f32.gmra.mxu0 %v3358_v4  ;;  %v627_v23 = vpop.f32.mrf.mxu1 }
 0x138   : > { %v5750_v20 = vadd.f32 %v4039_v18, %v633_v6  ;;  %v628_v34 = vadd.f32 %v627_v23, %v5653_v43  ;;  %4520 = vmatprep.mubr.f32.mxu0 %v3359_v62  ;;  %v3364_v62 = vld [vmem:[%s4716_s22 + $0x112] sm:$0xff]  ;;  %v3365_v18 = vld [vmem:[%s4716_s22 + $0x122] sm:$0xff] }
 0x139   : > { %v901_v46 = vpop.f32.mrf.mxu0  ;;  %v3962_v22 = vpop.f32.mrf.mxu1  ;;  %4441 = vmatmul.mubr.f32.gmra.mxu1 %v3312_v0 }
 0x13a   : > { %v5755_v10 = vadd.f32 %v901_v46, %v628_v34  ;;  %v643_v2 = vadd.f32 %v3962_v22, %v5672_v30  ;;  %4443 = vmatprep.mubr.f32.mxu1 %v3313_v59  ;;  %v3318_v59 = vld [vmem:[%s4716_s22 + $0x129] sm:$0xff]  ;;  %v3319_v46 = vld [vmem:[%s4716_s22 + $0x139] sm:$0xff] }
 0x13b   : > { %v4042_v29 = vpop.f32.mrf.mxu0  ;;  %4521 = vmatmul.mubr.f32.gmra.mxu0 %v3360_v39  ;;  %v637_v15 = vpop.f32.mrf.mxu1 }
 0x13c   : > { %v5760_v43 = vadd.f32 %v4042_v29, %v643_v2  ;;  %v638_v36 = vadd.f32 %v637_v15, %v5681_v41  ;;  %4523 = vmatprep.mubr.f32.mxu0 %v3361_v14  ;;  %v3366_v14 = vld [vmem:[%s4716_s22 + $0x12a] sm:$0xff]  ;;  %v3367_v29 = vld [vmem:[%s4716_s22 + $0x13a] sm:$0xff] }
 0x13d   : > { %v911_v44 = vpop.f32.mrf.mxu0  ;;  %v3965_v52 = vpop.f32.mrf.mxu1  ;;  %4444 = vmatmul.mubr.f32.gmra.mxu1 %v3314_v3 }
 0x13e   : > { %v5765_v30 = vadd.f32 %v911_v44, %v638_v36  ;;  %v653_v32 = vadd.f32 %v3965_v52, %v5500_v11  ;;  %4446 = vmatprep.mubr.f32.mxu1 %v3315_v19  ;;  %v3320_v19 = vld [vmem:[%s4716_s22 + $0x141] sm:$0xff]  ;;  %v3321_v44 = vld [vmem:[%s4716_s22 + $0x151] sm:$0xff] }
 0x13f   : > { %v4045_v1 = vpop.f32.mrf.mxu0  ;;  %4524 = vmatmul.mubr.f32.gmra.mxu0 %v3362_v5  ;;  %v647_v4 = vpop.f32.mrf.mxu1 }
 0x140   : > { %v5770_v41 = vadd.f32 %v4045_v1, %v653_v32  ;;  %v648_v8 = vadd.f32 %v647_v4, %v5509_v31  ;;  %4526 = vmatprep.mubr.f32.mxu0 %v3363_v57  ;;  %v3368_v57 = vld [vmem:[%s4716_s22 + $0x142] sm:$0xff]  ;;  %v3369_v1 = vld [vmem:[%s4716_s22 + $0x152] sm:$0xff] }
 0x141   : > { %v921_v6 = vpop.f32.mrf.mxu0  ;;  %v3968_v0 = vpop.f32.mrf.mxu1  ;;  %4447 = vmatmul.mubr.f32.gmra.mxu1 %v3316_v38 }
 0x142   : > { %v5775_v11 = vadd.f32 %v921_v6, %v648_v8  ;;  %v663_v23 = vadd.f32 %v3968_v0, %v5522_v42  ;;  %4449 = vmatprep.mubr.f32.mxu1 %v3317_v17  ;;  %v3322_v17 = vld [vmem:[%s4716_s22 + $0x159] sm:$0xff]  ;;  %v3323_v6 = vld [vmem:[%s4716_s22 + $0x169] sm:$0xff] }
 0x143   : > { %v4048_v34 = vpop.f32.mrf.mxu0  ;;  %4527 = vmatmul.mubr.f32.gmra.mxu0 %v3364_v62  ;;  %v657_v39 = vpop.f32.mrf.mxu1 }
 0x144   : > { %v5780_v31 = vadd.f32 %v4048_v34, %v663_v23  ;;  %v658_v22 = vadd.f32 %v657_v39, %v5531_v48  ;;  %4529 = vmatprep.mubr.f32.mxu0 %v3365_v18  ;;  %v3370_v18 = vld [vmem:[%s4716_s22 + $0x15a] sm:$0xff]  ;;  %v3371_v34 = vld [vmem:[%s4716_s22 + $0x16a] sm:$0xff] }
 0x145   : > { %v931_v2 = vpop.f32.mrf.mxu0  ;;  %v3971_v3 = vpop.f32.mrf.mxu1  ;;  %4450 = vmatmul.mubr.f32.gmra.mxu1 %v3318_v59 }
 0x146   : > { %v5785_v42 = vadd.f32 %v931_v2, %v658_v22  ;;  %v673_v15 = vadd.f32 %v3971_v3, %v5545_v27  ;;  %4452 = vmatprep.mubr.f32.mxu1 %v3319_v46  ;;  %v3324_v46 = vld [vmem:[%s4716_s22 + $0x171] sm:$0xff] }
 0x147   : > { %v4051_v36 = vpop.f32.mrf.mxu0  ;;  %4530 = vmatmul.mubr.f32.gmra.mxu0 %v3366_v14  ;;  %v667_v5 = vpop.f32.mrf.mxu1  ;;  %v3372_v3 = vld [vmem:[%s4716_s22 + $0x172] sm:$0xff] }
 0x148   : > { %v5790_v48 = vadd.f32 %v4051_v36, %v673_v15  ;;  %v668_v52 = vadd.f32 %v667_v5, %v5554_v33  ;;  %4532 = vmatprep.mubr.f32.mxu0 %v3367_v29 }
 0x149   : > { %v941_v32 = vpop.f32.mrf.mxu0  ;;  %v3974_v38 = vpop.f32.mrf.mxu1  ;;  %4453 = vmatmul.mubr.f32.gmra.mxu1 %v3320_v19 }
 0x14a   : > { %v5795_v27 = vadd.f32 %v941_v32, %v668_v52  ;;  %v683_v4 = vadd.f32 %v3974_v38, %v5568_v49  ;;  %4455 = vmatprep.mubr.f32.mxu1 %v3321_v44  ;;  %v3327_v44 = vld [vmem:[%s4716_s22 + $0x199] sm:$0xff] }
 0x14b   : > { %v4054_v8 = vpop.f32.mrf.mxu0  ;;  %4533 = vmatmul.mubr.f32.gmra.mxu0 %v3368_v57  ;;  %v677_v62 = vpop.f32.mrf.mxu1  ;;  %v3375_v38 = vld [vmem:[%s4716_s22 + $0x19a] sm:$0xff] }
 0x14c   : > { %v5800_v33 = vadd.f32 %v4054_v8, %v683_v4  ;;  %v678_v0 = vadd.f32 %v677_v62, %v5577_v24  ;;  %4535 = vmatprep.mubr.f32.mxu0 %v3369_v1  ;;  %v3328_v1 = vld [vmem:[%s4716_s22 + $0x1a1] sm:$0xff] }
 0x14d   : > { %v951_v23 = vpop.f32.mrf.mxu0  ;;  %v3977_v59 = vpop.f32.mrf.mxu1  ;;  %4456 = vmatmul.mubr.f32.gmra.mxu1 %v3322_v17 }
 0x14e   : > { %v5805_v39 = vadd.f32 %v951_v23, %v678_v0  ;;  %v693_v49 = vadd.f32 %v3977_v59, %v5591_v51  ;;  %4458 = vmatprep.mubr.f32.mxu1 %v3323_v6 }
 0x14f   : > { %v4057_v22 = vpop.f32.mrf.mxu0  ;;  %4536 = vmatmul.mubr.f32.gmra.mxu0 %v3370_v18  ;;  %v687_v14 = vpop.f32.mrf.mxu1 }
 0x150   : > { %v5809_v2 = vadd.f32 %v4057_v22, %v693_v49  ;;  %v688_v24 = vadd.f32 %v687_v14, %v5600_v9  ;;  %4538 = vmatprep.mubr.f32.mxu0 %v3371_v34 }
 0x151   : > { %v961_v29 = vpop.f32.mrf.mxu0  ;;  %v3980_v15 = vpop.f32.mrf.mxu1  ;;  %4459 = vmatmul.mubr.f32.gmra.mxu1 %v3324_v46 }
 0x152   : > { %v5813_v19 = vadd.f32 %v961_v29, %v688_v24  ;;  %v703_v51 = vadd.f32 %v3980_v15, %v5614_v16  ;;  %4461 = vmatprep.mubr.f32.mxu1 %v5436_v54 }
 0x153   : > { %v4060_v36 = vpop.f32.mrf.mxu0  ;;  %4539 = vmatmul.mubr.f32.gmra.mxu0 %v3372_v3  ;;  %v697_v5 = vpop.f32.mrf.mxu1 }
 0x154   : > { %v5818_v52 = vadd.f32 %v4060_v36, %v703_v51  ;;  %v698_v9 = vadd.f32 %v697_v5, %v5623_v37  ;;  %4541 = vmatprep.mubr.f32.mxu0 %v5656_v45  ;;  %v3376_v45 = vld [vmem:[%s4716_s22 + $0x1a2] sm:$0xff]  ;;  %s3072_s22 = sshll.u32 %s6252_s9, 1 }
 0x155   : > { %v971_v57 = vpop.f32.mrf.mxu0  ;;  %v3983_v32 = vpop.f32.mrf.mxu1  ;;  %4462 = vmatmul.mubr.f32.gmra.mxu1 %v5443_v25  ;;  %s178_s30 = scalar_lea.vmem %s6128_s2, %s3072_s22 }
 0x156   : > { %v5824_v16 = vadd.f32 %v971_v57, %v698_v9  ;;  %v713_v54 = vadd.f32 %v3983_v32, %v5637_v47  ;;  %4464 = vmatprep.mubr.f32.mxu1 %v3327_v44 }
 0x157   : > { %v4063_v4 = vpop.f32.mrf.mxu0  ;;  %4542 = vmatmul.mubr.f32.gmra.mxu0 %v5660_v58  ;;  %v707_v17 = vpop.f32.mrf.mxu1 }
 0x158   : > { %v5829_v8 = vadd.f32 %v4063_v4, %v713_v54  ;;  %v708_v37 = vadd.f32 %v707_v17, %v5646_v50  ;;  %4544 = vmatprep.mubr.f32.mxu0 %v3375_v38 }
 0x159   : > { %v981_v62 = vpop.f32.mrf.mxu0  ;;  %v3986_v6 = vpop.f32.mrf.mxu1  ;;  %4465 = vmatmul.mubr.f32.gmra.mxu1 %v3328_v1 }
 0x15a   : > { %v5833_v25 = vadd.f32 %v981_v62, %v708_v37  ;;  %v723_v0 = vadd.f32 %v3986_v6, %v5663_v7 }
 0x15b   : > { %v4066_v47 = vpop.f32.mrf.mxu0  ;;  %4545 = vmatmul.mubr.f32.gmra.mxu0 %v3376_v45  ;;  %v717_v18 = vpop.f32.mrf.mxu1 }
 0x15c   : > { %v5836_v23 = vadd.f32 %v4066_v47, %v723_v0  ;;  %v718_v58 = vadd.f32 %v717_v18, %v5674_v35 }
 0x15d   : > { %v991_v59 = vpop.f32.mrf.mxu0  ;;  %v4101_v34 = vpop.f32.mrf.mxu1 }
 0x15e   : > { %v5839_v49 = vadd.f32 %v991_v59, %v718_v58  ;;  %v1308_v50 = vadd.f32 %v4101_v34, %v5690_v12 }
 0x15f   : > { %v4181_v46 = vpop.f32.mrf.mxu0  ;;  %v1148_v22 = vpop.f32.mrf.mxu1 }
 0x160   : > { %v5842_v14 = vadd.f32 %v4181_v46, %v1308_v50  ;;  %v1307_v24 = vadd.f32 %v1148_v22, %v5695_v13 }
 0x161   : > { %v1454_v7 = vpop.f32.mrf.mxu0  ;;  %v4104_v3 = vpop.f32.mrf.mxu1 }
 0x162   : > { %v5845_v29 = vadd.f32 %v1454_v7, %v1307_v24  ;;  %v1310_v15 = vadd.f32 %v4104_v3, %v5700_v21 }
 0x163   : > { %v4184_v51 = vpop.f32.mrf.mxu0  ;;  %v1158_v35 = vpop.f32.mrf.mxu1 }
 0x164   : > { %v5848_v36 = vadd.f32 %v4184_v51, %v1310_v15  ;;  %v1309_v5 = vadd.f32 %v1158_v35, %v5705_v55 }
 0x165   : > { %v1464_v44 = vpop.f32.mrf.mxu0  ;;  %v4107_v12 = vpop.f32.mrf.mxu1 }
 0x166   : > { %v5851_v9 = vadd.f32 %v1464_v44, %v1309_v5  ;;  %v1312_v57 = vadd.f32 %v4107_v12, %v5710_v63 }
 0x167   : > { %v4187_v32 = vpop.f32.mrf.mxu0  ;;  %v1168_v13 = vpop.f32.mrf.mxu1 }
 0x168   : > { %v5854_v38 = vadd.f32 %v4187_v32, %v1312_v57  ;;  %v1311_v54 = vadd.f32 %v1168_v13, %v5715_v28 }
 0x169   : > { %v1474_v1 = vpop.f32.mrf.mxu0  ;;  %v4110_v21 = vpop.f32.mrf.mxu1 }
 0x16a   : > { %v5857_v4 = vadd.f32 %v1474_v1, %v1311_v54  ;;  %v1314_v17 = vadd.f32 %v4110_v21, %v5720_v56 }
 0x16b   : > { %v4190_v37 = vpop.f32.mrf.mxu0  ;;  %v1178_v55 = vpop.f32.mrf.mxu1 }
 0x16c   : > { %v5860_v45 = vadd.f32 %v4190_v37, %v1314_v17  ;;  %v1313_v62 = vadd.f32 %v1178_v55, %v5725_v60 }
 0x16d   : > { %v1484_v6 = vpop.f32.mrf.mxu0  ;;  %v4113_v63 = vpop.f32.mrf.mxu1 }
 0x16e   : > { %v5863_v0 = vadd.f32 %v1484_v6, %v1313_v62  ;;  %v1316_v47 = vadd.f32 %v4113_v63, %v5730_v40 }
 0x16f   : > { %v4193_v18 = vpop.f32.mrf.mxu0  ;;  %v1188_v28 = vpop.f32.mrf.mxu1 }
 0x170   : > { %v5866_v58 = vadd.f32 %v4193_v18, %v1316_v47  ;;  %v1315_v59 = vadd.f32 %v1188_v28, %v5735_v53 }
 0x171   : > { %v1494_v34 = vpop.f32.mrf.mxu0  ;;  %v4116_v56 = vpop.f32.mrf.mxu1 }
 0x172   : > { %v5869_v50 = vadd.f32 %v1494_v34, %v1315_v59  ;;  %v1318_v46 = vadd.f32 %v4116_v56, %v5740_v61 }
 0x173   : > { %v4196_v22 = vpop.f32.mrf.mxu0  ;;  %v1198_v60 = vpop.f32.mrf.mxu1 }
 0x174   : > { %v5872_v24 = vadd.f32 %v4196_v22, %v1318_v46  ;;  %v1317_v7 = vadd.f32 %v1198_v60, %v5745_v26 }
 0x175   : > { %v1504_v3 = vpop.f32.mrf.mxu0  ;;  %v4119_v40 = vpop.f32.mrf.mxu1 }
 0x176   : > { %v5875_v15 = vadd.f32 %v1504_v3, %v1317_v7  ;;  %v1320_v51 = vadd.f32 %v4119_v40, %v5750_v20 }
 0x177   : > { %v4199_v35 = vpop.f32.mrf.mxu0  ;;  %v1208_v53 = vpop.f32.mrf.mxu1 }
 0x178   : > { %v5878_v5 = vadd.f32 %v4199_v35, %v1320_v51  ;;  %v1319_v44 = vadd.f32 %v1208_v53, %v5755_v10 }
 0x179   : > { %v1514_v12 = vpop.f32.mrf.mxu0  ;;  %v4122_v61 = vpop.f32.mrf.mxu1 }
 0x17a   : > { %v5881_v57 = vadd.f32 %v1514_v12, %v1319_v44  ;;  %v1322_v32 = vadd.f32 %v4122_v61, %v5760_v43 }
 0x17b   : > { %v4202_v13 = vpop.f32.mrf.mxu0  ;;  %v1218_v26 = vpop.f32.mrf.mxu1 }
 0x17c   : > { %v5884_v54 = vadd.f32 %v4202_v13, %v1322_v32  ;;  %v1321_v1 = vadd.f32 %v1218_v26, %v5765_v30 }
 0x17d   : > { %v1524_v21 = vpop.f32.mrf.mxu0  ;;  %v4125_v20 = vpop.f32.mrf.mxu1 }
 0x17e   : > { %v5887_v17 = vadd.f32 %v1524_v21, %v1321_v1  ;;  %v1324_v37 = vadd.f32 %v4125_v20, %v5770_v41 }
 0x17f   : > { %v4205_v55 = vpop.f32.mrf.mxu0  ;;  %v1228_v10 = vpop.f32.mrf.mxu1 }
 0x180   : > { %v5890_v62 = vadd.f32 %v4205_v55, %v1324_v37  ;;  %v1323_v6 = vadd.f32 %v1228_v10, %v5775_v11 }
 0x181   : > { %v1534_v63 = vpop.f32.mrf.mxu0  ;;  %v4128_v43 = vpop.f32.mrf.mxu1 }
 0x182   : > { %v5893_v47 = vadd.f32 %v1534_v63, %v1323_v6  ;;  %v1326_v18 = vadd.f32 %v4128_v43, %v5780_v31 }
 0x183   : > { %v4208_v28 = vpop.f32.mrf.mxu0  ;;  %v1238_v30 = vpop.f32.mrf.mxu1 }
 0x184   : > { %v5896_v59 = vadd.f32 %v4208_v28, %v1326_v18  ;;  %v1325_v34 = vadd.f32 %v1238_v30, %v5785_v42 }
 0x185   : > { %v1544_v56 = vpop.f32.mrf.mxu0  ;;  %v4131_v41 = vpop.f32.mrf.mxu1 }
 0x186   : > { %v5899_v46 = vadd.f32 %v1544_v56, %v1325_v34  ;;  %v1328_v22 = vadd.f32 %v4131_v41, %v5790_v48 }
 0x187   : > { %v4211_v60 = vpop.f32.mrf.mxu0  ;;  %v1248_v11 = vpop.f32.mrf.mxu1 }
 0x188   : > { %v5902_v7 = vadd.f32 %v4211_v60, %v1328_v22  ;;  %v1327_v3 = vadd.f32 %v1248_v11, %v5795_v27 }
 0x189   : > { %v1554_v40 = vpop.f32.mrf.mxu0  ;;  %v4134_v31 = vpop.f32.mrf.mxu1 }
 0x18a   : > { %v5905_v51 = vadd.f32 %v1554_v40, %v1327_v3  ;;  %v1330_v35 = vadd.f32 %v4134_v31, %v5800_v33 }
 0x18b   : > { %v4214_v53 = vpop.f32.mrf.mxu0  ;;  %v1258_v42 = vpop.f32.mrf.mxu1 }
 0x18c   : > { %v5908_v44 = vadd.f32 %v4214_v53, %v1330_v35  ;;  %v1329_v12 = vadd.f32 %v1258_v42, %v5805_v39 }
 0x18d   : > { %v1564_v61 = vpop.f32.mrf.mxu0  ;;  %v4137_v48 = vpop.f32.mrf.mxu1 }
 0x18e   : > { %v5911_v32 = vadd.f32 %v1564_v61, %v1329_v12  ;;  %v1332_v13 = vadd.f32 %v4137_v48, %v5809_v2 }
 0x18f   : > { %v4217_v26 = vpop.f32.mrf.mxu0  ;;  %v1268_v27 = vpop.f32.mrf.mxu1 }
 0x190   : > { %v5914_v1 = vadd.f32 %v4217_v26, %v1332_v13  ;;  %v1331_v21 = vadd.f32 %v1268_v27, %v5813_v19 }
 0x191   : > { %v1574_v20 = vpop.f32.mrf.mxu0  ;;  %v4140_v33 = vpop.f32.mrf.mxu1 }
 0x192   : > { %v5917_v37 = vadd.f32 %v1574_v20, %v1331_v21  ;;  %v1334_v55 = vadd.f32 %v4140_v33, %v5818_v52 }
 0x193   : > { %v4220_v10 = vpop.f32.mrf.mxu0  ;;  %v1278_v39 = vpop.f32.mrf.mxu1 }
 0x194   : > { %6219 = vst [vmem:[#allocation2_spill] sm:$0xff] %v5917_v37  ;;  %v5920_v6 = vadd.f32 %v4220_v10, %v1334_v55  ;;  %v1333_v63 = vadd.f32 %v1278_v39, %v5824_v16 }
 0x195   : > { %v1584_v43 = vpop.f32.mrf.mxu0  ;;  %v4143_v2 = vpop.f32.mrf.mxu1 }
 0x196   : > { %v5923_v18 = vadd.f32 %v1584_v43, %v1333_v63  ;;  %v1336_v28 = vadd.f32 %v4143_v2, %v5829_v8 }
 0x197   : > { %v4223_v30 = vpop.f32.mrf.mxu0  ;;  %v1288_v19 = vpop.f32.mrf.mxu1 }
 0x198   : > { %6220 = vst [vmem:[#allocation3_spill] sm:$0xff] %v5923_v18  ;;  %v5926_v34 = vadd.f32 %v4223_v30, %v1336_v28  ;;  %v1335_v56 = vadd.f32 %v1288_v19, %v5833_v25 }
 0x199   : > { %v1594_v41 = vpop.f32.mrf.mxu0  ;;  %v4146_v52 = vpop.f32.mrf.mxu1 }
 0x19a   : > { %v5929_v22 = vadd.f32 %v1594_v41, %v1335_v56  ;;  %v1338_v60 = vadd.f32 %v4146_v52, %v5836_v23 }
 0x19b   : > { %v4226_v11 = vpop.f32.mrf.mxu0  ;;  %v1298_v16 = vpop.f32.mrf.mxu1 }
 0x19c   : > { %6221 = vst [vmem:[#allocation4_spill] sm:$0xff] %v5929_v22  ;;  %v5932_v3 = vadd.f32 %v4226_v11, %v1338_v60  ;;  %v1337_v40 = vadd.f32 %v1298_v16, %v5839_v49 }
 0x19d   : > { %v1604_v31 = vpop.f32.mrf.mxu0  ;;  %v4261_v8 = vpop.f32.mrf.mxu1 }
 0x19e   : > { %v5935_v35 = vadd.f32 %v1604_v31, %v1337_v40  ;;  %v1920_v53 = vadd.f32 %v4261_v8, %v5842_v14 }
 0x19f   : > { %v4341_v42 = vpop.f32.mrf.mxu0  ;;  %v5938_v25 = vpop.f32.mrf.mxu1 }
 0x1a0   : > { %6222 = vst [vmem:[#allocation5_spill] sm:$0xff] %v5935_v35  ;;  %v5940_v12 = vadd.f32 %v4341_v42, %v1920_v53 }
 0x1a1   : > { %v5942_v61 = vpop.f32.mrf.mxu0  ;;  %v4264_v23 = vpop.f32.mrf.mxu1 }
 0x1a2   : > { %v1922_v48 = vadd.f32 %v4264_v23, %v5848_v36 }
 0x1a3   : > { %v4344_v13 = vpop.f32.mrf.mxu0  ;;  %v5945_v26 = vpop.f32.mrf.mxu1 }
 0x1a4   : > { %v5947_v49 = vadd.f32 %v4344_v13, %v1922_v48 }
 0x1a5   : > { %v5949_v27 = vpop.f32.mrf.mxu0  ;;  %v4267_v21 = vpop.f32.mrf.mxu1 }
 0x1a6   : > { %v1924_v14 = vadd.f32 %v4267_v21, %v5854_v38 }
 0x1a7   : > { %v4347_v20 = vpop.f32.mrf.mxu0  ;;  %v5952_v33 = vpop.f32.mrf.mxu1 }
 0x1a8   : > { %v5954_v55 = vadd.f32 %v4347_v20, %v1924_v14 }
 0x1a9   : > { %v5956_v10 = vpop.f32.mrf.mxu0  ;;  %v4270_v39 = vpop.f32.mrf.mxu1 }
 0x1aa   : > { %v1926_v36 = vadd.f32 %v4270_v39, %v5860_v45 }
 0x1ab   : > { %v4350_v63 = vpop.f32.mrf.mxu0  ;;  %v5959_v43 = vpop.f32.mrf.mxu1 }
 0x1ac   : > { %v5961_v2 = vadd.f32 %v4350_v63, %v1926_v36 }
 0x1ad   : > { %v5963_v28 = vpop.f32.mrf.mxu0  ;;  %v4273_v30 = vpop.f32.mrf.mxu1 }
 0x1ae   : > { %v1928_v38 = vadd.f32 %v4273_v30, %v5866_v58 }
 0x1af   : > { %v4353_v19 = vpop.f32.mrf.mxu0  ;;  %v5966_v56 = vpop.f32.mrf.mxu1 }
 0x1b0   : > { %v5968_v41 = vadd.f32 %v4353_v19, %v1928_v38 }
 0x1b1   : > { %v5970_v52 = vpop.f32.mrf.mxu0  ;;  %v4276_v60 = vpop.f32.mrf.mxu1 }
 0x1b2   : > { %v1930_v45 = vadd.f32 %v4276_v60, %v5872_v24 }
 0x1b3   : > { %v4356_v11 = vpop.f32.mrf.mxu0  ;;  %v5973_v16 = vpop.f32.mrf.mxu1 }
 0x1b4   : > { %v5975_v40 = vadd.f32 %v4356_v11, %v1930_v45 }
 0x1b5   : > { %v5977_v31 = vpop.f32.mrf.mxu0  ;;  %v4279_v8 = vpop.f32.mrf.mxu1 }
 0x1b6   : > { %v1932_v58 = vadd.f32 %v4279_v8, %v5878_v5 }
 0x1b7   : > { %v4359_v53 = vpop.f32.mrf.mxu0  ;;  %v5980_v42 = vpop.f32.mrf.mxu1 }
 0x1b8   : > { %v5982_v23 = vadd.f32 %v4359_v53, %v1932_v58 }
 0x1b9   : > { %v5984_v48 = vpop.f32.mrf.mxu0  ;;  %v4282_v13 = vpop.f32.mrf.mxu1 }
 0x1ba   : > { %v1934_v24 = vadd.f32 %v4282_v13, %v5884_v54 }
 0x1bb   : > { %v4362_v21 = vpop.f32.mrf.mxu0  ;;  %v5987_v14 = vpop.f32.mrf.mxu1 }
 0x1bc   : > { %v5989_v20 = vadd.f32 %v4362_v21, %v1934_v24 }
 0x1bd   : > { %v5991_v39 = vpop.f32.mrf.mxu0  ;;  %v4285_v36 = vpop.f32.mrf.mxu1 }
 0x1be   : > { %v1936_v5 = vadd.f32 %v4285_v36, %v5890_v62 }
 0x1bf   : > { %v4365_v63 = vpop.f32.mrf.mxu0  ;;  %v5994_v30 = vpop.f32.mrf.mxu1 }
 0x1c0   : > { %v5996_v38 = vadd.f32 %v4365_v63, %v1936_v5 }
 0x1c1   : > { %v5998_v19 = vpop.f32.mrf.mxu0  ;;  %v4288_v60 = vpop.f32.mrf.mxu1 }
 0x1c2   : > { %v1938_v54 = vadd.f32 %v4288_v60, %v5896_v59 }
 0x1c3   : > { %v4368_v45 = vpop.f32.mrf.mxu0  ;;  %v6001_v11 = vpop.f32.mrf.mxu1 }
 0x1c4   : > { %v6003_v8 = vadd.f32 %v4368_v45, %v1938_v54 }
 0x1c5   : > { %v6005_v58 = vpop.f32.mrf.mxu0  ;;  %v4291_v53 = vpop.f32.mrf.mxu1 }
 0x1c6   : > { %v1940_v62 = vadd.f32 %v4291_v53, %v5902_v7 }
 0x1c7   : > { %v4371_v13 = vpop.f32.mrf.mxu0  ;;  %v6008_v24 = vpop.f32.mrf.mxu1 }
 0x1c8   : > { %v6010_v21 = vadd.f32 %v4371_v13, %v1940_v62 }
 0x1c9   : > { %v6012_v36 = vpop.f32.mrf.mxu0  ;;  %v4294_v5 = vpop.f32.mrf.mxu1 }
 0x1ca   : > { %v1942_v59 = vadd.f32 %v4294_v5, %v5908_v44 }
 0x1cb   : > { %v4374_v63 = vpop.f32.mrf.mxu0  ;;  %v6015_v60 = vpop.f32.mrf.mxu1 }
 0x1cc   : > { %v6017_v54 = vadd.f32 %v4374_v63, %v1942_v59 }
 0x1cd   : > { %v6019_v45 = vpop.f32.mrf.mxu0  ;;  %v4297_v35 = vpop.f32.mrf.mxu1 }
 0x1ce   : > { %6223 = vst [vmem:[#allocation6_spill] sm:$0xff] %v6017_v54  ;;  %6224 = vst [vmem:[#allocation7_spill] sm:$0xff] %v6019_v45  ;;  %v1944_v7 = vadd.f32 %v4297_v35, %v5914_v1 }
 0x1cf   : > { %v4377_v53 = vpop.f32.mrf.mxu0  ;;  %v6022_v22 = vpop.f32.mrf.mxu1 }
 0x1d0   : > { %v6024_v62 = vadd.f32 %v4377_v53, %v1944_v7 }
 0x1d1   : > { %v6026_v13 = vpop.f32.mrf.mxu0  ;;  %v4300_v18 = vpop.f32.mrf.mxu1 }
 0x1d2   : > { %6225 = vst [vmem:[#allocation8_spill] sm:$0xff] %v6024_v62  ;;  %v1946_v44 = vadd.f32 %v4300_v18, %v5920_v6  ;;  %v1919_v6 = vadd.f32 %v5938_v25, %v5845_v29 }
 0x1d3   : > { %v4380_v5 = vpop.f32.mrf.mxu0  ;;  %v6029_v37 = vpop.f32.mrf.mxu1 }
 0x1d4   : > { %v6031_v59 = vadd.f32 %v4380_v5, %v1946_v44 }
 0x1d5   : > { %v6033_v63 = vpop.f32.mrf.mxu0  ;;  %v4303_v54 = vpop.f32.mrf.mxu1 }
 0x1d6   : > { %6226 = vst [vmem:[#allocation9_spill] sm:$0xff] %v6031_v59  ;;  %6227 = vst [vmem:[#allocation10_spill] sm:$0xff] %v6033_v63  ;;  %v1948_v1 = vadd.f32 %v4303_v54, %v5926_v34  ;;  %v2226_v54 = vadd.f32 %v5942_v61, %v1919_v6 }
 0x1d7   : > { %v4383_v35 = vpop.f32.mrf.mxu0  ;;  %v6036_v45 = vpop.f32.mrf.mxu1 }
 0x1d8   : > { %v6038_v7 = vadd.f32 %v4383_v35, %v1948_v1  ;;  %v1921_v1 = vadd.f32 %v5945_v26, %v5851_v9 }
 0x1d9   : > { %v6040_v53 = vpop.f32.mrf.mxu0  ;;  %v4306_v62 = vpop.f32.mrf.mxu1 }
 0x1da   : > { %6228 = vst [vmem:[#allocation11_spill] sm:$0xff] %v6038_v7  ;;  %6229 = vst [vmem:[#allocation12_spill] sm:$0xff] %v6040_v53  ;;  %v1950_v18 = vadd.f32 %v4306_v62, %v5932_v3  ;;  %v1923_v3 = vadd.f32 %v5952_v33, %v5857_v4 }
 0x1db   : > { %v4386_v44 = vpop.f32.mrf.mxu0  ;;  %v6045_v5 = vpop.f32.mrf.mxu1 }
 0x1dc   : > { %6230 = vst [vmem:[#allocation13_spill] sm:$0xff] %v6045_v5  ;;  %v6047_v59 = vadd.f32 %v4386_v44, %v1950_v18  ;;  %v2228_v44 = vadd.f32 %v5949_v27, %v1921_v1 }
 0x1dd   : > { %v6049_v63 = vpop.f32.mrf.mxu0  ;;  %v4421_v34 = vpop.f32.mrf.mxu1 }
 0x1de   : > { %6231 = vst [vmem:[#allocation14_spill] sm:$0xff] %v6047_v59  ;;  %6232 = vst [vmem:[#allocation15_spill] sm:$0xff] %v6049_v63  ;;  %v2533_v35 = vadd.f32 %v4421_v34, %v5940_v12  ;;  %v2230_v34 = vadd.f32 %v5956_v10, %v1923_v3 }
 0x1df   : > { %v4501_v7 = vpop.f32.mrf.mxu0  ;;  %v2373_v53 = vpop.f32.mrf.mxu1 }
 0x1e0   : > { %v2839_v29 = vadd.f32 %v4501_v7, %v2533_v35  ;;  %v2532_v25 = vadd.f32 %v2373_v53, %v2226_v54  ;;  %v1925_v7 = vadd.f32 %v5959_v43, %v5863_v0 }
 0x1e1   : > { %v2679_v62 = vpop.f32.mrf.mxu0  ;;  %v4424_v18 = vpop.f32.mrf.mxu1 }
 0x1e2   : > { %v2838_v59 = vadd.f32 %v2679_v62, %v2532_v25  ;;  %v2535_v63 = vadd.f32 %v4424_v18, %v5947_v49  ;;  %v2909_v5 = vmul.f32 %v2839_v29, %v2839_v29 }
 0x1e3   : > { %v4504_v61 = vpop.f32.mrf.mxu0  ;;  %v2383_v6 = vpop.f32.mrf.mxu1 }
 0x1e4   : > { %v2870_v9 = vadd.f32 %v2839_v29, %v2838_v59  ;;  %v2908_v26 = vmul.f32 %v2838_v59, %v2838_v59  ;;  %v2534_v12 = vadd.f32 %v2383_v6, %v2228_v44  ;;  %v2841_v54 = vadd.f32 %v4504_v61, %v2535_v63 }
 0x1e5   : > { %v2689_v53 = vpop.f32.mrf.mxu0  ;;  %v4427_v4 = vpop.f32.mrf.mxu1  ;;  %v2232_v59 = vadd.f32 %v5963_v28, %v1925_v7  ;;  %v1927_v63 = vadd.f32 %v5966_v56, %v5869_v50  ;;  %v1929_v28 = vadd.f32 %v5973_v16, %v5875_v15  ;;  %v1931_v15 = vadd.f32 %v5980_v42, %v5881_v57 }
 0x1e6   : > { %v2940_v33 = vadd.f32 %v2909_v5, %v2908_v26  ;;  %v2840_v35 = vadd.f32 %v2689_v53, %v2534_v12  ;;  %v2537_v27 = vadd.f32 %v4427_v4, %v5954_v55  ;;  %v2911_v3 = vmul.f32 %v2841_v54, %v2841_v54 }
 0x1e7   : > { %v4507_v1 = vpop.f32.mrf.mxu0  ;;  %v2393_v49 = vpop.f32.mrf.mxu1  ;;  %v2238_v57 = vadd.f32 %v5984_v48, %v1931_v15  ;;  %v1933_v42 = vadd.f32 %v5987_v14, %v5887_v17  ;;  %v1935_v17 = vadd.f32 %v5994_v30, %v5893_v47  ;;  %v1937_v47 = vadd.f32 %v6001_v11, %v5899_v46 }
 0x1e8   : > { %v2871_v25 = vadd.f32 %v2870_v9, %v2840_v35  ;;  %v2910_v62 = vmul.f32 %v2840_v35, %v2840_v35  ;;  %v2536_v18 = vadd.f32 %v2393_v49, %v2230_v34  ;;  %v2843_v29 = vadd.f32 %v4507_v1, %v2537_v27 }
 0x1e9   : > { %v2699_v44 = vpop.f32.mrf.mxu0  ;;  %v4430_v10 = vpop.f32.mrf.mxu1  ;;  %v2240_v48 = vadd.f32 %v5991_v39, %v1933_v42  ;;  %v2242_v39 = vadd.f32 %v5998_v19, %v1935_v17  ;;  %v2244_v19 = vadd.f32 %v6005_v58, %v1937_v47  ;;  %v1939_v46 = vadd.f32 %v6008_v24, %v5905_v51 }
 0x1ea   : > { %v2941_v6 = vadd.f32 %v2940_v33, %v2910_v62  ;;  %v2842_v0 = vadd.f32 %v2699_v44, %v2536_v18  ;;  %v2872_v43 = vadd.f32 %v2871_v25, %v2841_v54  ;;  %v2539_v5 = vadd.f32 %v4430_v10, %v5961_v2 }
 0x1eb   : > { %v4510_v55 = vpop.f32.mrf.mxu0  ;;  %v2403_v61 = vpop.f32.mrf.mxu1  ;;  %v2913_v7 = vmul.f32 %v2843_v29, %v2843_v29  ;;  %v2234_v2 = vadd.f32 %v5970_v52, %v1927_v63  ;;  %v2236_v18 = vadd.f32 %v5977_v31, %v1929_v28  ;;  %v2246_v58 = vadd.f32 %v6012_v36, %v1939_v46 }
 0x1ec   : > { %v2873_v26 = vadd.f32 %v2872_v43, %v2842_v0  ;;  %v2912_v9 = vmul.f32 %v2842_v0, %v2842_v0  ;;  %v2942_v12 = vadd.f32 %v2941_v6, %v2911_v3  ;;  %v2538_v34 = vadd.f32 %v2403_v61, %v2232_v59 }
 0x1ed   : > { %v2845_v53 = vadd.f32 %v4510_v55, %v2539_v5  ;;  %v2709_v4 = vpop.f32.mrf.mxu0  ;;  %v4433_v33 = vpop.f32.mrf.mxu1  ;;  %v1941_v51 = vadd.f32 %v6015_v60, %v5911_v32 }
 0x1ee   : > { %v2943_v35 = vadd.f32 %v2942_v12, %v2912_v9  ;;  %v2844_v54 = vadd.f32 %v2709_v4, %v2538_v34  ;;  %v2874_v27 = vadd.f32 %v2873_v26, %v2843_v29  ;;  %v2541_v50 = vadd.f32 %v4433_v33, %v5968_v41 }
 0x1ef   : > { %v4513_v56 = vpop.f32.mrf.mxu0  ;;  %v2413_v1 = vpop.f32.mrf.mxu1  ;;  %v2915_v10 = vmul.f32 %v2845_v53, %v2845_v53 }
 0x1f0   : > { %v2875_v49 = vadd.f32 %v2874_v27, %v2844_v54  ;;  %v2914_v25 = vmul.f32 %v2844_v54, %v2844_v54  ;;  %v2944_v62 = vadd.f32 %v2943_v35, %v2913_v7  ;;  %v2540_v16 = vadd.f32 %v2413_v1, %v2234_v2 }
 0x1f1   : > { %v2719_v59 = vpop.f32.mrf.mxu0  ;;  %v4436_v44 = vpop.f32.mrf.mxu1  ;;  %v2847_v29 = vadd.f32 %v4513_v56, %v2541_v50 }
 0x1f2   : > { %v2945_v3 = vadd.f32 %v2944_v62, %v2914_v25  ;;  %v2876_v6 = vadd.f32 %v2875_v49, %v2845_v53  ;;  %v2846_v41 = vadd.f32 %v2719_v59, %v2540_v16  ;;  %v2543_v52 = vadd.f32 %v4436_v44, %v5975_v40 }
 0x1f3   : > { %v4516_v0 = vpop.f32.mrf.mxu0  ;;  %v2423_v43 = vpop.f32.mrf.mxu1  ;;  %v2917_v9 = vmul.f32 %v2847_v29, %v2847_v29 }
 0x1f4   : > { %v2946_v63 = vadd.f32 %v2945_v3, %v2915_v10  ;;  %v2542_v5 = vadd.f32 %v2423_v43, %v2236_v18  ;;  %v2877_v55 = vadd.f32 %v2876_v6, %v2846_v41  ;;  %v2916_v61 = vmul.f32 %v2846_v41, %v2846_v41 }
 0x1f5   : > { %v2729_v31 = vpop.f32.mrf.mxu0  ;;  %v4439_v26 = vpop.f32.mrf.mxu1  ;;  %v2849_v28 = vadd.f32 %v4516_v0, %v2543_v52 }
 0x1f6   : > { %v2848_v12 = vadd.f32 %v2729_v31, %v2542_v5  ;;  %v2947_v34 = vadd.f32 %v2946_v63, %v2916_v61  ;;  %v2878_v7 = vadd.f32 %v2877_v55, %v2847_v29  ;;  %v2545_v40 = vadd.f32 %v4439_v26, %v5982_v23 }
 0x1f7   : > { %v4519_v53 = vpop.f32.mrf.mxu0  ;;  %v2433_v4 = vpop.f32.mrf.mxu1  ;;  %v2919_v1 = vmul.f32 %v2849_v28, %v2849_v28 }
 0x1f8   : > { %v2918_v33 = vmul.f32 %v2848_v12, %v2848_v12  ;;  %v2544_v35 = vadd.f32 %v2433_v4, %v2238_v57  ;;  %v2879_v54 = vadd.f32 %v2878_v7, %v2848_v12  ;;  %v2948_v27 = vadd.f32 %v2947_v34, %v2917_v9 }
 0x1f9   : > { %v2739_v50 = vpop.f32.mrf.mxu0  ;;  %v4442_v2 = vpop.f32.mrf.mxu1  ;;  %v2851_v25 = vadd.f32 %v4519_v53, %v2545_v40 }
 0x1fa   : > { %v2850_v14 = vadd.f32 %v2739_v50, %v2544_v35  ;;  %v2547_v56 = vadd.f32 %v4442_v2, %v5989_v20  ;;  %v2949_v49 = vadd.f32 %v2948_v27, %v2918_v33  ;;  %v2880_v23 = vadd.f32 %v2879_v54, %v2849_v28 }
 0x1fb   : > { %v4522_v62 = vpop.f32.mrf.mxu0  ;;  %v2443_v18 = vpop.f32.mrf.mxu1  ;;  %v2921_v20 = vmul.f32 %v2851_v25, %v2851_v25 }
 0x1fc   : > { %v2920_v15 = vmul.f32 %v2850_v14, %v2850_v14  ;;  %v2546_v16 = vadd.f32 %v2443_v18, %v2240_v48  ;;  %v2881_v59 = vadd.f32 %v2880_v23, %v2850_v14  ;;  %v2950_v44 = vadd.f32 %v2949_v49, %v2919_v1  ;;  %v6234_v18 = vld [vmem:[#allocation2_spill] sm:$0xff] }
 0x1fd   : > { %v2749_v10 = vpop.f32.mrf.mxu0  ;;  %v4445_v3 = vpop.f32.mrf.mxu1  ;;  %v2853_v30 = vadd.f32 %v4522_v62, %v2547_v56  ;;  %v6233_v62 = vld [vmem:[#allocation7_spill] sm:$0xff]  ;;  %v1943_v32 = vadd.f32 %v6022_v22, %v6234_v18 }
 0x1fe   : > { %v2852_v29 = vadd.f32 %v2749_v10, %v2546_v16  ;;  %v2951_v6 = vadd.f32 %v2950_v44, %v2920_v15  ;;  %v2882_v41 = vadd.f32 %v2881_v59, %v2851_v25  ;;  %v2549_v52 = vadd.f32 %v4445_v3, %v5996_v38  ;;  %v6235_v44 = vld [vmem:[#allocation6_spill] sm:$0xff]  ;;  %v6244_v18 = vld [vmem:[#allocation11_spill] sm:$0xff] }
 0x1ff   : > { %v4525_v0 = vpop.f32.mrf.mxu0  ;;  %v2453_v43 = vpop.f32.mrf.mxu1  ;;  %v2923_v11 = vmul.f32 %v2853_v30, %v2853_v30  ;;  %v2248_v36 = vadd.f32 %v6233_v62, %v1941_v51 }
 0x200   : > { %v2922_v63 = vmul.f32 %v2852_v29, %v2852_v29  ;;  %v2548_v5 = vadd.f32 %v2453_v43, %v2242_v39  ;;  %v2883_v55 = vadd.f32 %v2882_v41, %v2852_v29  ;;  %v2952_v61 = vadd.f32 %v2951_v6, %v2921_v20 }
 0x201   : > { %v2759_v31 = vpop.f32.mrf.mxu0  ;;  %v4448_v26 = vpop.f32.mrf.mxu1  ;;  %v2855_v9 = vadd.f32 %v4525_v0, %v2549_v52  ;;  %v2250_v52 = vadd.f32 %v6026_v13, %v1943_v32  ;;  %v6236_v0 = vld [vmem:[#allocation3_spill] sm:$0xff] }
 0x202   : > { %v2854_v57 = vadd.f32 %v2759_v31, %v2548_v5  ;;  %v2953_v42 = vadd.f32 %v2952_v61, %v2922_v63  ;;  %v2884_v12 = vadd.f32 %v2883_v55, %v2853_v30  ;;  %v2551_v38 = vadd.f32 %v4448_v26, %v6003_v8  ;;  %v6237_v31 = vld [vmem:[#allocation8_spill] sm:$0xff] }
 0x203   : > { %v4528_v34 = vpop.f32.mrf.mxu0  ;;  %v2463_v28 = vpop.f32.mrf.mxu1  ;;  %v2925_v27 = vmul.f32 %v2855_v9, %v2855_v9  ;;  %v1945_v22 = vadd.f32 %v6029_v37, %v6236_v0 }
 0x204   : > { %v2924_v7 = vmul.f32 %v2854_v57, %v2854_v57  ;;  %v2550_v40 = vadd.f32 %v2463_v28, %v2244_v19  ;;  %v2885_v53 = vadd.f32 %v2884_v12, %v2854_v57  ;;  %v2954_v4 = vadd.f32 %v2953_v42, %v2923_v11  ;;  %v6239_v28 = vld [vmem:[#allocation4_spill] sm:$0xff] }
 0x205   : > { %v2769_v33 = vpop.f32.mrf.mxu0  ;;  %v4451_v35 = vpop.f32.mrf.mxu1  ;;  %v2857_v2 = vadd.f32 %v4528_v34, %v2551_v38  ;;  %v6238_v34 = vld [vmem:[#allocation10_spill] sm:$0xff]  ;;  %v1947_v37 = vadd.f32 %v6036_v45, %v6239_v28 }
 0x206   : > { %v2856_v24 = vadd.f32 %v2769_v33, %v2550_v40  ;;  %v2553_v54 = vadd.f32 %v4451_v35, %v6010_v21  ;;  %v2955_v50 = vadd.f32 %v2954_v4, %v2924_v7  ;;  %v2886_v8 = vadd.f32 %v2885_v53, %v2855_v9  ;;  %v6240_v40 = vld [vmem:[#allocation9_spill] sm:$0xff] }
 0x207   : > { %v4531_v48 = vpop.f32.mrf.mxu0  ;;  %v2473_v17 = vpop.f32.mrf.mxu1  ;;  %v2927_v21 = vmul.f32 %v2857_v2, %v2857_v2  ;;  %v2252_v13 = vadd.f32 %v6238_v34, %v1945_v22 }
 0x208   : > { %v2926_v14 = vmul.f32 %v2856_v24, %v2856_v24  ;;  %v2552_v56 = vadd.f32 %v2473_v17, %v2246_v58  ;;  %v2887_v1 = vadd.f32 %v2886_v8, %v2856_v24  ;;  %v2956_v49 = vadd.f32 %v2955_v50, %v2925_v27  ;;  %v6241_v17 = vld [vmem:[#allocation12_spill] sm:$0xff] }
 0x209   : > { %v2779_v25 = vpop.f32.mrf.mxu0  ;;  %v4454_v23 = vpop.f32.mrf.mxu1  ;;  %v2859_v60 = vadd.f32 %v4531_v48, %v2553_v54 }
 0x20a   : > { %v2858_v15 = vadd.f32 %v2779_v25, %v2552_v56  ;;  %v2957_v16 = vadd.f32 %v2956_v49, %v2926_v14  ;;  %v2888_v59 = vadd.f32 %v2887_v1, %v2857_v2  ;;  %v2555_v10 = vadd.f32 %v4454_v23, %v6235_v44  ;;  %v6242_v56 = vld [vmem:[#allocation5_spill] sm:$0xff] }
 0x20b   : > { %v4534_v3 = vpop.f32.mrf.mxu0  ;;  %v2483_v39 = vpop.f32.mrf.mxu1  ;;  %v2929_v43 = vmul.f32 %v2859_v60, %v2859_v60  ;;  %v2254_v14 = vadd.f32 %v6241_v17, %v1947_v37  ;;  %v6243_v1 = vld [vmem:[#allocation13_spill] sm:$0xff] }
 0x20c   : > { %v2928_v47 = vmul.f32 %v2858_v15, %v2858_v15  ;;  %v2554_v30 = vadd.f32 %v2483_v39, %v2248_v36  ;;  %v2889_v29 = vadd.f32 %v2888_v59, %v2858_v15  ;;  %v2958_v20 = vadd.f32 %v2957_v16, %v2927_v21  ;;  %v6245_v39 = vld [vmem:[#allocation15_spill] sm:$0xff] }
 0x20d   : > { %v2789_v6 = vpop.f32.mrf.mxu0  ;;  %v4457_v41 = vpop.f32.mrf.mxu1  ;;  %v2861_v55 = vadd.f32 %v4534_v3, %v2555_v10  ;;  %v1949_v45 = vadd.f32 %v6243_v1, %v6242_v56 }
 0x20e   : > { %v2860_v63 = vadd.f32 %v2789_v6, %v2554_v30  ;;  %v2959_v5 = vadd.f32 %v2958_v20, %v2928_v47  ;;  %v2890_v61 = vadd.f32 %v2889_v29, %v2859_v60  ;;  %v2557_v26 = vadd.f32 %v4457_v41, %v6237_v31 }
 0x20f   : > { %v4537_v19 = vpop.f32.mrf.mxu0  ;;  %v2493_v46 = vpop.f32.mrf.mxu1  ;;  %v2931_v4 = vmul.f32 %v2861_v55, %v2861_v55  ;;  %v2256_v47 = vadd.f32 %v6245_v39, %v1949_v45 }
 0x210   : > { %v2930_v11 = vmul.f32 %v2860_v63, %v2860_v63  ;;  %v2556_v57 = vadd.f32 %v2493_v46, %v2250_v52  ;;  %v2891_v42 = vadd.f32 %v2890_v61, %v2860_v63  ;;  %v2960_v9 = vadd.f32 %v2959_v5, %v2929_v43  ;;  %v6246_v52 = vld [vmem:[#allocation14_spill] sm:$0xff] }
 0x211   : > { %v2799_v12 = vpop.f32.mrf.mxu0  ;;  %v4460_v38 = vpop.f32.mrf.mxu1  ;;  %v2863_v35 = vadd.f32 %v4537_v19, %v2557_v26 }
 0x212   : > { %v2862_v7 = vadd.f32 %v2799_v12, %v2556_v57  ;;  %v2559_v53 = vadd.f32 %v4460_v38, %v6240_v40  ;;  %v2961_v33 = vadd.f32 %v2960_v9, %v2930_v11  ;;  %v2892_v58 = vadd.f32 %v2891_v42, %v2861_v55 }
 0x213   : > { %v4540_v51 = vpop.f32.mrf.mxu0  ;;  %v2503_v24 = vpop.f32.mrf.mxu1  ;;  %v2933_v23 = vmul.f32 %v2863_v35, %v2863_v35 }
 0x214   : > { %v2932_v54 = vmul.f32 %v2862_v7, %v2862_v7  ;;  %v2558_v27 = vadd.f32 %v2503_v24, %v2252_v13  ;;  %v2893_v50 = vadd.f32 %v2892_v58, %v2862_v7  ;;  %v2962_v2 = vadd.f32 %v2961_v33, %v2931_v4 }
 0x215   : > { %v2809_v8 = vpop.f32.mrf.mxu0  ;;  %v4463_v48 = vpop.f32.mrf.mxu1  ;;  %v2865_v49 = vadd.f32 %v4540_v51, %v2559_v53 }
 0x216   : > { %v2864_v25 = vadd.f32 %v2809_v8, %v2558_v27  ;;  %v2963_v62 = vadd.f32 %v2962_v2, %v2932_v54  ;;  %v2894_v36 = vadd.f32 %v2893_v50, %v2863_v35  ;;  %v2561_v32 = vadd.f32 %v4463_v48, %v6244_v18 }
 0x217   : > { %v4543_v60 = vpop.f32.mrf.mxu0  ;;  %v2513_v15 = vpop.f32.mrf.mxu1  ;;  %v2935_v30 = vmul.f32 %v2865_v49, %v2865_v49 }
 0x218   : > { %v2934_v21 = vmul.f32 %v2864_v25, %v2864_v25  ;;  %v2560_v16 = vadd.f32 %v2513_v15, %v2254_v14  ;;  %v2895_v59 = vadd.f32 %v2894_v36, %v2864_v25  ;;  %v2964_v44 = vadd.f32 %v2963_v62, %v2933_v23 }
 0x219   : > { %v2819_v10 = vpop.f32.mrf.mxu0  ;;  %v4466_v3 = vpop.f32.mrf.mxu1  ;;  %v2867_v6 = vadd.f32 %v4543_v60, %v2561_v32 }
 0x21a   : > { %v2866_v29 = vadd.f32 %v2819_v10, %v2560_v16  ;;  %v2965_v20 = vadd.f32 %v2964_v44, %v2934_v21  ;;  %v2896_v41 = vadd.f32 %v2895_v59, %v2865_v49  ;;  %v2563_v0 = vadd.f32 %v4466_v3, %v6246_v52 }
 0x21b   : > { %v4546_v22 = vpop.f32.mrf.mxu0  ;;  %v2523_v43 = vpop.f32.mrf.mxu1  ;;  %v2937_v19 = vmul.f32 %v2867_v6, %v2867_v6 }
 0x21c   : > { %v2936_v63 = vmul.f32 %v2866_v29, %v2866_v29  ;;  %v2562_v5 = vadd.f32 %v2523_v43, %v2256_v47  ;;  %v2897_v55 = vadd.f32 %v2896_v41, %v2866_v29  ;;  %v2966_v61 = vadd.f32 %v2965_v20, %v2935_v30 }
 0x21d   : > { %v2829_v31 = vpop.f32.mrf.mxu0  ;;  %v2869_v11 = vadd.f32 %v4546_v22, %v2563_v0 }
 0x21e   : > { %v2868_v26 = vadd.f32 %v2829_v31, %v2562_v5  ;;  %v2967_v46 = vadd.f32 %v2966_v61, %v2936_v63  ;;  %v2898_v57 = vadd.f32 %v2897_v55, %v2867_v6 }
 0x21f   : > { %v2939_v38 = vmul.f32 %v2869_v11, %v2869_v11 }
 0x220   : > { %v2938_v42 = vmul.f32 %v2868_v26, %v2868_v26  ;;  %v2899_v9 = vadd.f32 %v2898_v57, %v2868_v26  ;;  %v2968_v12 = vadd.f32 %v2967_v46, %v2937_v19 }
 0x222   : > { %v2900_v34 = vadd.f32 %v2899_v9, %v2869_v11  ;;  %v2969_v13 = vadd.f32 %v2968_v12, %v2938_v42 }
 0x224   : > { %v2901_v28 = vrot.slane %v2900_v34, 4  ;;  %v2970_v37 = vadd.f32 %v2969_v13, %v2939_v38 }
 0x226   : > { %v2902_v7 = vadd.f32 %v2901_v28, %v2900_v34  ;;  %v2971_v40 = vrot.slane %v2970_v37, 4 }
 0x228   : > { %v2903_v53 = vrot.slane %v2902_v7, 2  ;;  %v2972_v4 = vadd.f32 %v2971_v40, %v2970_v37 }
 0x22a   : > { %v2904_v33 = vadd.f32 %v2903_v53, %v2902_v7  ;;  %v2973_v35 = vrot.slane %v2972_v4, 2 }
 0x22c   : > { %v2905_v58 = vrot.slane %v2904_v33, 1  ;;  %v2974_v51 = vadd.f32 %v2973_v35, %v2972_v4 }
 0x22e   : > { %v2906_v24 = vadd.f32 %v2905_v58, %v2904_v33  ;;  %v2975_v54 = vrot.slane %v2974_v51, 1 }
 0x230   : > { %2907 = vst [vmem:[%s178_s30] sm:$0x1] %v2906_v24  ;;  %v2976_v27 = vadd.f32 %v2975_v54, %v2974_v51 }
 0x232   : > { %2977 = vst [vmem:[%s178_s30 + $0x1] sm:$0x1] %v2976_v27 }
 0x233 PF: > { %s12_s11 = sadd.s32 1, %s4626_s11   ;;  %s6247_s9 = smov %s4622_s10 }
 0x234   : > { %p9_p5 = scmp.ge.s32.totalorder %s12_s11, 4   ;;  %s6248_s10 = smov %s6250_s12 }
 0x236   :  { %11 = sbr.rel (!%p9_p5) target bundleno = 2 (0x2), region = 71 }

// kernel: cnn_block_forward.3
= control target key start
LH: loop header
LB: loop body
LE: loop exit
PB: predicated region body
PF: predicated region fallthrough
CT: control target
= control target key end

     0   :  { %s4871_s15 = smov 0   ;;  %s4873_s16 = smov 0   ;;  %s6528_s0 = inlined_call_operand.vmem [shape: f32[2,18,18,128], index: 0, kind: input, shape index: {}]   ;;  %s6529_s1 = inlined_call_operand.vmem [shape: f32[3,3,128,128], index: 1, kind: input, shape index: {}]   ;;  %s6530_s2 = inlined_call_operand.vmem [shape: f32[1,128], index: 2, kind: input, shape index: {}]   ;;  %s6531_s3 = inlined_call_operand.vmem [shape: f32[1,128], index: 3, kind: input, shape index: {}]   ;;  %s6532_s4 = inlined_call_operand.vmem [shape: f32[2,16,16,128], index: 4, kind: output, shape index: {}]  }
   0x1   :  { %s4875_s17 = smov 0  }
   0x2 LB: > { %s26_s18 = sadd.s32 1, %s4840_s16  ;;  %p3284_p0 = scmp.ge.s32.totalorder %s4844_s17, 1  ;;  %s4844_s17 = sphi %s4875_s17, %s14_s17   ;;  %s4840_s16 = sphi %s4873_s16, %s6700_s16   ;;  %s4836_s15 = sphi %s4871_s15, %s6699_s15  }
   0x3   : > { %p28_p1 = scmp.ge.s32.totalorder %s26_s18, 2  ;;  %p201_p2 = scmp.lt.s32.totalorder %s4844_s17, 3 }
   0x5   : > { %s6702_s18 = smov (%p28_p1, %s26_s18), 0  ;;  %p202_p3 = pnand %p3284_p0, %p201_p2 }
   0x7   : > { %205 = sbr.rel (%p202_p3) target bundleno = 552 (0x228), region = 36 }
   0xc   : > { %v3303_v0 = vld [vmem:[%s6529_s1 + $0xf8] sm:$0xff]  ;;  %v3302_v1 = vld [vmem:[%s6529_s1 + $0xf0] sm:$0xff]  ;;  %v3301_v2 = vld [vmem:[%s6529_s1 + $0xe8] sm:$0xff]  ;;  %p240_p4 = scmp.lt.s32.totalorder %s4836_s15, 1 }
   0xd   : > { %4765 = vmatprep.subr.mxu1 %v3303_v0  ;;  %4045 = vmatprep.subr.mxu0 %v3303_v0  ;;  %v3300_v3 = vld [vmem:[%s6529_s1 + $0xe0] sm:$0xff]  ;;  %v3299_v4 = vld [vmem:[%s6529_s1 + $0xd8] sm:$0xff]  ;;  %v3298_v5 = vld [vmem:[%s6529_s1 + $0xd0] sm:$0xff] }
   0xe   : > { %4781 = vmatpush3.msra.mxu1 %v3303_v0  ;;  %4046 = vmatpush3.msra.mxu0 %v3303_v0  ;;  %v3297_v6 = vld [vmem:[%s6529_s1 + $0xc8] sm:$0xff]  ;;  %v3296_v7 = vld [vmem:[%s6529_s1 + $0xc0] sm:$0xff]  ;;  %v3295_v8 = vld [vmem:[%s6529_s1 + $0xb8] sm:$0xff]  ;;  %s6704_s15 = smov (!%p240_p4, %s4836_s15), 1 }
   0xf   : > { %4766 = vmatprep.subr.mxu1 %v3302_v1  ;;  %4047 = vmatprep.subr.mxu0 %v3302_v1  ;;  %v3294_v9 = vld [vmem:[%s6529_s1 + $0xb0] sm:$0xff]  ;;  %v3293_v10 = vld [vmem:[%s6529_s1 + $0xa8] sm:$0xff]  ;;  %v3292_v11 = vld [vmem:[%s6529_s1 + $0xa0] sm:$0xff]  ;;  %s4797_s23 = smul.u32 432, %s6704_s15  ;;  %s3612_s14 = sshll.u32 %s6704_s15, 8 }
  0x10   : > { %4782 = vmatpush3.msra.mxu1 %v3302_v1  ;;  %4048 = vmatpush3.msra.mxu0 %v3302_v1  ;;  %v3291_v12 = vld [vmem:[%s6529_s1 + $0x98] sm:$0xff]  ;;  %v3290_v13 = vld [vmem:[%s6529_s1 + $0x90] sm:$0xff]  ;;  %v3289_v14 = vld [vmem:[%s6529_s1 + $0x88] sm:$0xff]  ;;  %s6345_s20 = scalar_lea.vmem %s6532_s4, %s3612_s14 }
  0x11   : > { %4767 = vmatprep.subr.mxu1 %v3301_v2  ;;  %4049 = vmatprep.subr.mxu0 %v3301_v2  ;;  %s4944_s30 = scalar_lea.vmem %s6528_s0, %s4797_s23  ;;  %v3288_v15 = vld [vmem:[%s6529_s1 + $0x80] sm:$0xff]  ;;  %v310_v19 = vld [vmem:[%s6529_s1 + $0x78] sm:$0xff]  ;;  %v309_v22 = vld [vmem:[%s6529_s1 + $0x70] sm:$0xff] }
  0x12   : > { %4783 = vmatpush3.msra.mxu1 %v3301_v2  ;;  %4050 = vmatpush3.msra.mxu0 %v3301_v2  ;;  %v4950_v16 = vld [vmem:[%s4944_s30 + $0xc1] sm:$0xff]  ;;  %v4954_v18 = vld [vmem:[%s4944_s30 + $0xc9] sm:$0xff]  ;;  %v3319_v21 = vld [vmem:[%s6529_s1 + $0x178] sm:$0xff] }
  0x13   : > { %4768 = vmatprep.subr.mxu1 %v3300_v3  ;;  %4051 = vmatprep.subr.mxu0 %v3300_v3  ;;  %v311_v17 = vld [vmem:[%s4944_s30 + $0x1] sm:$0xff]  ;;  %v312_v20 = vld [vmem:[%s4944_s30 + $0x9] sm:$0xff]  ;;  %v4969_v23 = vld [vmem:[%s4944_s30 + $0xd9] sm:$0xff] }
  0x14   : > { %4784 = vmatpush3.msra.mxu1 %v3300_v3  ;;  %4052 = vmatpush3.msra.mxu0 %v3300_v3  ;;  %v3318_v24 = vld [vmem:[%s6529_s1 + $0x170] sm:$0xff]  ;;  %v4975_v25 = vld [vmem:[%s4944_s30 + $0x19] sm:$0xff]  ;;  %v4978_v26 = vld [vmem:[%s4944_s30 + $0xe1] sm:$0xff] }
  0x15   : > { %4769 = vmatprep.subr.mxu1 %v3299_v4  ;;  %4053 = vmatprep.subr.mxu0 %v3299_v4  ;;  %v308_v27 = vld [vmem:[%s6529_s1 + $0x68] sm:$0xff]  ;;  %v307_v30 = vld [vmem:[%s6529_s1 + $0x60] sm:$0xff]  ;;  %v4996_v31 = vld [vmem:[%s4944_s30 + $0xf1] sm:$0xff] }
  0x16   : > { %4785 = vmatpush3.msra.mxu1 %v3299_v4  ;;  %4054 = vmatpush3.msra.mxu0 %v3299_v4  ;;  %v4985_v28 = vld [vmem:[%s4944_s30 + $0x21] sm:$0xff]  ;;  %v5003_v33 = vld [vmem:[%s4944_s30 + $0x31] sm:$0xff]  ;;  %v5006_v34 = vld [vmem:[%s4944_s30 + $0xf9] sm:$0xff] }
  0x17   : > { %4770 = vmatprep.subr.mxu1 %v3298_v5  ;;  %4055 = vmatprep.subr.mxu0 %v3298_v5  ;;  %v3317_v29 = vld [vmem:[%s6529_s1 + $0x168] sm:$0xff]  ;;  %v3316_v32 = vld [vmem:[%s6529_s1 + $0x160] sm:$0xff]  ;;  %v306_v35 = vld [vmem:[%s6529_s1 + $0x58] sm:$0xff] }
  0x18   : > { %4786 = vmatpush3.msra.mxu1 %v3298_v5  ;;  %4056 = vmatpush3.msra.mxu0 %v3298_v5  ;;  %v5013_v36 = vld [vmem:[%s4944_s30 + $0x39] sm:$0xff]  ;;  %v305_v38 = vld [vmem:[%s6529_s1 + $0x50] sm:$0xff]  ;;  %v304_v43 = vld [vmem:[%s6529_s1 + $0x48] sm:$0xff] }
  0x19   : > { %4771 = vmatprep.subr.mxu1 %v3297_v6  ;;  %4057 = vmatprep.subr.mxu0 %v3297_v6  ;;  %v3315_v37 = vld [vmem:[%s6529_s1 + $0x158] sm:$0xff]  ;;  %v5024_v39 = vld [vmem:[%s4944_s30 + $0x109] sm:$0xff]  ;;  %v303_v46 = vld [vmem:[%s6529_s1 + $0x40] sm:$0xff] }
  0x1a   : > { %4787 = vmatpush3.msra.mxu1 %v3297_v6  ;;  %4058 = vmatpush3.msra.mxu0 %v3297_v6  ;;  %v3314_v40 = vld [vmem:[%s6529_s1 + $0x150] sm:$0xff]  ;;  %v3313_v45 = vld [vmem:[%s6529_s1 + $0x148] sm:$0xff]  ;;  %v3312_v48 = vld [vmem:[%s6529_s1 + $0x140] sm:$0xff] }
  0x1b   : > { %4772 = vmatprep.subr.mxu1 %v3296_v7  ;;  %4059 = vmatprep.subr.mxu0 %v3296_v7  ;;  %v5031_v41 = vld [vmem:[%s4944_s30 + $0x49] sm:$0xff]  ;;  %v5034_v42 = vld [vmem:[%s4944_s30 + $0x111] sm:$0xff]  ;;  %v5052_v47 = vld [vmem:[%s4944_s30 + $0x121] sm:$0xff] }
  0x1c   : > { %4788 = vmatpush3.msra.mxu1 %v3296_v7  ;;  %4060 = vmatpush3.msra.mxu0 %v3296_v7  ;;  %v5041_v44 = vld [vmem:[%s4944_s30 + $0x51] sm:$0xff]  ;;  %v5059_v49 = vld [vmem:[%s4944_s30 + $0x61] sm:$0xff]  ;;  %v5062_v50 = vld [vmem:[%s4944_s30 + $0x129] sm:$0xff] }
  0x1d   : > { %4773 = vmatprep.subr.mxu1 %v3295_v8  ;;  %4061 = vmatprep.subr.mxu0 %v3295_v8  ;;  %v302_v51 = vld [vmem:[%s6529_s1 + $0x38] sm:$0xff]  ;;  %v5069_v52 = vld [vmem:[%s4944_s30 + $0x69] sm:$0xff]  ;;  %v5090_v58 = vld [vmem:[%s4944_s30 + $0x141] sm:$0xff] }
  0x1e   : > { %4789 = vmatpush3.msra.mxu1 %v3295_v8  ;;  %4062 = vmatpush3.msra.mxu0 %v3295_v8  ;;  %v3311_v53 = vld [vmem:[%s6529_s1 + $0x138] sm:$0xff]  ;;  %v301_v54 = vld [vmem:[%s6529_s1 + $0x30] sm:$0xff]  ;;  %v300_v59 = vld [vmem:[%s6529_s1 + $0x28] sm:$0xff] }
  0x1f   : > { %4774 = vmatprep.subr.mxu1 %v3294_v9  ;;  %4063 = vmatprep.subr.mxu0 %v3294_v9  ;;  %v5080_v55 = vld [vmem:[%s4944_s30 + $0x139] sm:$0xff]  ;;  %v3310_v56 = vld [vmem:[%s6529_s1 + $0x130] sm:$0xff]  ;;  %v5097_v60 = vld [vmem:[%s4944_s30 + $0x81] sm:$0xff] }
  0x20   : > { %4790 = vmatpush3.msra.mxu1 %v3294_v9  ;;  %4064 = vmatpush3.msra.mxu0 %v3294_v9  ;;  %v5087_v57 = vld [vmem:[%s4944_s30 + $0x79] sm:$0xff]  ;;  %v3309_v61 = vld [vmem:[%s6529_s1 + $0x128] sm:$0xff]  ;;  %v5108_v63 = vld [vmem:[%s4944_s30 + $0x151] sm:$0xff] }
  0x21   : > { %4775 = vmatprep.subr.mxu1 %v3293_v10  ;;  %4065 = vmatprep.subr.mxu0 %v3293_v10  ;;  %v299_v62 = vld [vmem:[%s6529_s1 + $0x20] sm:$0xff]  ;;  %v5115_v1 = vld [vmem:[%s4944_s30 + $0x91] sm:$0xff]  ;;  %v5136_v7 = vld [vmem:[%s4944_s30 + $0x169] sm:$0xff] }
  0x22   : > { %4791 = vmatpush3.msra.mxu1 %v3293_v10  ;;  %4066 = vmatpush3.msra.mxu0 %v3293_v10  ;;  %v3308_v0 = vld [vmem:[%s6529_s1 + $0x120] sm:$0xff]  ;;  %v298_v3 = vld [vmem:[%s6529_s1 + $0x18] sm:$0xff]  ;;  %v297_v6 = vld [vmem:[%s6529_s1 + $0x10] sm:$0xff]  ;;  %6564 = vst [vmem:[#allocation3_spill] sm:$0xff] %v5136_v7 }
  0x23   : > { %4776 = vmatprep.subr.mxu1 %v3292_v11  ;;  %4067 = vmatprep.subr.mxu0 %v3292_v11  ;;  %v5118_v2 = vld [vmem:[%s4944_s30 + $0x159] sm:$0xff]  ;;  %v3306_v8 = vld [vmem:[%s6529_s1 + $0x110] sm:$0xff] }
  0x24   : > { %4792 = vmatpush3.msra.mxu1 %v3292_v11  ;;  %4068 = vmatpush3.msra.mxu0 %v3292_v11  ;;  %6563 = vst [vmem:[#allocation2_spill] sm:$0xff] %v5118_v2  ;;  %v5125_v4 = vld [vmem:[%s4944_s30 + $0x99] sm:$0xff]  ;;  %v5143_v9 = vld [vmem:[%s4944_s30 + $0xa9] sm:$0xff]  ;;  %v5146_v10 = vld [vmem:[%s4944_s30 + $0x171] sm:$0xff] }
  0x25   : > { %4777 = vmatprep.subr.mxu1 %v3291_v12  ;;  %4069 = vmatprep.subr.mxu0 %v3291_v12  ;;  %v3307_v5 = vld [vmem:[%s6529_s1 + $0x118] sm:$0xff]  ;;  %6565 = vst [vmem:[#allocation4_spill] sm:$0xff] %v5146_v10  ;;  %v296_v11 = vld [vmem:[%s6529_s1 + $0x8] sm:$0xff] }
  0x26   : > { %4793 = vmatpush3.msra.mxu1 %v3291_v12  ;;  %4070 = vmatpush3.msra.mxu0 %v3291_v12  ;;  %v5153_v12 = vld [vmem:[%s4944_s30 + $0xb1] sm:$0xff] }
  0x27   : > { %4778 = vmatprep.subr.mxu1 %v3290_v13  ;;  %4071 = vmatprep.subr.mxu0 %v3290_v13 }
  0x28   : > { %4794 = vmatpush3.msra.mxu1 %v3290_v13  ;;  %4072 = vmatpush3.msra.mxu0 %v3290_v13  ;;  %v3305_v13 = vld [vmem:[%s6529_s1 + $0x108] sm:$0xff] }
  0x29   : > { %4779 = vmatprep.subr.mxu1 %v3289_v14  ;;  %4073 = vmatprep.subr.mxu0 %v3289_v14 }
  0x2a   : > { %4795 = vmatpush3.msra.mxu1 %v3289_v14  ;;  %4074 = vmatpush3.msra.mxu0 %v3289_v14  ;;  %v295_v14 = vld [vmem:[%s6529_s1] sm:$0xff] }
  0x2b   : > { %4780 = vmatprep.subr.mxu1 %v3288_v15  ;;  %4075 = vmatprep.subr.mxu0 %v3288_v15 }
  0x2c   : > { %4796 = vmatpush3.msra.mxu1 %v3288_v15  ;;  %4101 = vmatprep.mubr.f32.mxu1 %v4950_v16 }
  0x2d   : > { %4076 = vmatpush3.msra.mxu0 %v3288_v15  ;;  %4077 = vmatprep.mubr.f32.mxu0 %v311_v17  ;;  %v263_v15 = vld [vmem:[%s4944_s30] sm:$0xff] }
  0x2e   : > { %4102 = vmatmul.mubr.f32.vlgmr.msra.gmra.mxu1 %v4954_v18  ;;  %4125 = vmatprep.subr.mxu1 %v310_v19  ;;  %v3304_v17 = vld [vmem:[%s6529_s1 + $0x100] sm:$0xff] }
  0x2f   : > { %4078 = vmatmul.mubr.f32.vlgmr.msra.gmra.mxu0 %v312_v20  ;;  %4126 = vmatpush3.msra.mxu1 %v310_v19  ;;  %v264_v19 = vld [vmem:[%s4944_s30 + $0x8] sm:$0xff] }
  0x30   : > { %4205 = vmatprep.subr.mxu0 %v3319_v21  ;;  %4127 = vmatprep.subr.mxu1 %v309_v22  ;;  %v810_v20 = vld [vmem:[%s4944_s30 + $0x2] sm:$0xff] }
  0x31   : > { %4206 = vmatpush3.msra.mxu0 %v3319_v21  ;;  %4104 = vmatprep.mubr.f32.mxu1 %v4969_v23  ;;  %v3367_v21 = vld [vmem:[%s6529_s1 + $0x1f8] sm:$0xff] }
  0x32   : > { %4128 = vmatpush3.msra.mxu1 %v309_v22  ;;  %4207 = vmatprep.subr.mxu0 %v3318_v24  ;;  %v811_v22 = vld [vmem:[%s4944_s30 + $0xa] sm:$0xff] }
  0x33   : > { %4080 = vmatprep.mubr.f32.mxu0 %v4975_v25  ;;  %4105 = vmatmul.mubr.f32.gmra.mxu1 %v4978_v26 }
  0x34   : > { %4129 = vmatprep.subr.mxu1 %v308_v27  ;;  %4208 = vmatpush3.msra.mxu0 %v3318_v24  ;;  %v3415_v24 = vld [vmem:[%s6529_s1 + $0x278] sm:$0xff] }
  0x35   : > { %4081 = vmatmul.mubr.f32.gmra.mxu0 %v4985_v28  ;;  %4130 = vmatpush3.msra.mxu1 %v308_v27  ;;  %v5178_v27 = vld [vmem:[%s4944_s30 + $0x18] sm:$0xff] }
  0x36   : > { %4209 = vmatprep.subr.mxu0 %v3317_v29  ;;  %4131 = vmatprep.subr.mxu1 %v307_v30 }
  0x37   : > { %4210 = vmatpush3.msra.mxu0 %v3317_v29  ;;  %4107 = vmatprep.mubr.f32.mxu1 %v4996_v31  ;;  %v5181_v29 = vld [vmem:[%s4944_s30 + $0x20] sm:$0xff] }
  0x38   : > { %4132 = vmatpush3.msra.mxu1 %v307_v30  ;;  %4211 = vmatprep.subr.mxu0 %v3316_v32  ;;  %v5184_v30 = vld [vmem:[%s4944_s30 + $0x1a] sm:$0xff] }
  0x39   : > { %4083 = vmatprep.mubr.f32.mxu0 %v5003_v33  ;;  %4108 = vmatmul.mubr.f32.gmra.mxu1 %v5006_v34  ;;  %6566 = vst [vmem:[#allocation5_spill] sm:$0xff] %v5184_v30 }
  0x3a   : > { %4133 = vmatprep.subr.mxu1 %v306_v35  ;;  %4212 = vmatpush3.msra.mxu0 %v3316_v32  ;;  %v3366_v32 = vld [vmem:[%s6529_s1 + $0x1f0] sm:$0xff] }
  0x3b   : > { %4084 = vmatmul.mubr.f32.gmra.mxu0 %v5013_v36  ;;  %4134 = vmatpush3.msra.mxu1 %v306_v35  ;;  %v5191_v35 = vld [vmem:[%s4944_s30 + $0x22] sm:$0xff] }
  0x3c   : > { %4213 = vmatprep.subr.mxu0 %v3315_v37  ;;  %4135 = vmatprep.subr.mxu1 %v305_v38  ;;  %6567 = vst [vmem:[#allocation6_spill] sm:$0xff] %v5191_v35 }
  0x3d   : > { %4214 = vmatpush3.msra.mxu0 %v3315_v37  ;;  %4110 = vmatprep.mubr.f32.mxu1 %v5024_v39  ;;  %v3414_v37 = vld [vmem:[%s6529_s1 + $0x270] sm:$0xff] }
  0x3e   : > { %4136 = vmatpush3.msra.mxu1 %v305_v38  ;;  %4215 = vmatprep.subr.mxu0 %v3314_v40  ;;  %v5198_v38 = vld [vmem:[%s4944_s30 + $0x30] sm:$0xff] }
  0x3f   : > { %4086 = vmatprep.mubr.f32.mxu0 %v5031_v41  ;;  %4111 = vmatmul.mubr.f32.gmra.mxu1 %v5034_v42 }
  0x40   : > { %4137 = vmatprep.subr.mxu1 %v304_v43  ;;  %4216 = vmatpush3.msra.mxu0 %v3314_v40  ;;  %v5202_v40 = vld [vmem:[%s4944_s30 + $0x38] sm:$0xff] }
  0x41   : > { %4087 = vmatmul.mubr.f32.gmra.mxu0 %v5041_v44  ;;  %4138 = vmatpush3.msra.mxu1 %v304_v43  ;;  %v5206_v43 = vld [vmem:[%s4944_s30 + $0x32] sm:$0xff] }
  0x42   : > { %4217 = vmatprep.subr.mxu0 %v3313_v45  ;;  %4139 = vmatprep.subr.mxu1 %v303_v46  ;;  %6568 = vst [vmem:[#allocation7_spill] sm:$0xff] %v5206_v43 }
  0x43   : > { %4218 = vmatpush3.msra.mxu0 %v3313_v45  ;;  %4113 = vmatprep.mubr.f32.mxu1 %v5052_v47  ;;  %v3365_v45 = vld [vmem:[%s6529_s1 + $0x1e8] sm:$0xff] }
  0x44   : > { %4140 = vmatpush3.msra.mxu1 %v303_v46  ;;  %4219 = vmatprep.subr.mxu0 %v3312_v48  ;;  %v5213_v46 = vld [vmem:[%s4944_s30 + $0x3a] sm:$0xff] }
  0x45   : > { %4089 = vmatprep.mubr.f32.mxu0 %v5059_v49  ;;  %4114 = vmatmul.mubr.f32.gmra.mxu1 %v5062_v50  ;;  %6569 = vst [vmem:[#allocation8_spill] sm:$0xff] %v5213_v46 }
  0x46   : > { %4141 = vmatprep.subr.mxu1 %v302_v51  ;;  %4220 = vmatpush3.msra.mxu0 %v3312_v48  ;;  %v3413_v48 = vld [vmem:[%s6529_s1 + $0x268] sm:$0xff] }
  0x47   : > { %4090 = vmatmul.mubr.f32.gmra.mxu0 %v5069_v52  ;;  %4142 = vmatpush3.msra.mxu1 %v302_v51  ;;  %v5220_v51 = vld [vmem:[%s4944_s30 + $0x48] sm:$0xff] }
  0x48   : > { %4221 = vmatprep.subr.mxu0 %v3311_v53  ;;  %4143 = vmatprep.subr.mxu1 %v301_v54 }
  0x49   : > { %4222 = vmatpush3.msra.mxu0 %v3311_v53  ;;  %4116 = vmatprep.mubr.f32.mxu1 %v5080_v55  ;;  %v5224_v53 = vld [vmem:[%s4944_s30 + $0x50] sm:$0xff] }
  0x4a   : > { %4144 = vmatpush3.msra.mxu1 %v301_v54  ;;  %4223 = vmatprep.subr.mxu0 %v3310_v56  ;;  %v5228_v54 = vld [vmem:[%s4944_s30 + $0x4a] sm:$0xff] }
  0x4b   : > { %4092 = vmatprep.mubr.f32.mxu0 %v5087_v57  ;;  %4117 = vmatmul.mubr.f32.gmra.mxu1 %v5090_v58  ;;  %6570 = vst [vmem:[#allocation9_spill] sm:$0xff] %v5228_v54 }
  0x4c   : > { %4145 = vmatprep.subr.mxu1 %v300_v59  ;;  %4224 = vmatpush3.msra.mxu0 %v3310_v56  ;;  %v3364_v56 = vld [vmem:[%s6529_s1 + $0x1e0] sm:$0xff] }
  0x4d   : > { %4093 = vmatmul.mubr.f32.gmra.mxu0 %v5097_v60  ;;  %4146 = vmatpush3.msra.mxu1 %v300_v59  ;;  %v5235_v59 = vld [vmem:[%s4944_s30 + $0x52] sm:$0xff] }
  0x4e   : > { %4225 = vmatprep.subr.mxu0 %v3309_v61  ;;  %4147 = vmatprep.subr.mxu1 %v299_v62  ;;  %6571 = vst [vmem:[#allocation10_spill] sm:$0xff] %v5235_v59 }
  0x4f   : > { %4226 = vmatpush3.msra.mxu0 %v3309_v61  ;;  %4119 = vmatprep.mubr.f32.mxu1 %v5108_v63  ;;  %v3412_v61 = vld [vmem:[%s6529_s1 + $0x260] sm:$0xff] }
  0x50   : > { %4148 = vmatpush3.msra.mxu1 %v299_v62  ;;  %4227 = vmatprep.subr.mxu0 %v3308_v0  ;;  %v5242_v62 = vld [vmem:[%s4944_s30 + $0x60] sm:$0xff] }
  0x51   : > { %4095 = vmatprep.mubr.f32.mxu0 %v5115_v1  ;;  %4120 = vmatmul.mubr.f32.gmra.mxu1 %v5118_v2  ;;  %v5499_v2 = vld [vmem:[%s4944_s30 + $0x172] sm:$0xff] }
  0x52   : > { %4149 = vmatprep.subr.mxu1 %v298_v3  ;;  %4228 = vmatpush3.msra.mxu0 %v3308_v0  ;;  %v5246_v0 = vld [vmem:[%s4944_s30 + $0x68] sm:$0xff] }
  0x53   : > { %4096 = vmatmul.mubr.f32.gmra.mxu0 %v5125_v4  ;;  %4150 = vmatpush3.msra.mxu1 %v298_v3  ;;  %v5250_v3 = vld [vmem:[%s4944_s30 + $0x62] sm:$0xff] }
  0x54   : > { %4229 = vmatprep.subr.mxu0 %v3307_v5  ;;  %4151 = vmatprep.subr.mxu1 %v297_v6  ;;  %6572 = vst [vmem:[#allocation11_spill] sm:$0xff] %v5250_v3 }
  0x55   : > { %4230 = vmatpush3.msra.mxu0 %v3307_v5  ;;  %4122 = vmatprep.mubr.f32.mxu1 %v5136_v7  ;;  %v3363_v5 = vld [vmem:[%s6529_s1 + $0x1d8] sm:$0xff]  ;;  %v5492_v7 = vld [vmem:[%s4944_s30 + $0x16a] sm:$0xff] }
  0x56   : > { %4152 = vmatpush3.msra.mxu1 %v297_v6  ;;  %4231 = vmatprep.subr.mxu0 %v3306_v8  ;;  %v5257_v6 = vld [vmem:[%s4944_s30 + $0x6a] sm:$0xff] }
  0x57   : > { %4098 = vmatprep.mubr.f32.mxu0 %v5143_v9  ;;  %4123 = vmatmul.mubr.f32.gmra.mxu1 %v5146_v10  ;;  %6573 = vst [vmem:[#allocation12_spill] sm:$0xff] %v5257_v6  ;;  %v5477_v10 = vld [vmem:[%s4944_s30 + $0x15a] sm:$0xff] }
  0x58   : > { %4153 = vmatprep.subr.mxu1 %v296_v11  ;;  %4232 = vmatpush3.msra.mxu0 %v3306_v8  ;;  %v3411_v8 = vld [vmem:[%s6529_s1 + $0x258] sm:$0xff] }
  0x59   : > { %4099 = vmatmul.mubr.f32.gmra.mxu0 %v5153_v12  ;;  %4154 = vmatpush3.msra.mxu1 %v296_v11  ;;  %v5264_v11 = vld [vmem:[%s4944_s30 + $0x78] sm:$0xff] }
  0x5a   : > { %4233 = vmatprep.subr.mxu0 %v3305_v13  ;;  %4155 = vmatprep.subr.mxu1 %v295_v14 }
  0x5b   : > { %4234 = vmatpush3.msra.mxu0 %v3305_v13  ;;  %4156 = vmatpush3.msra.mxu1 %v295_v14  ;;  %v5268_v13 = vld [vmem:[%s4944_s30 + $0x80] sm:$0xff] }
  0x5c   : > { %4157 = vmatprep.mubr.f32.mxu1 %v263_v15  ;;  %4235 = vmatprep.subr.mxu0 %v3304_v17  ;;  %v5272_v14 = vld [vmem:[%s4944_s30 + $0x7a] sm:$0xff]  ;;  %v3362_v15 = vld [vmem:[%s6529_s1 + $0x1d0] sm:$0xff] }
  0x5d   : > { %4158 = vmatmul.mubr.f32.vlgmr.msra.gmra.mxu1 %v264_v19  ;;  %4236 = vmatpush3.msra.mxu0 %v3304_v17  ;;  %6574 = vst [vmem:[#allocation13_spill] sm:$0xff] %v5272_v14  ;;  %v5279_v17 = vld [vmem:[%s4944_s30 + $0x82] sm:$0xff]  ;;  %v3410_v19 = vld [vmem:[%s6529_s1 + $0x250] sm:$0xff] }
  0x5e   : > { %4237 = vmatprep.mubr.f32.mxu0 %v810_v20  ;;  %4285 = vmatprep.subr.mxu1 %v3367_v21  ;;  %6575 = vst [vmem:[#allocation14_spill] sm:$0xff] %v5279_v17  ;;  %v5286_v20 = vld [vmem:[%s4944_s30 + $0x90] sm:$0xff] }
  0x5f   : > { %4238 = vmatmul.mubr.f32.vlgmr.msra.gmra.mxu0 %v811_v22  ;;  %4286 = vmatpush3.msra.mxu1 %v3367_v21  ;;  %v5290_v21 = vld [vmem:[%s4944_s30 + $0x98] sm:$0xff] }
  0x60   : > { %4365 = vmatprep.subr.mxu0 %v3415_v24  ;;  %4160 = vmatprep.mubr.f32.mxu1 %v5178_v27  ;;  %v5294_v22 = vld [vmem:[%s4944_s30 + $0x92] sm:$0xff] }
  0x61   : > { %4366 = vmatpush3.msra.mxu0 %v3415_v24  ;;  %4161 = vmatmul.mubr.f32.gmra.mxu1 %v5181_v29  ;;  %6576 = vst [vmem:[#allocation15_spill] sm:$0xff] %v5294_v22  ;;  %v3361_v24 = vld [vmem:[%s6529_s1 + $0x1c8] sm:$0xff] }
  0x62   : > { %4240 = vmatprep.mubr.f32.mxu0 %v5184_v30  ;;  %4287 = vmatprep.subr.mxu1 %v3366_v32  ;;  %v3353_v30 = vld [vmem:[%s6529_s1 + $0x188] sm:$0xff] }
  0x63   : > { %4241 = vmatmul.mubr.f32.gmra.mxu0 %v5191_v35  ;;  %4288 = vmatpush3.msra.mxu1 %v3366_v32  ;;  %v5301_v32 = vld [vmem:[%s4944_s30 + $0x9a] sm:$0xff]  ;;  %v5455_v35 = vld [vmem:[%s4944_s30 + $0x142] sm:$0xff] }
  0x64   : > { %4367 = vmatprep.subr.mxu0 %v3414_v37  ;;  %4163 = vmatprep.mubr.f32.mxu1 %v5198_v38  ;;  %6577 = vst [vmem:[#allocation16_spill] sm:$0xff] %v5301_v32  ;;  %6591 = vst [vmem:[#allocation30_spill] sm:$0xff] %v5455_v35 }
  0x65   : > { %4368 = vmatpush3.msra.mxu0 %v3414_v37  ;;  %4164 = vmatmul.mubr.f32.gmra.mxu1 %v5202_v40  ;;  %v3409_v37 = vld [vmem:[%s6529_s1 + $0x248] sm:$0xff] }
  0x66   : > { %4243 = vmatprep.mubr.f32.mxu0 %v5206_v43  ;;  %4289 = vmatprep.subr.mxu1 %v3365_v45  ;;  %v3354_v43 = vld [vmem:[%s6529_s1 + $0x190] sm:$0xff] }
  0x67   : > { %4244 = vmatmul.mubr.f32.gmra.mxu0 %v5213_v46  ;;  %4290 = vmatpush3.msra.mxu1 %v3365_v45  ;;  %v5308_v45 = vld [vmem:[%s4944_s30 + $0xa8] sm:$0xff] }
  0x68   : > { %4369 = vmatprep.subr.mxu0 %v3413_v48  ;;  %4166 = vmatprep.mubr.f32.mxu1 %v5220_v51  ;;  %v5433_v46 = vld [vmem:[%s4944_s30 + $0x12a] sm:$0xff] }
  0x69   : > { %4370 = vmatpush3.msra.mxu0 %v3413_v48  ;;  %4167 = vmatmul.mubr.f32.gmra.mxu1 %v5224_v53  ;;  %v5312_v48 = vld [vmem:[%s4944_s30 + $0xb0] sm:$0xff]  ;;  %6589 = vst [vmem:[#allocation28_spill] sm:$0xff] %v5433_v46 }
  0x6a   : > { %4246 = vmatprep.mubr.f32.mxu0 %v5228_v54  ;;  %4291 = vmatprep.subr.mxu1 %v3364_v56  ;;  %v3355_v54 = vld [vmem:[%s6529_s1 + $0x198] sm:$0xff] }
  0x6b   : > { %4247 = vmatmul.mubr.f32.gmra.mxu0 %v5235_v59  ;;  %4292 = vmatpush3.msra.mxu1 %v3364_v56  ;;  %v5316_v56 = vld [vmem:[%s4944_s30 + $0xaa] sm:$0xff]  ;;  %v5411_v59 = vld [vmem:[%s4944_s30 + $0x112] sm:$0xff] }
  0x6c   : > { %4371 = vmatprep.subr.mxu0 %v3412_v61  ;;  %4169 = vmatprep.mubr.f32.mxu1 %v5242_v62  ;;  %6578 = vst [vmem:[#allocation17_spill] sm:$0xff] %v5316_v56  ;;  %6587 = vst [vmem:[#allocation26_spill] sm:$0xff] %v5411_v59 }
  0x6d   : > { %4372 = vmatpush3.msra.mxu0 %v3412_v61  ;;  %4170 = vmatmul.mubr.f32.gmra.mxu1 %v5246_v0  ;;  %v3360_v61 = vld [vmem:[%s6529_s1 + $0x1c0] sm:$0xff] }
  0x6e   : > { %4249 = vmatprep.mubr.f32.mxu0 %v5250_v3  ;;  %4293 = vmatprep.subr.mxu1 %v3363_v5  ;;  %v3356_v3 = vld [vmem:[%s6529_s1 + $0x1a0] sm:$0xff] }
  0x6f   : > { %4250 = vmatmul.mubr.f32.gmra.mxu0 %v5257_v6  ;;  %4294 = vmatpush3.msra.mxu1 %v3363_v5  ;;  %v5323_v5 = vld [vmem:[%s4944_s30 + $0xb2] sm:$0xff]  ;;  %v5389_v6 = vld [vmem:[%s4944_s30 + $0xfa] sm:$0xff] }
  0x70   : > { %4373 = vmatprep.subr.mxu0 %v3411_v8  ;;  %4172 = vmatprep.mubr.f32.mxu1 %v5264_v11  ;;  %6579 = vst [vmem:[#allocation18_spill] sm:$0xff] %v5323_v5  ;;  %6585 = vst [vmem:[#allocation24_spill] sm:$0xff] %v5389_v6 }
  0x71   : > { %4374 = vmatpush3.msra.mxu0 %v3411_v8  ;;  %4173 = vmatmul.mubr.f32.gmra.mxu1 %v5268_v13  ;;  %v3408_v8 = vld [vmem:[%s6529_s1 + $0x240] sm:$0xff] }
  0x72   : > { %4252 = vmatprep.mubr.f32.mxu0 %v5272_v14  ;;  %4295 = vmatprep.subr.mxu1 %v3362_v15  ;;  %v3357_v14 = vld [vmem:[%s6529_s1 + $0x1a8] sm:$0xff] }
  0x73   : > { %4253 = vmatmul.mubr.f32.gmra.mxu0 %v5279_v17  ;;  %4296 = vmatpush3.msra.mxu1 %v3362_v15  ;;  %v5330_v15 = vld [vmem:[%s4944_s30 + $0xc0] sm:$0xff] }
  0x74   : > { %4375 = vmatprep.subr.mxu0 %v3410_v19  ;;  %4175 = vmatprep.mubr.f32.mxu1 %v5286_v20  ;;  %v5367_v17 = vld [vmem:[%s4944_s30 + $0xe2] sm:$0xff] }
  0x75   : > { %4376 = vmatpush3.msra.mxu0 %v3410_v19  ;;  %4176 = vmatmul.mubr.f32.gmra.mxu1 %v5290_v21  ;;  %v5334_v19 = vld [vmem:[%s4944_s30 + $0xc8] sm:$0xff]  ;;  %6583 = vst [vmem:[#allocation22_spill] sm:$0xff] %v5367_v17 }
  0x76   : > { %4255 = vmatprep.mubr.f32.mxu0 %v5294_v22  ;;  %4297 = vmatprep.subr.mxu1 %v3361_v24  ;;  %v3358_v22 = vld [vmem:[%s6529_s1 + $0x1b0] sm:$0xff] }
  0x77   : > { %4256 = vmatmul.mubr.f32.gmra.mxu0 %v5301_v32  ;;  %4298 = vmatpush3.msra.mxu1 %v3361_v24  ;;  %v5338_v24 = vld [vmem:[%s4944_s30 + $0xc2] sm:$0xff]  ;;  %v5345_v32 = vld [vmem:[%s4944_s30 + $0xca] sm:$0xff] }
  0x78   : > { %4377 = vmatprep.subr.mxu0 %v3409_v37  ;;  %4178 = vmatprep.mubr.f32.mxu1 %v5308_v45  ;;  %6580 = vst [vmem:[#allocation19_spill] sm:$0xff] %v5338_v24  ;;  %6581 = vst [vmem:[#allocation20_spill] sm:$0xff] %v5345_v32 }
  0x79   : > { %4378 = vmatpush3.msra.mxu0 %v3409_v37  ;;  %4179 = vmatmul.mubr.f32.gmra.mxu1 %v5312_v48  ;;  %v3359_v37 = vld [vmem:[%s6529_s1 + $0x1b8] sm:$0xff] }
  0x7a   : > { %4258 = vmatprep.mubr.f32.mxu0 %v5316_v56  ;;  %4299 = vmatprep.subr.mxu1 %v3360_v61  ;;  %v5356_v56 = vld [vmem:[%s4944_s30 + $0xe0] sm:$0xff] }
  0x7b   : > { %4259 = vmatmul.mubr.f32.gmra.mxu0 %v5323_v5  ;;  %4300 = vmatpush3.msra.mxu1 %v3360_v61  ;;  %v3407_v61 = vld [vmem:[%s6529_s1 + $0x238] sm:$0xff] }
  0x7c   : > { %4379 = vmatprep.subr.mxu0 %v3408_v8  ;;  %4181 = vmatprep.mubr.f32.mxu1 %v5330_v15  ;;  %v5352_v5 = vld [vmem:[%s4944_s30 + $0xd8] sm:$0xff] }
  0x7d   : > { %4380 = vmatpush3.msra.mxu0 %v3408_v8  ;;  %4182 = vmatmul.mubr.f32.gmra.mxu1 %v5334_v19  ;;  %v5360_v8 = vld [vmem:[%s4944_s30 + $0xda] sm:$0xff] }
  0x7e   : > { %4261 = vmatprep.mubr.f32.mxu0 %v5338_v24  ;;  %4301 = vmatprep.subr.mxu1 %v3359_v37  ;;  %6582 = vst [vmem:[#allocation21_spill] sm:$0xff] %v5360_v8  ;;  %v5378_v24 = vld [vmem:[%s4944_s30 + $0xf8] sm:$0xff] }
  0x7f   : > { %4262 = vmatmul.mubr.f32.gmra.mxu0 %v5345_v32  ;;  %4302 = vmatpush3.msra.mxu1 %v3359_v37  ;;  %v3406_v37 = vld [vmem:[%s6529_s1 + $0x230] sm:$0xff] }
  0x80   : > { %4381 = vmatprep.subr.mxu0 %v3407_v61  ;;  %4184 = vmatprep.mubr.f32.mxu1 %v5352_v5  ;;  %v5374_v32 = vld [vmem:[%s4944_s30 + $0xf0] sm:$0xff] }
  0x81   : > { %4382 = vmatpush3.msra.mxu0 %v3407_v61  ;;  %4185 = vmatmul.mubr.f32.gmra.mxu1 %v5356_v56  ;;  %v5382_v61 = vld [vmem:[%s4944_s30 + $0xf2] sm:$0xff] }
  0x82   : > { %4264 = vmatprep.mubr.f32.mxu0 %v5360_v8  ;;  %4303 = vmatprep.subr.mxu1 %v3358_v22  ;;  %6584 = vst [vmem:[#allocation23_spill] sm:$0xff] %v5382_v61  ;;  %v5400_v8 = vld [vmem:[%s4944_s30 + $0x110] sm:$0xff] }
  0x83   : > { %4265 = vmatmul.mubr.f32.gmra.mxu0 %v5367_v17  ;;  %4304 = vmatpush3.msra.mxu1 %v3358_v22  ;;  %v3405_v22 = vld [vmem:[%s6529_s1 + $0x228] sm:$0xff] }
  0x84   : > { %4383 = vmatprep.subr.mxu0 %v3406_v37  ;;  %4187 = vmatprep.mubr.f32.mxu1 %v5374_v32  ;;  %v5396_v17 = vld [vmem:[%s4944_s30 + $0x108] sm:$0xff] }
  0x85   : > { %4384 = vmatpush3.msra.mxu0 %v3406_v37  ;;  %4188 = vmatmul.mubr.f32.gmra.mxu1 %v5378_v24  ;;  %v5404_v37 = vld [vmem:[%s4944_s30 + $0x10a] sm:$0xff] }
  0x86   : > { %4267 = vmatprep.mubr.f32.mxu0 %v5382_v61  ;;  %4305 = vmatprep.subr.mxu1 %v3357_v14  ;;  %6586 = vst [vmem:[#allocation25_spill] sm:$0xff] %v5404_v37  ;;  %v5422_v61 = vld [vmem:[%s4944_s30 + $0x128] sm:$0xff] }
  0x87   : > { %4268 = vmatmul.mubr.f32.gmra.mxu0 %v5389_v6  ;;  %4306 = vmatpush3.msra.mxu1 %v3357_v14  ;;  %v3404_v14 = vld [vmem:[%s6529_s1 + $0x220] sm:$0xff] }
  0x88   : > { %4385 = vmatprep.subr.mxu0 %v3405_v22  ;;  %4190 = vmatprep.mubr.f32.mxu1 %v5396_v17  ;;  %v5418_v6 = vld [vmem:[%s4944_s30 + $0x120] sm:$0xff] }
  0x89   : > { %4386 = vmatpush3.msra.mxu0 %v3405_v22  ;;  %4191 = vmatmul.mubr.f32.gmra.mxu1 %v5400_v8  ;;  %v5426_v22 = vld [vmem:[%s4944_s30 + $0x122] sm:$0xff] }
  0x8a   : > { %4270 = vmatprep.mubr.f32.mxu0 %v5404_v37  ;;  %4307 = vmatprep.subr.mxu1 %v3356_v3  ;;  %6588 = vst [vmem:[#allocation27_spill] sm:$0xff] %v5426_v22  ;;  %v5444_v37 = vld [vmem:[%s4944_s30 + $0x140] sm:$0xff] }
  0x8b   : > { %4271 = vmatmul.mubr.f32.gmra.mxu0 %v5411_v59  ;;  %4308 = vmatpush3.msra.mxu1 %v3356_v3  ;;  %v3403_v3 = vld [vmem:[%s6529_s1 + $0x218] sm:$0xff] }
  0x8c   : > { %4387 = vmatprep.subr.mxu0 %v3404_v14  ;;  %4193 = vmatprep.mubr.f32.mxu1 %v5418_v6  ;;  %v5440_v59 = vld [vmem:[%s4944_s30 + $0x138] sm:$0xff] }
  0x8d   : > { %4388 = vmatpush3.msra.mxu0 %v3404_v14  ;;  %4194 = vmatmul.mubr.f32.gmra.mxu1 %v5422_v61  ;;  %v5448_v14 = vld [vmem:[%s4944_s30 + $0x13a] sm:$0xff] }
  0x8e   : > { %4273 = vmatprep.mubr.f32.mxu0 %v5426_v22  ;;  %4309 = vmatprep.subr.mxu1 %v3355_v54  ;;  %6590 = vst [vmem:[#allocation29_spill] sm:$0xff] %v5448_v14  ;;  %v5466_v22 = vld [vmem:[%s4944_s30 + $0x158] sm:$0xff] }
  0x8f   : > { %4274 = vmatmul.mubr.f32.gmra.mxu0 %v5433_v46  ;;  %4310 = vmatpush3.msra.mxu1 %v3355_v54  ;;  %v3402_v54 = vld [vmem:[%s6529_s1 + $0x210] sm:$0xff] }
  0x90   : > { %4389 = vmatprep.subr.mxu0 %v3403_v3  ;;  %4196 = vmatprep.mubr.f32.mxu1 %v5440_v59  ;;  %v5462_v46 = vld [vmem:[%s4944_s30 + $0x150] sm:$0xff] }
  0x91   : > { %4390 = vmatpush3.msra.mxu0 %v3403_v3  ;;  %4197 = vmatmul.mubr.f32.gmra.mxu1 %v5444_v37  ;;  %v5470_v3 = vld [vmem:[%s4944_s30 + $0x152] sm:$0xff] }
  0x92   : > { %4276 = vmatprep.mubr.f32.mxu0 %v5448_v14  ;;  %4311 = vmatprep.subr.mxu1 %v3354_v43  ;;  %6592 = vst [vmem:[#allocation31_spill] sm:$0xff] %v5470_v3  ;;  %v5488_v14 = vld [vmem:[%s4944_s30 + $0x170] sm:$0xff] }
  0x93   : > { %4277 = vmatmul.mubr.f32.gmra.mxu0 %v5455_v35  ;;  %4312 = vmatpush3.msra.mxu1 %v3354_v43  ;;  %v3401_v35 = vld [vmem:[%s6529_s1 + $0x208] sm:$0xff] }
  0x94   : > { %4391 = vmatprep.subr.mxu0 %v3402_v54  ;;  %4199 = vmatprep.mubr.f32.mxu1 %v5462_v46  ;;  %v5484_v43 = vld [vmem:[%s4944_s30 + $0x168] sm:$0xff] }
  0x95   : > { %4392 = vmatpush3.msra.mxu0 %v3402_v54  ;;  %4200 = vmatmul.mubr.f32.gmra.mxu1 %v5466_v22  ;;  %v3352_v54 = vld [vmem:[%s6529_s1 + $0x180] sm:$0xff] }
  0x96   : > { %4279 = vmatprep.mubr.f32.mxu0 %v5470_v3  ;;  %4313 = vmatprep.subr.mxu1 %v3353_v30  ;;  %v3400_v3 = vld [vmem:[%s6529_s1 + $0x200] sm:$0xff] }
  0x97   : > { %4280 = vmatmul.mubr.f32.gmra.mxu0 %v5477_v10  ;;  %4314 = vmatpush3.msra.mxu1 %v3353_v30  ;;  %v3463_v30 = vld [vmem:[%s6529_s1 + $0x2f8] sm:$0xff] }
  0x98   : > { %4393 = vmatprep.subr.mxu0 %v3401_v35  ;;  %4202 = vmatprep.mubr.f32.mxu1 %v5484_v43 }
  0x99   : > { %4394 = vmatpush3.msra.mxu0 %v3401_v35  ;;  %4203 = vmatmul.mubr.f32.gmra.mxu1 %v5488_v14  ;;  %v3511_v35 = vld [vmem:[%s6529_s1 + $0x378] sm:$0xff] }
  0x9a   : > { %4282 = vmatprep.mubr.f32.mxu0 %v5492_v7  ;;  %4315 = vmatprep.subr.mxu1 %v3352_v54 }
  0x9b   : > { %4283 = vmatmul.mubr.f32.gmra.mxu0 %v5499_v2  ;;  %4316 = vmatpush3.msra.mxu1 %v3352_v54  ;;  %v3462_v54 = vld [vmem:[%s6529_s1 + $0x2f0] sm:$0xff] }
  0x9c   : > { %4395 = vmatprep.subr.mxu0 %v3400_v3  ;;  %4317 = vmatprep.mubr.f32.mxu1 %v5178_v27  ;;  %v3510_v27 = vld [vmem:[%s6529_s1 + $0x370] sm:$0xff] }
  0x9d   : > { %4396 = vmatpush3.msra.mxu0 %v3400_v3  ;;  %4318 = vmatmul.mubr.f32.vlgmr.msra.gmra.mxu1 %v5181_v29  ;;  %v5656_v29 = vld [vmem:[%s4944_s30 + $0x180] sm:$0xff]  ;;  %v6594_v3 = vld [vmem:[#allocation3_spill] sm:$0xff] }
  0x9e   : > { %4397 = vmatprep.mubr.f32.mxu0 %v4975_v25  ;;  %4445 = vmatprep.subr.mxu1 %v3463_v30  ;;  %v3461_v25 = vld [vmem:[%s6529_s1 + $0x2e8] sm:$0xff] }
  0x9f   : > { %4398 = vmatmul.mubr.f32.vlgmr.msra.gmra.mxu0 %v4985_v28  ;;  %4446 = vmatpush3.msra.mxu1 %v3463_v30  ;;  %v3509_v28 = vld [vmem:[%s6529_s1 + $0x368] sm:$0xff] }
  0xa0   : > { %4525 = vmatprep.subr.mxu0 %v3511_v35  ;;  %4320 = vmatprep.mubr.f32.mxu1 %v5198_v38  ;;  %v5660_v30 = vld [vmem:[%s4944_s30 + $0x188] sm:$0xff] }
  0xa1   : > { %4526 = vmatpush3.msra.mxu0 %v3511_v35  ;;  %4321 = vmatmul.mubr.f32.gmra.mxu1 %v5202_v40  ;;  %v6595_v35 = vld [vmem:[#allocation4_spill] sm:$0xff] }
  0xa2   : > { %4400 = vmatprep.mubr.f32.mxu0 %v5003_v33  ;;  %4447 = vmatprep.subr.mxu1 %v3462_v54  ;;  %v3460_v33 = vld [vmem:[%s6529_s1 + $0x2e0] sm:$0xff] }
  0xa3   : > { %4401 = vmatmul.mubr.f32.gmra.mxu0 %v5013_v36  ;;  %4448 = vmatpush3.msra.mxu1 %v3462_v54  ;;  %v3508_v36 = vld [vmem:[%s6529_s1 + $0x360] sm:$0xff] }
  0xa4   : > { %4527 = vmatprep.subr.mxu0 %v3510_v27  ;;  %4323 = vmatprep.mubr.f32.mxu1 %v5220_v51  ;;  %v5664_v54 = vld [vmem:[%s4944_s30 + $0x181] sm:$0xff] }
  0xa5   : > { %4528 = vmatpush3.msra.mxu0 %v3510_v27  ;;  %4324 = vmatmul.mubr.f32.gmra.mxu1 %v5224_v53  ;;  %v3448_v27 = vld [vmem:[%s6529_s1 + $0x280] sm:$0xff] }
  0xa6   : > { %4403 = vmatprep.mubr.f32.mxu0 %v5031_v41  ;;  %4449 = vmatprep.subr.mxu1 %v3461_v25  ;;  %v3459_v41 = vld [vmem:[%s6529_s1 + $0x2d8] sm:$0xff] }
  0xa7   : > { %4404 = vmatmul.mubr.f32.gmra.mxu0 %v5041_v44  ;;  %4450 = vmatpush3.msra.mxu1 %v3461_v25  ;;  %v3507_v44 = vld [vmem:[%s6529_s1 + $0x358] sm:$0xff]  ;;  %v5671_v25 = vld [vmem:[%s4944_s30 + $0x189] sm:$0xff] }
  0xa8   : > { %4529 = vmatprep.subr.mxu0 %v3509_v28  ;;  %4326 = vmatprep.mubr.f32.mxu1 %v5242_v62 }
  0xa9   : > { %4530 = vmatpush3.msra.mxu0 %v3509_v28  ;;  %4327 = vmatmul.mubr.f32.gmra.mxu1 %v5246_v0  ;;  %v3496_v28 = vld [vmem:[%s6529_s1 + $0x300] sm:$0xff] }
  0xaa   : > { %4406 = vmatprep.mubr.f32.mxu0 %v5059_v49  ;;  %4451 = vmatprep.subr.mxu1 %v3460_v33  ;;  %v3458_v49 = vld [vmem:[%s6529_s1 + $0x2d0] sm:$0xff] }
  0xab   : > { %4407 = vmatmul.mubr.f32.gmra.mxu0 %v5069_v52  ;;  %4452 = vmatpush3.msra.mxu1 %v3460_v33  ;;  %v3506_v52 = vld [vmem:[%s6529_s1 + $0x350] sm:$0xff]  ;;  %v3559_v33 = vld [vmem:[%s6529_s1 + $0x3f8] sm:$0xff] }
  0xac   : > { %4531 = vmatprep.subr.mxu0 %v3508_v36  ;;  %4329 = vmatprep.mubr.f32.mxu1 %v5264_v11 }
  0xad   : > { %4532 = vmatpush3.msra.mxu0 %v3508_v36  ;;  %4330 = vmatmul.mubr.f32.gmra.mxu1 %v5268_v13  ;;  %v6596_v36 = vld [vmem:[#allocation5_spill] sm:$0xff] }
  0xae   : > { %4409 = vmatprep.mubr.f32.mxu0 %v5087_v57  ;;  %4453 = vmatprep.subr.mxu1 %v3459_v41  ;;  %v3457_v57 = vld [vmem:[%s6529_s1 + $0x2c8] sm:$0xff] }
  0xaf   : > { %4410 = vmatmul.mubr.f32.gmra.mxu0 %v5097_v60  ;;  %4454 = vmatpush3.msra.mxu1 %v3459_v41  ;;  %v3505_v60 = vld [vmem:[%s6529_s1 + $0x348] sm:$0xff]  ;;  %v6597_v41 = vld [vmem:[#allocation6_spill] sm:$0xff] }
  0xb0   : > { %4533 = vmatprep.subr.mxu0 %v3507_v44  ;;  %4332 = vmatprep.mubr.f32.mxu1 %v5286_v20 }
  0xb1   : > { %4534 = vmatpush3.msra.mxu0 %v3507_v44  ;;  %4333 = vmatmul.mubr.f32.gmra.mxu1 %v5290_v21  ;;  %v3607_v44 = vld [vmem:[%s6529_s1 + $0x478] sm:$0xff] }
  0xb2   : > { %4412 = vmatprep.mubr.f32.mxu0 %v5115_v1  ;;  %4455 = vmatprep.subr.mxu1 %v3458_v49  ;;  %v3456_v1 = vld [vmem:[%s6529_s1 + $0x2c0] sm:$0xff] }
  0xb3   : > { %4413 = vmatmul.mubr.f32.gmra.mxu0 %v5125_v4  ;;  %4456 = vmatpush3.msra.mxu1 %v3458_v49  ;;  %v3504_v4 = vld [vmem:[%s6529_s1 + $0x340] sm:$0xff]  ;;  %v3558_v49 = vld [vmem:[%s6529_s1 + $0x3f0] sm:$0xff] }
  0xb4   : > { %4535 = vmatprep.subr.mxu0 %v3506_v52  ;;  %4335 = vmatprep.mubr.f32.mxu1 %v5308_v45 }
  0xb5   : > { %4536 = vmatpush3.msra.mxu0 %v3506_v52  ;;  %4336 = vmatmul.mubr.f32.gmra.mxu1 %v5312_v48  ;;  %v6598_v52 = vld [vmem:[#allocation7_spill] sm:$0xff] }
  0xb6   : > { %4415 = vmatprep.mubr.f32.mxu0 %v5143_v9  ;;  %4457 = vmatprep.subr.mxu1 %v3457_v57  ;;  %v3455_v9 = vld [vmem:[%s6529_s1 + $0x2b8] sm:$0xff] }
  0xb7   : > { %4416 = vmatmul.mubr.f32.gmra.mxu0 %v5153_v12  ;;  %4458 = vmatpush3.msra.mxu1 %v3457_v57  ;;  %v3503_v12 = vld [vmem:[%s6529_s1 + $0x338] sm:$0xff]  ;;  %v6599_v57 = vld [vmem:[#allocation8_spill] sm:$0xff] }
  0xb8   : > { %4537 = vmatprep.subr.mxu0 %v3505_v60  ;;  %4338 = vmatprep.mubr.f32.mxu1 %v5330_v15 }
  0xb9   : > { %4538 = vmatpush3.msra.mxu0 %v3505_v60  ;;  %4339 = vmatmul.mubr.f32.gmra.mxu1 %v5334_v19  ;;  %v3606_v60 = vld [vmem:[%s6529_s1 + $0x470] sm:$0xff] }
  0xba   : > { %4418 = vmatprep.mubr.f32.mxu0 %v4950_v16  ;;  %4459 = vmatprep.subr.mxu1 %v3456_v1  ;;  %v3454_v16 = vld [vmem:[%s6529_s1 + $0x2b0] sm:$0xff] }
  0xbb   : > { %4419 = vmatmul.mubr.f32.gmra.mxu0 %v4954_v18  ;;  %4460 = vmatpush3.msra.mxu1 %v3456_v1  ;;  %v3502_v18 = vld [vmem:[%s6529_s1 + $0x330] sm:$0xff]  ;;  %v6601_v1 = vld [vmem:[#allocation10_spill] sm:$0xff] }
  0xbc   : > { %4539 = vmatprep.subr.mxu0 %v3504_v4  ;;  %4341 = vmatprep.mubr.f32.mxu1 %v5352_v5 }
  0xbd   : > { %4540 = vmatpush3.msra.mxu0 %v3504_v4  ;;  %4342 = vmatmul.mubr.f32.gmra.mxu1 %v5356_v56  ;;  %v3605_v4 = vld [vmem:[%s6529_s1 + $0x468] sm:$0xff] }
  0xbe   : > { %4421 = vmatprep.mubr.f32.mxu0 %v4969_v23  ;;  %4461 = vmatprep.subr.mxu1 %v3455_v9  ;;  %v3453_v23 = vld [vmem:[%s6529_s1 + $0x2a8] sm:$0xff] }
  0xbf   : > { %4422 = vmatmul.mubr.f32.gmra.mxu0 %v4978_v26  ;;  %4462 = vmatpush3.msra.mxu1 %v3455_v9  ;;  %v3501_v26 = vld [vmem:[%s6529_s1 + $0x328] sm:$0xff]  ;;  %v6603_v9 = vld [vmem:[#allocation12_spill] sm:$0xff] }
  0xc0   : > { %4541 = vmatprep.subr.mxu0 %v3503_v12  ;;  %4344 = vmatprep.mubr.f32.mxu1 %v5374_v32 }
  0xc1   : > { %4542 = vmatpush3.msra.mxu0 %v3503_v12  ;;  %4345 = vmatmul.mubr.f32.gmra.mxu1 %v5378_v24  ;;  %v3604_v12 = vld [vmem:[%s6529_s1 + $0x460] sm:$0xff] }
  0xc2   : > { %4424 = vmatprep.mubr.f32.mxu0 %v4996_v31  ;;  %4463 = vmatprep.subr.mxu1 %v3454_v16  ;;  %v3452_v31 = vld [vmem:[%s6529_s1 + $0x2a0] sm:$0xff] }
  0xc3   : > { %4425 = vmatmul.mubr.f32.gmra.mxu0 %v5006_v34  ;;  %4464 = vmatpush3.msra.mxu1 %v3454_v16  ;;  %v3500_v34 = vld [vmem:[%s6529_s1 + $0x320] sm:$0xff] }
  0xc4   : > { %4543 = vmatprep.subr.mxu0 %v3502_v18  ;;  %4347 = vmatprep.mubr.f32.mxu1 %v5396_v17  ;;  %v6605_v16 = vld [vmem:[#allocation14_spill] sm:$0xff] }
  0xc5   : > { %4544 = vmatpush3.msra.mxu0 %v3502_v18  ;;  %4348 = vmatmul.mubr.f32.gmra.mxu1 %v5400_v8  ;;  %v3603_v18 = vld [vmem:[%s6529_s1 + $0x458] sm:$0xff] }
  0xc6   : > { %4427 = vmatprep.mubr.f32.mxu0 %v5024_v39  ;;  %4465 = vmatprep.subr.mxu1 %v3453_v23  ;;  %v3451_v39 = vld [vmem:[%s6529_s1 + $0x298] sm:$0xff] }
  0xc7   : > { %4428 = vmatmul.mubr.f32.gmra.mxu0 %v5034_v42  ;;  %4466 = vmatpush3.msra.mxu1 %v3453_v23  ;;  %v3499_v42 = vld [vmem:[%s6529_s1 + $0x318] sm:$0xff] }
  0xc8   : > { %4545 = vmatprep.subr.mxu0 %v3501_v26  ;;  %4350 = vmatprep.mubr.f32.mxu1 %v5418_v6 }
  0xc9   : > { %4546 = vmatpush3.msra.mxu0 %v3501_v26  ;;  %4351 = vmatmul.mubr.f32.gmra.mxu1 %v5422_v61  ;;  %v6606_v26 = vld [vmem:[#allocation15_spill] sm:$0xff] }
  0xca   : > { %4430 = vmatprep.mubr.f32.mxu0 %v5052_v47  ;;  %4467 = vmatprep.subr.mxu1 %v3452_v31  ;;  %v3450_v47 = vld [vmem:[%s6529_s1 + $0x290] sm:$0xff] }
  0xcb   : > { %4431 = vmatmul.mubr.f32.gmra.mxu0 %v5062_v50  ;;  %4468 = vmatpush3.msra.mxu1 %v3452_v31  ;;  %v3498_v50 = vld [vmem:[%s6529_s1 + $0x310] sm:$0xff] }
  0xcc   : > { %4547 = vmatprep.subr.mxu0 %v3500_v34  ;;  %4353 = vmatprep.mubr.f32.mxu1 %v5440_v59 }
  0xcd   : > { %4548 = vmatpush3.msra.mxu0 %v3500_v34  ;;  %4354 = vmatmul.mubr.f32.gmra.mxu1 %v5444_v37  ;;  %v6607_v34 = vld [vmem:[#allocation16_spill] sm:$0xff] }
  0xce   : > { %4433 = vmatprep.mubr.f32.mxu0 %v5080_v55  ;;  %4469 = vmatprep.subr.mxu1 %v3451_v39  ;;  %v6593_v55 = vld [vmem:[#allocation2_spill] sm:$0xff] }
  0xcf   : > { %4434 = vmatmul.mubr.f32.gmra.mxu0 %v5090_v58  ;;  %4470 = vmatpush3.msra.mxu1 %v3451_v39  ;;  %v3449_v58 = vld [vmem:[%s6529_s1 + $0x288] sm:$0xff] }
  0xd0   : > { %4549 = vmatprep.subr.mxu0 %v3499_v42  ;;  %4356 = vmatprep.mubr.f32.mxu1 %v5462_v46  ;;  %v3553_v39 = vld [vmem:[%s6529_s1 + $0x3c8] sm:$0xff] }
  0xd1   : > { %4550 = vmatpush3.msra.mxu0 %v3499_v42  ;;  %4357 = vmatmul.mubr.f32.gmra.mxu1 %v5466_v22 }
  0xd2   : > { %4436 = vmatprep.mubr.f32.mxu0 %v5108_v63  ;;  %4471 = vmatprep.subr.mxu1 %v3450_v47  ;;  %v3497_v63 = vld [vmem:[%s6529_s1 + $0x308] sm:$0xff] }
  0xd3   : > { %4437 = vmatmul.mubr.f32.gmra.mxu0 %v6593_v55  ;;  %4472 = vmatpush3.msra.mxu1 %v3450_v47  ;;  %v6608_v47 = vld [vmem:[#allocation17_spill] sm:$0xff] }
  0xd4   : > { %4551 = vmatprep.subr.mxu0 %v3498_v50  ;;  %4359 = vmatprep.mubr.f32.mxu1 %v5484_v43 }
  0xd5   : > { %4552 = vmatpush3.msra.mxu0 %v3498_v50  ;;  %4360 = vmatmul.mubr.f32.gmra.mxu1 %v5488_v14  ;;  %v6609_v50 = vld [vmem:[#allocation18_spill] sm:$0xff] }
  0xd6   : > { %4439 = vmatprep.mubr.f32.mxu0 %v6594_v3  ;;  %4473 = vmatprep.subr.mxu1 %v3449_v58  ;;  %v6610_v3 = vld [vmem:[#allocation19_spill] sm:$0xff] }
  0xd7   : > { %4440 = vmatmul.mubr.f32.gmra.mxu0 %v6595_v35  ;;  %4474 = vmatpush3.msra.mxu1 %v3449_v58  ;;  %v3552_v58 = vld [vmem:[%s6529_s1 + $0x3c0] sm:$0xff]  ;;  %v6611_v35 = vld [vmem:[#allocation20_spill] sm:$0xff] }
  0xd8   : > { %4553 = vmatprep.subr.mxu0 %v3497_v63  ;;  %4362 = vmatprep.mubr.f32.mxu1 %v5656_v29 }
  0xd9   : > { %4554 = vmatpush3.msra.mxu0 %v3497_v63  ;;  %4363 = vmatmul.mubr.f32.gmra.mxu1 %v5660_v30 }
  0xda   : > { %4442 = vmatprep.mubr.f32.mxu0 %v5664_v54  ;;  %4475 = vmatprep.subr.mxu1 %v3448_v27 }
  0xdb   : > { %4443 = vmatmul.mubr.f32.gmra.mxu0 %v5671_v25  ;;  %4476 = vmatpush3.msra.mxu1 %v3448_v27 }
  0xdc   : > { %4555 = vmatprep.subr.mxu0 %v3496_v28  ;;  %4477 = vmatprep.mubr.f32.mxu1 %v6596_v36  ;;  %v6612_v36 = vld [vmem:[#allocation21_spill] sm:$0xff] }
  0xdd   : > { %4556 = vmatpush3.msra.mxu0 %v3496_v28  ;;  %4478 = vmatmul.mubr.f32.vlgmr.msra.gmra.mxu1 %v6597_v41  ;;  %v6613_v41 = vld [vmem:[#allocation22_spill] sm:$0xff] }
  0xde   : > { %4557 = vmatprep.mubr.f32.mxu0 %v5198_v38  ;;  %4605 = vmatprep.subr.mxu1 %v3559_v33  ;;  %v3557_v38 = vld [vmem:[%s6529_s1 + $0x3e8] sm:$0xff] }
  0xdf   : > { %4558 = vmatmul.mubr.f32.vlgmr.msra.gmra.mxu0 %v5202_v40  ;;  %4606 = vmatpush3.msra.mxu1 %v3559_v33  ;;  %v6600_v40 = vld [vmem:[#allocation9_spill] sm:$0xff] }
  0xe0   : > { %4685 = vmatprep.subr.mxu0 %v3607_v44  ;;  %4480 = vmatprep.mubr.f32.mxu1 %v6598_v52  ;;  %v6614_v52 = vld [vmem:[#allocation23_spill] sm:$0xff] }
  0xe1   : > { %4686 = vmatpush3.msra.mxu0 %v3607_v44  ;;  %4481 = vmatmul.mubr.f32.gmra.mxu1 %v6599_v57  ;;  %v3550_v44 = vld [vmem:[%s6529_s1 + $0x3b0] sm:$0xff] }
  0xe2   : > { %4560 = vmatprep.mubr.f32.mxu0 %v5220_v51  ;;  %4607 = vmatprep.subr.mxu1 %v3558_v49  ;;  %v3556_v51 = vld [vmem:[%s6529_s1 + $0x3e0] sm:$0xff]  ;;  %v6615_v57 = vld [vmem:[#allocation24_spill] sm:$0xff] }
  0xe3   : > { %4561 = vmatmul.mubr.f32.gmra.mxu0 %v5224_v53  ;;  %4608 = vmatpush3.msra.mxu1 %v3558_v49  ;;  %v6602_v53 = vld [vmem:[#allocation11_spill] sm:$0xff] }
  0xe4   : > { %4687 = vmatprep.subr.mxu0 %v3606_v60  ;;  %4483 = vmatprep.mubr.f32.mxu1 %v6600_v40 }
  0xe5   : > { %4688 = vmatpush3.msra.mxu0 %v3606_v60  ;;  %4484 = vmatmul.mubr.f32.gmra.mxu1 %v6601_v1  ;;  %v6616_v1 = vld [vmem:[#allocation25_spill] sm:$0xff] }
  0xe6   : > { %4563 = vmatprep.mubr.f32.mxu0 %v5242_v62  ;;  %4609 = vmatprep.subr.mxu1 %v3557_v38  ;;  %v3555_v62 = vld [vmem:[%s6529_s1 + $0x3d8] sm:$0xff] }
  0xe7   : > { %4564 = vmatmul.mubr.f32.gmra.mxu0 %v5246_v0  ;;  %4610 = vmatpush3.msra.mxu1 %v3557_v38  ;;  %v6604_v0 = vld [vmem:[#allocation13_spill] sm:$0xff]  ;;  %v3549_v38 = vld [vmem:[%s6529_s1 + $0x3a8] sm:$0xff] }
  0xe8   : > { %4689 = vmatprep.subr.mxu0 %v3605_v4  ;;  %4486 = vmatprep.mubr.f32.mxu1 %v6602_v53 }
  0xe9   : > { %4690 = vmatpush3.msra.mxu0 %v3605_v4  ;;  %4487 = vmatmul.mubr.f32.gmra.mxu1 %v6603_v9  ;;  %v6617_v4 = vld [vmem:[#allocation26_spill] sm:$0xff] }
  0xea   : > { %4566 = vmatprep.mubr.f32.mxu0 %v5264_v11  ;;  %4611 = vmatprep.subr.mxu1 %v3556_v51 }
  0xeb   : > { %4567 = vmatmul.mubr.f32.gmra.mxu0 %v5268_v13  ;;  %4612 = vmatpush3.msra.mxu1 %v3556_v51  ;;  %v3554_v13 = vld [vmem:[%s6529_s1 + $0x3d0] sm:$0xff] }
  0xec   : > { %4691 = vmatprep.subr.mxu0 %v3604_v12  ;;  %4489 = vmatprep.mubr.f32.mxu1 %v6604_v0  ;;  %v3547_v0 = vld [vmem:[%s6529_s1 + $0x398] sm:$0xff] }
  0xed   : > { %4692 = vmatpush3.msra.mxu0 %v3604_v12  ;;  %4490 = vmatmul.mubr.f32.gmra.mxu1 %v6605_v16  ;;  %v6618_v12 = vld [vmem:[#allocation27_spill] sm:$0xff] }
  0xee   : > { %4569 = vmatprep.mubr.f32.mxu0 %v5286_v20  ;;  %4613 = vmatprep.subr.mxu1 %v3555_v62  ;;  %v5728_v11 = vpop.f32.mrf.mxu1  ;;  %v3602_v20 = vld [vmem:[%s6529_s1 + $0x450] sm:$0xff] }
  0xef   : > { %4570 = vmatmul.mubr.f32.gmra.mxu0 %v5290_v21  ;;  %4614 = vmatpush3.msra.mxu1 %v3555_v62  ;;  %v5734_v23 = vpop.f32.mrf.mxu0  ;;  %v6619_v62 = vld [vmem:[#allocation28_spill] sm:$0xff] }
  0xf0   : > { %4693 = vmatprep.subr.mxu0 %v3603_v18  ;;  %4492 = vmatprep.mubr.f32.mxu1 %v6606_v26  ;;  %v5737_v31 = vpop.f32.mrf.mxu1 }
  0xf1   : > { %4694 = vmatpush3.msra.mxu0 %v3603_v18  ;;  %4493 = vmatmul.mubr.f32.gmra.mxu1 %v6607_v34  ;;  %v5743_v21 = vpop.f32.mrf.mxu0  ;;  %v6620_v18 = vld [vmem:[#allocation29_spill] sm:$0xff]  ;;  %v3546_v34 = vld [vmem:[%s6529_s1 + $0x390] sm:$0xff] }
  0xf2   : > { %4572 = vmatprep.mubr.f32.mxu0 %v5308_v45  ;;  %4615 = vmatprep.subr.mxu1 %v3554_v13  ;;  %v3601_v45 = vld [vmem:[%s6529_s1 + $0x448] sm:$0xff] }
  0xf3   : > { %4573 = vmatmul.mubr.f32.gmra.mxu0 %v5312_v48  ;;  %4616 = vmatpush3.msra.mxu1 %v3554_v13  ;;  %v5750_v42 = vpop.f32.mrf.mxu1  ;;  %v6621_v13 = vld [vmem:[#allocation30_spill] sm:$0xff] }
  0xf4   : > { %4695 = vmatprep.subr.mxu0 %v3602_v20  ;;  %4495 = vmatprep.mubr.f32.mxu1 %v6608_v47 }
  0xf5   : > { %4696 = vmatpush3.msra.mxu0 %v3602_v20  ;;  %4496 = vmatmul.mubr.f32.gmra.mxu1 %v6609_v50  ;;  %v5757_v55 = vpop.f32.mrf.mxu0  ;;  %v5759_v48 = vpop.f32.mrf.mxu1 }
  0xf6   : > { %4575 = vmatprep.mubr.f32.mxu0 %v5330_v15  ;;  %4617 = vmatprep.subr.mxu1 %v3553_v39  ;;  %v3600_v15 = vld [vmem:[%s6529_s1 + $0x440] sm:$0xff] }
  0xf7   : > { %4576 = vmatmul.mubr.f32.gmra.mxu0 %v5334_v19  ;;  %4618 = vmatpush3.msra.mxu1 %v3553_v39  ;;  %v5766_v63 = vpop.f32.mrf.mxu0  ;;  %v3551_v19 = vld [vmem:[%s6529_s1 + $0x3b8] sm:$0xff]  ;;  %v6622_v39 = vld [vmem:[#allocation31_spill] sm:$0xff] }
  0xf8   : > { %4697 = vmatprep.subr.mxu0 %v3601_v45  ;;  %4498 = vmatprep.mubr.f32.mxu1 %v6610_v3  ;;  %v3544_v3 = vld [vmem:[%s6529_s1 + $0x380] sm:$0xff] }
  0xf9   : > { %4698 = vmatpush3.msra.mxu0 %v3601_v45  ;;  %4499 = vmatmul.mubr.f32.gmra.mxu1 %v6611_v35  ;;  %v5773_v27 = vpop.f32.mrf.mxu1  ;;  %v5884_v45 = vld [vmem:[%s4944_s30 + $0x182] sm:$0xff] }
  0xfa   : > { %4578 = vmatprep.mubr.f32.mxu0 %v5352_v5  ;;  %4619 = vmatprep.subr.mxu1 %v3552_v58  ;;  %v3599_v5 = vld [vmem:[%s6529_s1 + $0x438] sm:$0xff] }
  0xfb   : > { %4579 = vmatmul.mubr.f32.gmra.mxu0 %v5356_v56  ;;  %4620 = vmatpush3.msra.mxu1 %v3552_v58  ;;  %v5780_v28 = vpop.f32.mrf.mxu0  ;;  %v5782_v33 = vpop.f32.mrf.mxu1  ;;  %v5888_v58 = vld [vmem:[%s4944_s30 + $0x18a] sm:$0xff] }
  0xfc   : > { %4699 = vmatprep.subr.mxu0 %v3600_v15  ;;  %4501 = vmatprep.mubr.f32.mxu1 %v6612_v36  ;;  %v3513_v36 = vld [vmem:[%s4944_s30 + $0x39] sm:$0xff] }
  0xfd   : > { %4700 = vmatpush3.msra.mxu0 %v3600_v15  ;;  %4502 = vmatmul.mubr.f32.gmra.mxu1 %v6613_v41  ;;  %v5789_v56 = vpop.f32.mrf.mxu0  ;;  %v3592_v15 = vld [vmem:[%s6529_s1 + $0x400] sm:$0xff] }
  0xfe   : > { %4581 = vmatprep.mubr.f32.mxu0 %v5374_v32  ;;  %4621 = vmatprep.subr.mxu1 %v3551_v19  ;;  %v3598_v32 = vld [vmem:[%s6529_s1 + $0x430] sm:$0xff] }
  0xff   : > { %4582 = vmatmul.mubr.f32.gmra.mxu0 %v5378_v24  ;;  %4622 = vmatpush3.msra.mxu1 %v3551_v19  ;;  %v5796_v49 = vpop.f32.mrf.mxu1  ;;  %v3512_v19 = vld [vmem:[%s4944_s30 + $0x31] sm:$0xff] }
 0x100   : > { %4701 = vmatprep.subr.mxu0 %v3599_v5  ;;  %4504 = vmatprep.mubr.f32.mxu1 %v6614_v52  ;;  %v3561_v52 = vld [vmem:[%s4944_s30 + $0x3a] sm:$0xff] }
 0x101   : > { %4702 = vmatpush3.msra.mxu0 %v3599_v5  ;;  %4505 = vmatmul.mubr.f32.gmra.mxu1 %v6615_v57  ;;  %v5803_v60 = vpop.f32.mrf.mxu0  ;;  %v5805_v24 = vpop.f32.mrf.mxu1  ;;  %v3560_v5 = vld [vmem:[%s4944_s30 + $0x32] sm:$0xff] }
 0x102   : > { %4584 = vmatprep.mubr.f32.mxu0 %v5396_v17  ;;  %4623 = vmatprep.subr.mxu1 %v3550_v44  ;;  %v3597_v17 = vld [vmem:[%s6529_s1 + $0x428] sm:$0xff] }
 0x103   : > { %4585 = vmatmul.mubr.f32.gmra.mxu0 %v5400_v8  ;;  %4624 = vmatpush3.msra.mxu1 %v3550_v44  ;;  %v5812_v40 = vpop.f32.mrf.mxu0  ;;  %v3548_v8 = vld [vmem:[%s6529_s1 + $0x3a0] sm:$0xff]  ;;  %v3514_v44 = vld [vmem:[%s4944_s30 + $0x49] sm:$0xff] }
 0x104   : > { %4703 = vmatprep.subr.mxu0 %v3598_v32  ;;  %4507 = vmatprep.mubr.f32.mxu1 %v6616_v1  ;;  %v3515_v1 = vld [vmem:[%s4944_s30 + $0x51] sm:$0xff] }
 0x105   : > { %4704 = vmatpush3.msra.mxu0 %v3598_v32  ;;  %4508 = vmatmul.mubr.f32.gmra.mxu1 %v6617_v4  ;;  %v5819_v51 = vpop.f32.mrf.mxu1  ;;  %v3562_v32 = vld [vmem:[%s4944_s30 + $0x4a] sm:$0xff] }
 0x106   : > { %4587 = vmatprep.mubr.f32.mxu0 %v5418_v6  ;;  %4625 = vmatprep.subr.mxu1 %v3549_v38  ;;  %v3596_v6 = vld [vmem:[%s6529_s1 + $0x420] sm:$0xff] }
 0x107   : > { %4588 = vmatmul.mubr.f32.gmra.mxu0 %v5422_v61  ;;  %4626 = vmatpush3.msra.mxu1 %v3549_v38  ;;  %v5826_v53 = vpop.f32.mrf.mxu0  ;;  %v5828_v9 = vpop.f32.mrf.mxu1 }
 0x108   : > { %4705 = vmatprep.subr.mxu0 %v3597_v17  ;;  %4510 = vmatprep.mubr.f32.mxu1 %v6618_v12 }
 0x109   : > { %4706 = vmatpush3.msra.mxu0 %v3597_v17  ;;  %4511 = vmatmul.mubr.f32.gmra.mxu1 %v6619_v62  ;;  %v5835_v61 = vpop.f32.mrf.mxu0 }
 0x10a   : > { %4590 = vmatprep.mubr.f32.mxu0 %v5440_v59  ;;  %4627 = vmatprep.subr.mxu1 %v3548_v8  ;;  %v3595_v59 = vld [vmem:[%s6529_s1 + $0x418] sm:$0xff] }
 0x10b   : > { %4591 = vmatmul.mubr.f32.gmra.mxu0 %v5444_v37  ;;  %4628 = vmatpush3.msra.mxu1 %v3548_v8  ;;  %v5842_v16 = vpop.f32.mrf.mxu1  ;;  %v3516_v8 = vld [vmem:[%s4944_s30 + $0x61] sm:$0xff] }
 0x10c   : > { %4707 = vmatprep.subr.mxu0 %v3596_v6  ;;  %4513 = vmatprep.mubr.f32.mxu1 %v6620_v18 }
 0x10d   : > { %4708 = vmatpush3.msra.mxu0 %v3596_v6  ;;  %4514 = vmatmul.mubr.f32.gmra.mxu1 %v6621_v13  ;;  %v5849_v26 = vpop.f32.mrf.mxu0  ;;  %v5851_v37 = vpop.f32.mrf.mxu1  ;;  %v3563_v6 = vld [vmem:[%s4944_s30 + $0x52] sm:$0xff] }
 0x10e   : > { %4593 = vmatprep.mubr.f32.mxu0 %v5462_v46  ;;  %4629 = vmatprep.subr.mxu1 %v3547_v0  ;;  %v3594_v46 = vld [vmem:[%s6529_s1 + $0x410] sm:$0xff] }
 0x10f   : > { %4594 = vmatmul.mubr.f32.gmra.mxu0 %v5466_v22  ;;  %4630 = vmatpush3.msra.mxu1 %v3547_v0  ;;  %v5858_v20 = vpop.f32.mrf.mxu0  ;;  %v3545_v22 = vld [vmem:[%s6529_s1 + $0x388] sm:$0xff] }
 0x110   : > { %4709 = vmatprep.subr.mxu0 %v3595_v59  ;;  %4516 = vmatprep.mubr.f32.mxu1 %v6622_v39 }
 0x111   : > { %4710 = vmatpush3.msra.mxu0 %v3595_v59  ;;  %4517 = vmatmul.mubr.f32.gmra.mxu1 %v5477_v10  ;;  %v5865_v47 = vpop.f32.mrf.mxu1 }
 0x112   : > { %4596 = vmatprep.mubr.f32.mxu0 %v5484_v43  ;;  %4631 = vmatprep.subr.mxu1 %v3546_v34 }
 0x113   : > { %4597 = vmatmul.mubr.f32.gmra.mxu0 %v5488_v14  ;;  %4632 = vmatpush3.msra.mxu1 %v3546_v34  ;;  %v5872_v10 = vpop.f32.mrf.mxu0  ;;  %v5874_v50 = vpop.f32.mrf.mxu1  ;;  %v3593_v14 = vld [vmem:[%s6529_s1 + $0x408] sm:$0xff] }
 0x114   : > { %4711 = vmatprep.subr.mxu0 %v3594_v46  ;;  %4519 = vmatprep.mubr.f32.mxu1 %v5492_v7  ;;  %v3517_v34 = vld [vmem:[%s4944_s30 + $0x69] sm:$0xff] }
 0x115   : > { %4712 = vmatpush3.msra.mxu0 %v3594_v46  ;;  %4520 = vmatmul.mubr.f32.gmra.mxu1 %v5499_v2  ;;  %v5881_v43 = vpop.f32.mrf.mxu0  ;;  %v3494_v2 = vld [vmem:[%s4944_s30 + $0x198] sm:$0xff] }
 0x116   : > { %4599 = vmatprep.mubr.f32.mxu0 %v5656_v29  ;;  %4633 = vmatprep.subr.mxu1 %v3545_v22  ;;  %v3495_v29 = vld [vmem:[%s4944_s30 + $0x1a0] sm:$0xff] }
 0x117   : > { %4600 = vmatmul.mubr.f32.gmra.mxu0 %v5660_v30  ;;  %4634 = vmatpush3.msra.mxu1 %v3545_v22  ;;  %v5891_v7 = vpop.f32.mrf.mxu1  ;;  %v3518_v22 = vld [vmem:[%s4944_s30 + $0x79] sm:$0xff] }
 0x118   : > { %4713 = vmatprep.subr.mxu0 %v3593_v14  ;;  %4522 = vmatprep.mubr.f32.mxu1 %v5884_v45 }
 0x119   : > { %4714 = vmatpush3.msra.mxu0 %v3593_v14  ;;  %4523 = vmatmul.mubr.f32.gmra.mxu1 %v5888_v58  ;;  %v5900_v30 = vpop.f32.mrf.mxu0  ;;  %v5902_v35 = vpop.f32.mrf.mxu1 }
 0x11a   : > { %4602 = vmatprep.mubr.f32.mxu0 %v3494_v2  ;;  %4635 = vmatprep.subr.mxu1 %v3544_v3  ;;  %v3565_v2 = vld [vmem:[%s4944_s30 + $0x6a] sm:$0xff] }
 0x11b   : > { %4603 = vmatmul.mubr.f32.gmra.mxu0 %v3495_v29  ;;  %4636 = vmatpush3.msra.mxu1 %v3544_v3  ;;  %v5909_v41 = vpop.f32.mrf.mxu0 }
 0x11c   : > { %4715 = vmatprep.subr.mxu0 %v3592_v15  ;;  %4637 = vmatprep.mubr.f32.mxu1 %v3512_v19 }
 0x11d   : > { %4716 = vmatpush3.msra.mxu0 %v3592_v15  ;;  %v4159_v57 = vpop.f32.mrf.mxu1  ;;  %4638 = vmatmul.mubr.f32.vlgmr.msra.gmra.mxu1 %v3513_v36  ;;  %v3566_v15 = vld [vmem:[%s4944_s30 + $0x7a] sm:$0xff] }
 0x11e   : > { %v657_v38 = vadd.f32 %v4159_v57, %v5734_v23  ;;  %4717 = vmatprep.mubr.f32.mxu0 %v3560_v5  ;;  %4640 = vmatprep.mubr.f32.mxu1 %v3514_v44  ;;  %v3564_v23 = vld [vmem:[%s4944_s30 + $0x62] sm:$0xff] }
 0x11f   : > { %v4239_v4 = vpop.f32.mrf.mxu0  ;;  %4718 = vmatmul.mubr.f32.vlgmr.msra.gmra.mxu0 %v3561_v52  ;;  %v651_v17 = vpop.f32.mrf.mxu1  ;;  %v3519_v36 = vld [vmem:[%s4944_s30 + $0x81] sm:$0xff]  ;;  %v3520_v52 = vld [vmem:[%s4944_s30 + $0x91] sm:$0xff] }
 0x120   : > { %v5918_v12 = vadd.f32 %v4239_v4, %v657_v38  ;;  %v652_v62 = vadd.f32 %v651_v17, %v5743_v21  ;;  %4720 = vmatprep.mubr.f32.mxu0 %v3562_v32  ;;  %v3567_v32 = vld [vmem:[%s4944_s30 + $0x82] sm:$0xff]  ;;  %v3568_v4 = vld [vmem:[%s4944_s30 + $0x92] sm:$0xff] }
 0x121   : > { %v925_v0 = vpop.f32.mrf.mxu0  ;;  %v4162_v18 = vpop.f32.mrf.mxu1  ;;  %4641 = vmatmul.mubr.f32.gmra.mxu1 %v3515_v1 }
 0x122   : > { %v5923_v13 = vadd.f32 %v925_v0, %v652_v62  ;;  %v667_v59 = vadd.f32 %v4162_v18, %v5757_v55  ;;  %4643 = vmatprep.mubr.f32.mxu1 %v3516_v8  ;;  %v3521_v8 = vld [vmem:[%s4944_s30 + $0x99] sm:$0xff]  ;;  %v3522_v0 = vld [vmem:[%s4944_s30 + $0xa9] sm:$0xff] }
 0x123   : > { %v4242_v39 = vpop.f32.mrf.mxu0  ;;  %4721 = vmatmul.mubr.f32.gmra.mxu0 %v3563_v6  ;;  %v661_v46 = vpop.f32.mrf.mxu1 }
 0x124   : > { %v5928_v21 = vadd.f32 %v4242_v39, %v667_v59  ;;  %v662_v14 = vadd.f32 %v661_v46, %v5766_v63  ;;  %4723 = vmatprep.mubr.f32.mxu0 %v3564_v23  ;;  %v3569_v23 = vld [vmem:[%s4944_s30 + $0x9a] sm:$0xff]  ;;  %v3570_v39 = vld [vmem:[%s4944_s30 + $0xaa] sm:$0xff] }
 0x125   : > { %v935_v3 = vpop.f32.mrf.mxu0  ;;  %v4165_v29 = vpop.f32.mrf.mxu1  ;;  %4644 = vmatmul.mubr.f32.gmra.mxu1 %v3517_v34 }
 0x126   : > { %v5933_v55 = vadd.f32 %v935_v3, %v662_v14  ;;  %v677_v19 = vadd.f32 %v4165_v29, %v5780_v28  ;;  %4646 = vmatprep.mubr.f32.mxu1 %v3518_v22  ;;  %v3523_v22 = vld [vmem:[%s4944_s30 + $0xb1] sm:$0xff]  ;;  %v3524_v3 = vld [vmem:[%s4944_s30 + $0xc1] sm:$0xff] }
 0x127   : > { %v4245_v5 = vpop.f32.mrf.mxu0  ;;  %4724 = vmatmul.mubr.f32.gmra.mxu0 %v3565_v2  ;;  %v671_v44 = vpop.f32.mrf.mxu1 }
 0x128   : > { %v5938_v63 = vadd.f32 %v4245_v5, %v677_v19  ;;  %v672_v57 = vadd.f32 %v671_v44, %v5789_v56  ;;  %4726 = vmatprep.mubr.f32.mxu0 %v3566_v15  ;;  %v3571_v15 = vld [vmem:[%s4944_s30 + $0xb2] sm:$0xff]  ;;  %v3572_v5 = vld [vmem:[%s4944_s30 + $0xc2] sm:$0xff] }
 0x129   : > { %v945_v38 = vpop.f32.mrf.mxu0  ;;  %v4168_v1 = vpop.f32.mrf.mxu1  ;;  %4647 = vmatmul.mubr.f32.gmra.mxu1 %v3519_v36 }
 0x12a   : > { %v5943_v28 = vadd.f32 %v945_v38, %v672_v57  ;;  %v687_v17 = vadd.f32 %v4168_v1, %v5803_v60  ;;  %4649 = vmatprep.mubr.f32.mxu1 %v3520_v52  ;;  %v3525_v52 = vld [vmem:[%s4944_s30 + $0xc9] sm:$0xff]  ;;  %v3526_v38 = vld [vmem:[%s4944_s30 + $0xd9] sm:$0xff] }
 0x12b   : > { %v4248_v62 = vpop.f32.mrf.mxu0  ;;  %4727 = vmatmul.mubr.f32.gmra.mxu0 %v3567_v32  ;;  %v681_v6 = vpop.f32.mrf.mxu1 }
 0x12c   : > { %v5948_v56 = vadd.f32 %v4248_v62, %v687_v17  ;;  %v682_v18 = vadd.f32 %v681_v6, %v5812_v40  ;;  %4729 = vmatprep.mubr.f32.mxu0 %v3568_v4  ;;  %v3573_v4 = vld [vmem:[%s4944_s30 + $0xca] sm:$0xff]  ;;  %v3574_v62 = vld [vmem:[%s4944_s30 + $0xda] sm:$0xff] }
 0x12d   : > { %v955_v59 = vpop.f32.mrf.mxu0  ;;  %v4171_v34 = vpop.f32.mrf.mxu1  ;;  %4650 = vmatmul.mubr.f32.gmra.mxu1 %v3521_v8 }
 0x12e   : > { %v5953_v60 = vadd.f32 %v955_v59, %v682_v18  ;;  %v697_v46 = vadd.f32 %v4171_v34, %v5826_v53  ;;  %4652 = vmatprep.mubr.f32.mxu1 %v3522_v0  ;;  %v3527_v0 = vld [vmem:[%s4944_s30 + $0xe1] sm:$0xff]  ;;  %v3528_v59 = vld [vmem:[%s4944_s30 + $0xf1] sm:$0xff] }
 0x12f   : > { %v4251_v14 = vpop.f32.mrf.mxu0  ;;  %4730 = vmatmul.mubr.f32.gmra.mxu0 %v3569_v23  ;;  %v691_v2 = vpop.f32.mrf.mxu1 }
 0x130   : > { %v5958_v40 = vadd.f32 %v4251_v14, %v697_v46  ;;  %v692_v29 = vadd.f32 %v691_v2, %v5835_v61  ;;  %4732 = vmatprep.mubr.f32.mxu0 %v3570_v39  ;;  %v3575_v39 = vld [vmem:[%s4944_s30 + $0xe2] sm:$0xff]  ;;  %v3576_v14 = vld [vmem:[%s4944_s30 + $0xf2] sm:$0xff] }
 0x131   : > { %v965_v19 = vpop.f32.mrf.mxu0  ;;  %v4174_v36 = vpop.f32.mrf.mxu1  ;;  %4653 = vmatmul.mubr.f32.gmra.mxu1 %v3523_v22 }
 0x132   : > { %v5963_v53 = vadd.f32 %v965_v19, %v692_v29  ;;  %v707_v44 = vadd.f32 %v4174_v36, %v5849_v26  ;;  %4655 = vmatprep.mubr.f32.mxu1 %v3524_v3  ;;  %v3529_v3 = vld [vmem:[%s4944_s30 + $0xf9] sm:$0xff]  ;;  %v3530_v19 = vld [vmem:[%s4944_s30 + $0x109] sm:$0xff] }
 0x133   : > { %v4254_v57 = vpop.f32.mrf.mxu0  ;;  %4733 = vmatmul.mubr.f32.gmra.mxu0 %v3571_v15  ;;  %v701_v32 = vpop.f32.mrf.mxu1 }
 0x134   : > { %v5968_v61 = vadd.f32 %v4254_v57, %v707_v44  ;;  %v702_v1 = vadd.f32 %v701_v32, %v5858_v20  ;;  %4735 = vmatprep.mubr.f32.mxu0 %v3572_v5  ;;  %v3577_v5 = vld [vmem:[%s4944_s30 + $0xfa] sm:$0xff]  ;;  %v3578_v57 = vld [vmem:[%s4944_s30 + $0x10a] sm:$0xff] }
 0x135   : > { %v975_v17 = vpop.f32.mrf.mxu0  ;;  %v4177_v8 = vpop.f32.mrf.mxu1  ;;  %4656 = vmatmul.mubr.f32.gmra.mxu1 %v3525_v52 }
 0x136   : > { %v5973_v26 = vadd.f32 %v975_v17, %v702_v1  ;;  %v717_v6 = vadd.f32 %v4177_v8, %v5872_v10  ;;  %4658 = vmatprep.mubr.f32.mxu1 %v3526_v38  ;;  %v3531_v38 = vld [vmem:[%s4944_s30 + $0x111] sm:$0xff]  ;;  %v3532_v17 = vld [vmem:[%s4944_s30 + $0x121] sm:$0xff] }
 0x137   : > { %v4257_v18 = vpop.f32.mrf.mxu0  ;;  %4736 = vmatmul.mubr.f32.gmra.mxu0 %v3573_v4  ;;  %v711_v23 = vpop.f32.mrf.mxu1 }
 0x138   : > { %v5978_v20 = vadd.f32 %v4257_v18, %v717_v6  ;;  %v712_v34 = vadd.f32 %v711_v23, %v5881_v43  ;;  %4738 = vmatprep.mubr.f32.mxu0 %v3574_v62  ;;  %v3579_v62 = vld [vmem:[%s4944_s30 + $0x112] sm:$0xff]  ;;  %v3580_v18 = vld [vmem:[%s4944_s30 + $0x122] sm:$0xff] }
 0x139   : > { %v985_v46 = vpop.f32.mrf.mxu0  ;;  %v4180_v22 = vpop.f32.mrf.mxu1  ;;  %4659 = vmatmul.mubr.f32.gmra.mxu1 %v3527_v0 }
 0x13a   : > { %v5983_v10 = vadd.f32 %v985_v46, %v712_v34  ;;  %v727_v2 = vadd.f32 %v4180_v22, %v5900_v30  ;;  %4661 = vmatprep.mubr.f32.mxu1 %v3528_v59  ;;  %v3533_v59 = vld [vmem:[%s4944_s30 + $0x129] sm:$0xff]  ;;  %v3534_v46 = vld [vmem:[%s4944_s30 + $0x139] sm:$0xff] }
 0x13b   : > { %v4260_v29 = vpop.f32.mrf.mxu0  ;;  %4739 = vmatmul.mubr.f32.gmra.mxu0 %v3575_v39  ;;  %v721_v15 = vpop.f32.mrf.mxu1 }
 0x13c   : > { %v5988_v43 = vadd.f32 %v4260_v29, %v727_v2  ;;  %v722_v36 = vadd.f32 %v721_v15, %v5909_v41  ;;  %4741 = vmatprep.mubr.f32.mxu0 %v3576_v14  ;;  %v3581_v14 = vld [vmem:[%s4944_s30 + $0x12a] sm:$0xff]  ;;  %v3582_v29 = vld [vmem:[%s4944_s30 + $0x13a] sm:$0xff] }
 0x13d   : > { %v995_v44 = vpop.f32.mrf.mxu0  ;;  %v4183_v52 = vpop.f32.mrf.mxu1  ;;  %4662 = vmatmul.mubr.f32.gmra.mxu1 %v3529_v3 }
 0x13e   : > { %v5993_v30 = vadd.f32 %v995_v44, %v722_v36  ;;  %v737_v32 = vadd.f32 %v4183_v52, %v5728_v11  ;;  %4664 = vmatprep.mubr.f32.mxu1 %v3530_v19  ;;  %v3535_v19 = vld [vmem:[%s4944_s30 + $0x141] sm:$0xff]  ;;  %v3536_v44 = vld [vmem:[%s4944_s30 + $0x151] sm:$0xff] }
 0x13f   : > { %v4263_v1 = vpop.f32.mrf.mxu0  ;;  %4742 = vmatmul.mubr.f32.gmra.mxu0 %v3577_v5  ;;  %v731_v4 = vpop.f32.mrf.mxu1 }
 0x140   : > { %v5998_v41 = vadd.f32 %v4263_v1, %v737_v32  ;;  %v732_v8 = vadd.f32 %v731_v4, %v5737_v31  ;;  %4744 = vmatprep.mubr.f32.mxu0 %v3578_v57  ;;  %v3583_v57 = vld [vmem:[%s4944_s30 + $0x142] sm:$0xff]  ;;  %v3584_v1 = vld [vmem:[%s4944_s30 + $0x152] sm:$0xff] }
 0x141   : > { %v1005_v6 = vpop.f32.mrf.mxu0  ;;  %v4186_v0 = vpop.f32.mrf.mxu1  ;;  %4665 = vmatmul.mubr.f32.gmra.mxu1 %v3531_v38 }
 0x142   : > { %v6003_v11 = vadd.f32 %v1005_v6, %v732_v8  ;;  %v747_v23 = vadd.f32 %v4186_v0, %v5750_v42  ;;  %4667 = vmatprep.mubr.f32.mxu1 %v3532_v17  ;;  %v3537_v17 = vld [vmem:[%s4944_s30 + $0x159] sm:$0xff]  ;;  %v3538_v6 = vld [vmem:[%s4944_s30 + $0x169] sm:$0xff] }
 0x143   : > { %v4266_v34 = vpop.f32.mrf.mxu0  ;;  %4745 = vmatmul.mubr.f32.gmra.mxu0 %v3579_v62  ;;  %v741_v39 = vpop.f32.mrf.mxu1 }
 0x144   : > { %v6008_v31 = vadd.f32 %v4266_v34, %v747_v23  ;;  %v742_v22 = vadd.f32 %v741_v39, %v5759_v48  ;;  %4747 = vmatprep.mubr.f32.mxu0 %v3580_v18  ;;  %v3585_v18 = vld [vmem:[%s4944_s30 + $0x15a] sm:$0xff]  ;;  %v3586_v34 = vld [vmem:[%s4944_s30 + $0x16a] sm:$0xff] }
 0x145   : > { %v1015_v2 = vpop.f32.mrf.mxu0  ;;  %v4189_v3 = vpop.f32.mrf.mxu1  ;;  %4668 = vmatmul.mubr.f32.gmra.mxu1 %v3533_v59 }
 0x146   : > { %v6013_v42 = vadd.f32 %v1015_v2, %v742_v22  ;;  %v757_v15 = vadd.f32 %v4189_v3, %v5773_v27  ;;  %4670 = vmatprep.mubr.f32.mxu1 %v3534_v46  ;;  %v3539_v46 = vld [vmem:[%s4944_s30 + $0x171] sm:$0xff] }
 0x147   : > { %v4269_v36 = vpop.f32.mrf.mxu0  ;;  %4748 = vmatmul.mubr.f32.gmra.mxu0 %v3581_v14  ;;  %v751_v5 = vpop.f32.mrf.mxu1  ;;  %v3587_v3 = vld [vmem:[%s4944_s30 + $0x172] sm:$0xff] }
 0x148   : > { %v6018_v48 = vadd.f32 %v4269_v36, %v757_v15  ;;  %v752_v52 = vadd.f32 %v751_v5, %v5782_v33  ;;  %4750 = vmatprep.mubr.f32.mxu0 %v3582_v29 }
 0x149   : > { %v1025_v32 = vpop.f32.mrf.mxu0  ;;  %v4192_v38 = vpop.f32.mrf.mxu1  ;;  %4671 = vmatmul.mubr.f32.gmra.mxu1 %v3535_v19 }
 0x14a   : > { %v6023_v27 = vadd.f32 %v1025_v32, %v752_v52  ;;  %v767_v4 = vadd.f32 %v4192_v38, %v5796_v49  ;;  %4673 = vmatprep.mubr.f32.mxu1 %v3536_v44  ;;  %v3542_v44 = vld [vmem:[%s4944_s30 + $0x199] sm:$0xff] }
 0x14b   : > { %v4272_v8 = vpop.f32.mrf.mxu0  ;;  %4751 = vmatmul.mubr.f32.gmra.mxu0 %v3583_v57  ;;  %v761_v62 = vpop.f32.mrf.mxu1  ;;  %v3590_v38 = vld [vmem:[%s4944_s30 + $0x19a] sm:$0xff] }
 0x14c   : > { %v6028_v33 = vadd.f32 %v4272_v8, %v767_v4  ;;  %v762_v0 = vadd.f32 %v761_v62, %v5805_v24  ;;  %4753 = vmatprep.mubr.f32.mxu0 %v3584_v1  ;;  %v3543_v1 = vld [vmem:[%s4944_s30 + $0x1a1] sm:$0xff] }
 0x14d   : > { %v1035_v23 = vpop.f32.mrf.mxu0  ;;  %v4195_v59 = vpop.f32.mrf.mxu1  ;;  %4674 = vmatmul.mubr.f32.gmra.mxu1 %v3537_v17 }
 0x14e   : > { %v6033_v39 = vadd.f32 %v1035_v23, %v762_v0  ;;  %v777_v49 = vadd.f32 %v4195_v59, %v5819_v51  ;;  %4676 = vmatprep.mubr.f32.mxu1 %v3538_v6 }
 0x14f   : > { %v4275_v22 = vpop.f32.mrf.mxu0  ;;  %4754 = vmatmul.mubr.f32.gmra.mxu0 %v3585_v18  ;;  %v771_v14 = vpop.f32.mrf.mxu1 }
 0x150   : > { %v6037_v2 = vadd.f32 %v4275_v22, %v777_v49  ;;  %v772_v24 = vadd.f32 %v771_v14, %v5828_v9  ;;  %4756 = vmatprep.mubr.f32.mxu0 %v3586_v34 }
 0x151   : > { %v1045_v29 = vpop.f32.mrf.mxu0  ;;  %v4198_v15 = vpop.f32.mrf.mxu1  ;;  %4677 = vmatmul.mubr.f32.gmra.mxu1 %v3539_v46 }
 0x152   : > { %v6041_v19 = vadd.f32 %v1045_v29, %v772_v24  ;;  %v787_v51 = vadd.f32 %v4198_v15, %v5842_v16  ;;  %4679 = vmatprep.mubr.f32.mxu1 %v5664_v54 }
 0x153   : > { %v4278_v36 = vpop.f32.mrf.mxu0  ;;  %4757 = vmatmul.mubr.f32.gmra.mxu0 %v3587_v3  ;;  %v781_v5 = vpop.f32.mrf.mxu1 }
 0x154   : > { %v6046_v52 = vadd.f32 %v4278_v36, %v787_v51  ;;  %v782_v9 = vadd.f32 %v781_v5, %v5851_v37  ;;  %4759 = vmatprep.mubr.f32.mxu0 %v5884_v45  ;;  %v3591_v45 = vld [vmem:[%s4944_s30 + $0x1a2] sm:$0xff] }
 0x155   : > { %v1055_v57 = vpop.f32.mrf.mxu0  ;;  %v4201_v32 = vpop.f32.mrf.mxu1  ;;  %4680 = vmatmul.mubr.f32.gmra.mxu1 %v5671_v25 }
 0x156   : > { %v6052_v16 = vadd.f32 %v1055_v57, %v782_v9  ;;  %v797_v54 = vadd.f32 %v4201_v32, %v5865_v47  ;;  %4682 = vmatprep.mubr.f32.mxu1 %v3542_v44 }
 0x157   : > { %v4281_v4 = vpop.f32.mrf.mxu0  ;;  %4760 = vmatmul.mubr.f32.gmra.mxu0 %v5888_v58  ;;  %v791_v17 = vpop.f32.mrf.mxu1 }
 0x158   : > { %v6057_v8 = vadd.f32 %v4281_v4, %v797_v54  ;;  %v792_v37 = vadd.f32 %v791_v17, %v5874_v50  ;;  %4762 = vmatprep.mubr.f32.mxu0 %v3590_v38 }
 0x159   : > { %v1065_v62 = vpop.f32.mrf.mxu0  ;;  %v4204_v6 = vpop.f32.mrf.mxu1  ;;  %4683 = vmatmul.mubr.f32.gmra.mxu1 %v3543_v1 }
 0x15a   : > { %v6061_v25 = vadd.f32 %v1065_v62, %v792_v37  ;;  %v807_v0 = vadd.f32 %v4204_v6, %v5891_v7 }
 0x15b   : > { %v4284_v47 = vpop.f32.mrf.mxu0  ;;  %4763 = vmatmul.mubr.f32.gmra.mxu0 %v3591_v45  ;;  %v801_v18 = vpop.f32.mrf.mxu1 }
 0x15c   : > { %v6064_v23 = vadd.f32 %v4284_v47, %v807_v0  ;;  %v802_v58 = vadd.f32 %v801_v18, %v5902_v35 }
 0x15d   : > { %v1075_v59 = vpop.f32.mrf.mxu0  ;;  %v4319_v34 = vpop.f32.mrf.mxu1 }
 0x15e   : > { %v6067_v49 = vadd.f32 %v1075_v59, %v802_v58  ;;  %v1392_v50 = vadd.f32 %v4319_v34, %v5918_v12 }
 0x15f   : > { %v4399_v46 = vpop.f32.mrf.mxu0  ;;  %v1232_v22 = vpop.f32.mrf.mxu1 }
 0x160   : > { %v6070_v14 = vadd.f32 %v4399_v46, %v1392_v50  ;;  %v1391_v24 = vadd.f32 %v1232_v22, %v5923_v13 }
 0x161   : > { %v1538_v7 = vpop.f32.mrf.mxu0  ;;  %v4322_v3 = vpop.f32.mrf.mxu1 }
 0x162   : > { %v6073_v29 = vadd.f32 %v1538_v7, %v1391_v24  ;;  %v1394_v15 = vadd.f32 %v4322_v3, %v5928_v21 }
 0x163   : > { %v4402_v51 = vpop.f32.mrf.mxu0  ;;  %v1242_v35 = vpop.f32.mrf.mxu1 }
 0x164   : > { %v6076_v36 = vadd.f32 %v4402_v51, %v1394_v15  ;;  %v1393_v5 = vadd.f32 %v1242_v35, %v5933_v55 }
 0x165   : > { %v1548_v44 = vpop.f32.mrf.mxu0  ;;  %v4325_v12 = vpop.f32.mrf.mxu1 }
 0x166   : > { %v6079_v9 = vadd.f32 %v1548_v44, %v1393_v5  ;;  %v1396_v57 = vadd.f32 %v4325_v12, %v5938_v63 }
 0x167   : > { %v4405_v32 = vpop.f32.mrf.mxu0  ;;  %v1252_v13 = vpop.f32.mrf.mxu1 }
 0x168   : > { %v6082_v38 = vadd.f32 %v4405_v32, %v1396_v57  ;;  %v1395_v54 = vadd.f32 %v1252_v13, %v5943_v28 }
 0x169   : > { %v1558_v1 = vpop.f32.mrf.mxu0  ;;  %v4328_v21 = vpop.f32.mrf.mxu1 }
 0x16a   : > { %v6085_v4 = vadd.f32 %v1558_v1, %v1395_v54  ;;  %v1398_v17 = vadd.f32 %v4328_v21, %v5948_v56 }
 0x16b   : > { %v4408_v37 = vpop.f32.mrf.mxu0  ;;  %v1262_v55 = vpop.f32.mrf.mxu1 }
 0x16c   : > { %v6088_v45 = vadd.f32 %v4408_v37, %v1398_v17  ;;  %v1397_v62 = vadd.f32 %v1262_v55, %v5953_v60 }
 0x16d   : > { %v1568_v6 = vpop.f32.mrf.mxu0  ;;  %v4331_v63 = vpop.f32.mrf.mxu1 }
 0x16e   : > { %v6091_v0 = vadd.f32 %v1568_v6, %v1397_v62  ;;  %v1400_v47 = vadd.f32 %v4331_v63, %v5958_v40 }
 0x16f   : > { %v4411_v18 = vpop.f32.mrf.mxu0  ;;  %v1272_v28 = vpop.f32.mrf.mxu1 }
 0x170   : > { %v6094_v58 = vadd.f32 %v4411_v18, %v1400_v47  ;;  %v1399_v59 = vadd.f32 %v1272_v28, %v5963_v53 }
 0x171   : > { %v1578_v34 = vpop.f32.mrf.mxu0  ;;  %v4334_v56 = vpop.f32.mrf.mxu1 }
 0x172   : > { %v6097_v50 = vadd.f32 %v1578_v34, %v1399_v59  ;;  %v1402_v46 = vadd.f32 %v4334_v56, %v5968_v61 }
 0x173   : > { %v4414_v22 = vpop.f32.mrf.mxu0  ;;  %v1282_v60 = vpop.f32.mrf.mxu1 }
 0x174   : > { %v6100_v24 = vadd.f32 %v4414_v22, %v1402_v46  ;;  %v1401_v7 = vadd.f32 %v1282_v60, %v5973_v26 }
 0x175   : > { %v1588_v3 = vpop.f32.mrf.mxu0  ;;  %v4337_v40 = vpop.f32.mrf.mxu1 }
 0x176   : > { %v6103_v15 = vadd.f32 %v1588_v3, %v1401_v7  ;;  %v1404_v51 = vadd.f32 %v4337_v40, %v5978_v20 }
 0x177   : > { %v4417_v35 = vpop.f32.mrf.mxu0  ;;  %v1292_v53 = vpop.f32.mrf.mxu1 }
 0x178   : > { %v6106_v5 = vadd.f32 %v4417_v35, %v1404_v51  ;;  %v1403_v44 = vadd.f32 %v1292_v53, %v5983_v10 }
 0x179   : > { %v1598_v12 = vpop.f32.mrf.mxu0  ;;  %v4340_v61 = vpop.f32.mrf.mxu1 }
 0x17a   : > { %v6109_v57 = vadd.f32 %v1598_v12, %v1403_v44  ;;  %v1406_v32 = vadd.f32 %v4340_v61, %v5988_v43 }
 0x17b   : > { %v4420_v13 = vpop.f32.mrf.mxu0  ;;  %v1302_v26 = vpop.f32.mrf.mxu1 }
 0x17c   : > { %v6112_v54 = vadd.f32 %v4420_v13, %v1406_v32  ;;  %v1405_v1 = vadd.f32 %v1302_v26, %v5993_v30 }
 0x17d   : > { %v1608_v21 = vpop.f32.mrf.mxu0  ;;  %v4343_v20 = vpop.f32.mrf.mxu1 }
 0x17e   : > { %v6115_v17 = vadd.f32 %v1608_v21, %v1405_v1  ;;  %v1408_v37 = vadd.f32 %v4343_v20, %v5998_v41 }
 0x17f   : > { %v4423_v55 = vpop.f32.mrf.mxu0  ;;  %v1312_v10 = vpop.f32.mrf.mxu1 }
 0x180   : > { %v6118_v62 = vadd.f32 %v4423_v55, %v1408_v37  ;;  %v1407_v6 = vadd.f32 %v1312_v10, %v6003_v11 }
 0x181   : > { %v1618_v63 = vpop.f32.mrf.mxu0  ;;  %v4346_v43 = vpop.f32.mrf.mxu1 }
 0x182   : > { %v6121_v47 = vadd.f32 %v1618_v63, %v1407_v6  ;;  %v1410_v18 = vadd.f32 %v4346_v43, %v6008_v31 }
 0x183   : > { %v4426_v28 = vpop.f32.mrf.mxu0  ;;  %v1322_v30 = vpop.f32.mrf.mxu1 }
 0x184   : > { %v6124_v59 = vadd.f32 %v4426_v28, %v1410_v18  ;;  %v1409_v34 = vadd.f32 %v1322_v30, %v6013_v42 }
 0x185   : > { %v1628_v56 = vpop.f32.mrf.mxu0  ;;  %v4349_v41 = vpop.f32.mrf.mxu1 }
 0x186   : > { %6623 = vst [vmem:[#allocation2_spill] sm:$0xff] %v6124_v59  ;;  %v6127_v46 = vadd.f32 %v1628_v56, %v1409_v34  ;;  %v1412_v22 = vadd.f32 %v4349_v41, %v6018_v48 }
 0x187   : > { %v4429_v60 = vpop.f32.mrf.mxu0  ;;  %v1332_v11 = vpop.f32.mrf.mxu1 }
 0x188   : > { %6624 = vst [vmem:[#allocation3_spill] sm:$0xff] %v6127_v46  ;;  %v6130_v7 = vadd.f32 %v4429_v60, %v1412_v22  ;;  %v1411_v3 = vadd.f32 %v1332_v11, %v6023_v27 }
 0x189   : > { %v1638_v40 = vpop.f32.mrf.mxu0  ;;  %v4352_v31 = vpop.f32.mrf.mxu1 }
 0x18a   : > { %6625 = vst [vmem:[#allocation4_spill] sm:$0xff] %v6130_v7  ;;  %v6133_v51 = vadd.f32 %v1638_v40, %v1411_v3  ;;  %v1414_v35 = vadd.f32 %v4352_v31, %v6028_v33 }
 0x18b   : > { %v4432_v53 = vpop.f32.mrf.mxu0  ;;  %v1342_v42 = vpop.f32.mrf.mxu1 }
 0x18c   : > { %6626 = vst [vmem:[#allocation5_spill] sm:$0xff] %v6133_v51  ;;  %v6136_v44 = vadd.f32 %v4432_v53, %v1414_v35  ;;  %v1413_v12 = vadd.f32 %v1342_v42, %v6033_v39 }
 0x18d   : > { %v1648_v61 = vpop.f32.mrf.mxu0  ;;  %v4355_v48 = vpop.f32.mrf.mxu1 }
 0x18e   : > { %6627 = vst [vmem:[#allocation6_spill] sm:$0xff] %v6136_v44  ;;  %v6139_v32 = vadd.f32 %v1648_v61, %v1413_v12  ;;  %v1416_v13 = vadd.f32 %v4355_v48, %v6037_v2 }
 0x18f   : > { %v4435_v26 = vpop.f32.mrf.mxu0  ;;  %v1352_v27 = vpop.f32.mrf.mxu1 }
 0x190   : > { %6628 = vst [vmem:[#allocation7_spill] sm:$0xff] %v6139_v32  ;;  %v6142_v1 = vadd.f32 %v4435_v26, %v1416_v13  ;;  %v1415_v21 = vadd.f32 %v1352_v27, %v6041_v19 }
 0x191   : > { %v1658_v20 = vpop.f32.mrf.mxu0  ;;  %v4358_v33 = vpop.f32.mrf.mxu1 }
 0x192   : > { %6629 = vst [vmem:[#allocation8_spill] sm:$0xff] %v6142_v1  ;;  %v6145_v37 = vadd.f32 %v1658_v20, %v1415_v21  ;;  %v1418_v55 = vadd.f32 %v4358_v33, %v6046_v52 }
 0x193   : > { %v4438_v10 = vpop.f32.mrf.mxu0  ;;  %v1362_v39 = vpop.f32.mrf.mxu1 }
 0x194   : > { %6630 = vst [vmem:[#allocation9_spill] sm:$0xff] %v6145_v37  ;;  %v6148_v6 = vadd.f32 %v4438_v10, %v1418_v55  ;;  %v1417_v63 = vadd.f32 %v1362_v39, %v6052_v16 }
 0x195   : > { %v1668_v43 = vpop.f32.mrf.mxu0  ;;  %v4361_v2 = vpop.f32.mrf.mxu1 }
 0x196   : > { %6631 = vst [vmem:[#allocation10_spill] sm:$0xff] %v6148_v6  ;;  %v6151_v18 = vadd.f32 %v1668_v43, %v1417_v63  ;;  %v1420_v28 = vadd.f32 %v4361_v2, %v6057_v8 }
 0x197   : > { %v4441_v30 = vpop.f32.mrf.mxu0  ;;  %v1372_v19 = vpop.f32.mrf.mxu1 }
 0x198   : > { %6632 = vst [vmem:[#allocation11_spill] sm:$0xff] %v6151_v18  ;;  %v6154_v34 = vadd.f32 %v4441_v30, %v1420_v28  ;;  %v1419_v56 = vadd.f32 %v1372_v19, %v6061_v25 }
 0x199   : > { %v1678_v41 = vpop.f32.mrf.mxu0  ;;  %v4364_v52 = vpop.f32.mrf.mxu1 }
 0x19a   : > { %6633 = vst [vmem:[#allocation12_spill] sm:$0xff] %v6154_v34  ;;  %v6157_v22 = vadd.f32 %v1678_v41, %v1419_v56  ;;  %v1422_v60 = vadd.f32 %v4364_v52, %v6064_v23 }
 0x19b   : > { %v4444_v11 = vpop.f32.mrf.mxu0  ;;  %v1382_v16 = vpop.f32.mrf.mxu1 }
 0x19c   : > { %6634 = vst [vmem:[#allocation13_spill] sm:$0xff] %v6157_v22  ;;  %v6160_v3 = vadd.f32 %v4444_v11, %v1422_v60  ;;  %v1421_v40 = vadd.f32 %v1382_v16, %v6067_v49 }
 0x19d   : > { %v1688_v31 = vpop.f32.mrf.mxu0  ;;  %v4479_v8 = vpop.f32.mrf.mxu1 }
 0x19e   : > { %6635 = vst [vmem:[#allocation14_spill] sm:$0xff] %v6160_v3  ;;  %v6163_v35 = vadd.f32 %v1688_v31, %v1421_v40 }
 0x19f   : > { %v6165_v53 = vpop.f32.mrf.mxu0  ;;  %v1844_v42 = vpop.f32.mrf.mxu1 }
 0x1a0   : > { %6636 = vst [vmem:[#allocation15_spill] sm:$0xff] %v6163_v35 }
 0x1a1   : > { %v6167_v25 = vpop.f32.mrf.mxu0  ;;  %v4482_v12 = vpop.f32.mrf.mxu1 }
 0x1a3   : > { %v6169_v61 = vpop.f32.mrf.mxu0  ;;  %v1854_v48 = vpop.f32.mrf.mxu1 }
 0x1a5   : > { %v6171_v23 = vpop.f32.mrf.mxu0  ;;  %v4485_v13 = vpop.f32.mrf.mxu1 }
 0x1a7   : > { %v6173_v26 = vpop.f32.mrf.mxu0  ;;  %v1864_v27 = vpop.f32.mrf.mxu1 }
 0x1a9   : > { %v6175_v49 = vpop.f32.mrf.mxu0  ;;  %v4488_v21 = vpop.f32.mrf.mxu1 }
 0x1ab   : > { %v6177_v20 = vpop.f32.mrf.mxu0  ;;  %v1874_v33 = vpop.f32.mrf.mxu1 }
 0x1ad   : > { %v6179_v55 = vpop.f32.mrf.mxu0  ;;  %v4491_v10 = vpop.f32.mrf.mxu1 }
 0x1af   : > { %v6181_v39 = vpop.f32.mrf.mxu0  ;;  %v1884_v63 = vpop.f32.mrf.mxu1 }
 0x1b1   : > { %v6183_v43 = vpop.f32.mrf.mxu0  ;;  %v4494_v2 = vpop.f32.mrf.mxu1 }
 0x1b3   : > { %v6185_v28 = vpop.f32.mrf.mxu0  ;;  %v1894_v30 = vpop.f32.mrf.mxu1 }
 0x1b5   : > { %v6187_v19 = vpop.f32.mrf.mxu0  ;;  %v4497_v56 = vpop.f32.mrf.mxu1 }
 0x1b7   : > { %v6189_v41 = vpop.f32.mrf.mxu0  ;;  %v1904_v52 = vpop.f32.mrf.mxu1 }
 0x1b9   : > { %v6191_v60 = vpop.f32.mrf.mxu0  ;;  %v4500_v11 = vpop.f32.mrf.mxu1 }
 0x1bb   : > { %v6193_v16 = vpop.f32.mrf.mxu0  ;;  %v6195_v40 = vpop.f32.mrf.mxu1 }
 0x1bd   : > { %v6197_v31 = vpop.f32.mrf.mxu0  ;;  %v6199_v35 = vpop.f32.mrf.mxu1 }
 0x1bf   : > { %v6201_v3 = vpop.f32.mrf.mxu0  ;;  %v6203_v22 = vpop.f32.mrf.mxu1 }
 0x1c1   : > { %v6205_v34 = vpop.f32.mrf.mxu0  ;;  %v6207_v18 = vpop.f32.mrf.mxu1 }
 0x1c2   : > { %6637 = vst [vmem:[#allocation16_spill] sm:$0xff] %v6205_v34  ;;  %6638 = vst [vmem:[#allocation17_spill] sm:$0xff] %v6207_v18 }
 0x1c3   : > { %v6209_v6 = vpop.f32.mrf.mxu0  ;;  %v6211_v37 = vpop.f32.mrf.mxu1 }
 0x1c4   : > { %6639 = vst [vmem:[#allocation18_spill] sm:$0xff] %v6209_v6  ;;  %6640 = vst [vmem:[#allocation19_spill] sm:$0xff] %v6211_v37 }
 0x1c5   : > { %v6213_v1 = vpop.f32.mrf.mxu0  ;;  %v6215_v32 = vpop.f32.mrf.mxu1 }
 0x1c6   : > { %6641 = vst [vmem:[#allocation20_spill] sm:$0xff] %v6213_v1  ;;  %6642 = vst [vmem:[#allocation21_spill] sm:$0xff] %v6215_v32 }
 0x1c7   : > { %v6217_v44 = vpop.f32.mrf.mxu0  ;;  %v6219_v51 = vpop.f32.mrf.mxu1 }
 0x1c8   : > { %6643 = vst [vmem:[#allocation22_spill] sm:$0xff] %v6217_v44  ;;  %6644 = vst [vmem:[#allocation23_spill] sm:$0xff] %v6219_v51 }
 0x1c9   : > { %v6221_v7 = vpop.f32.mrf.mxu0  ;;  %v6223_v46 = vpop.f32.mrf.mxu1 }
 0x1ca   : > { %6645 = vst [vmem:[#allocation24_spill] sm:$0xff] %v6221_v7  ;;  %6646 = vst [vmem:[#allocation25_spill] sm:$0xff] %v6223_v46 }
 0x1cb   : > { %v6225_v59 = vpop.f32.mrf.mxu0  ;;  %v6227_v34 = vpop.f32.mrf.mxu1 }
 0x1cc   : > { %6647 = vst [vmem:[#allocation26_spill] sm:$0xff] %v6225_v59  ;;  %6648 = vst [vmem:[#allocation27_spill] sm:$0xff] %v6227_v34 }
 0x1cd   : > { %v6229_v18 = vpop.f32.mrf.mxu0  ;;  %v6231_v6 = vpop.f32.mrf.mxu1 }
 0x1ce   : > { %6649 = vst [vmem:[#allocation28_spill] sm:$0xff] %v6229_v18  ;;  %6650 = vst [vmem:[#allocation29_spill] sm:$0xff] %v6231_v6 }
 0x1cf   : > { %v6233_v37 = vpop.f32.mrf.mxu0  ;;  %v6235_v1 = vpop.f32.mrf.mxu1 }
 0x1d0   : > { %6651 = vst [vmem:[#allocation30_spill] sm:$0xff] %v6233_v37  ;;  %6652 = vst [vmem:[#allocation31_spill] sm:$0xff] %v6235_v1  ;;  %v2004_v37 = vadd.f32 %v4479_v8, %v6070_v14  ;;  %v2003_v1 = vadd.f32 %v1844_v42, %v6073_v29 }
 0x1d1   : > { %v6237_v32 = vpop.f32.mrf.mxu0  ;;  %v6239_v44 = vpop.f32.mrf.mxu1 }
 0x1d2   : > { %6653 = vst [vmem:[#allocation32_spill] sm:$0xff] %v6237_v32  ;;  %6654 = vst [vmem:[#allocation33_spill] sm:$0xff] %v6239_v44  ;;  %v2006_v32 = vadd.f32 %v4482_v12, %v6076_v36  ;;  %v2005_v44 = vadd.f32 %v1854_v48, %v6079_v9  ;;  %v2311_v14 = vadd.f32 %v6165_v53, %v2004_v37  ;;  %v6290_v53 = vld [vmem:[%s6530_s2] ss:$0 sm:$0xff] }
 0x1d3   : > { %v6241_v51 = vpop.f32.mrf.mxu0  ;;  %v6243_v7 = vpop.f32.mrf.mxu1  ;;  %v2310_v29 = vadd.f32 %v6167_v25, %v2003_v1  ;;  %v2009_v36 = vadd.f32 %v1874_v33, %v6091_v0  ;;  %v2012_v9 = vadd.f32 %v4491_v10, %v6094_v58  ;;  %v2014_v0 = vadd.f32 %v4494_v2, %v6100_v24 }
 0x1d4   : > { %6655 = vst [vmem:[#allocation34_spill] sm:$0xff] %v6241_v51  ;;  %6656 = vst [vmem:[#allocation35_spill] sm:$0xff] %v6243_v7  ;;  %v2008_v51 = vadd.f32 %v4485_v13, %v6082_v38  ;;  %v2313_v38 = vadd.f32 %v6169_v61, %v2006_v32  ;;  %v2312_v8 = vadd.f32 %v6171_v23, %v2005_v44  ;;  %v6310_v23 = vld [vmem:[%s6531_s3] ss:$0 sm:$0xff] }
 0x1d5   : > { %v6245_v46 = vpop.f32.mrf.mxu0  ;;  %v6247_v59 = vpop.f32.mrf.mxu1  ;;  %v2013_v58 = vadd.f32 %v1894_v30, %v6103_v15  ;;  %v2016_v32 = vadd.f32 %v4497_v56, %v6106_v5  ;;  %v2015_v44 = vadd.f32 %v1904_v52, %v6109_v57  ;;  %v6296_v24 = vadd.f32 %v6181_v39, %v2012_v9  ;;  %v6663_v56 = vld [vmem:[#allocation17_spill] sm:$0xff] }
 0x1d6   : > { %6657 = vst [vmem:[#allocation36_spill] sm:$0xff] %v6245_v46  ;;  %6658 = vst [vmem:[#allocation37_spill] sm:$0xff] %v6247_v59  ;;  %v2007_v46 = vadd.f32 %v1864_v27, %v6085_v4  ;;  %v2315_v4 = vadd.f32 %v6173_v26, %v2008_v51  ;;  %v2018_v51 = vadd.f32 %v4500_v11, %v6112_v54 }
 0x1d7   : > { %v6249_v34 = vpop.f32.mrf.mxu0  ;;  %v6251_v18 = vpop.f32.mrf.mxu1  ;;  %v2017_v57 = vadd.f32 %v6195_v40, %v6115_v17  ;;  %v2020_v54 = vadd.f32 %v6199_v35, %v6118_v62  ;;  %v2019_v61 = vadd.f32 %v6203_v22, %v6121_v47  ;;  %v6313_v27 = vadd.f32 %v6185_v28, %v2014_v0  ;;  %v6661_v28 = vld [vmem:[#allocation16_spill] sm:$0xff]  ;;  %v6664_v40 = vld [vmem:[#allocation3_spill] sm:$0xff] }
 0x1d8   : > { %6659 = vst [vmem:[#allocation38_spill] sm:$0xff] %v6249_v34  ;;  %6660 = vst [vmem:[#allocation39_spill] sm:$0xff] %v6251_v18  ;;  %v2010_v34 = vadd.f32 %v4488_v21, %v6088_v45  ;;  %v2011_v45 = vadd.f32 %v1884_v63, %v6097_v50  ;;  %v2314_v48 = vadd.f32 %v6175_v49, %v2007_v46 }
 0x1d9   : > { %v6258_v6 = vpop.f32.mrf.mxu0  ;;  %v6260_v7 = vpop.f32.mrf.mxu1  ;;  %v6320_v62 = vadd.f32 %v6189_v41, %v2016_v32  ;;  %v6323_v47 = vadd.f32 %v6191_v60, %v2015_v44  ;;  %v6326_v22 = vadd.f32 %v6193_v16, %v2018_v51  ;;  %v6335_v2 = vadd.f32 %v6201_v3, %v2020_v54  ;;  %v6668_v32 = vld [vmem:[#allocation18_spill] sm:$0xff] }
 0x1da   : > { %v6280_v37 = vadd.f32 %v6177_v20, %v2010_v34  ;;  %v6293_v34 = vadd.f32 %v6179_v55, %v2009_v36  ;;  %v6299_v5 = vadd.f32 %v6183_v43, %v2011_v45  ;;  %v6317_v20 = vadd.f32 %v6187_v19, %v2013_v58  ;;  %v6662_v19 = vld [vmem:[#allocation2_spill] sm:$0xff]  ;;  %v6667_v36 = vld [vmem:[#allocation21_spill] sm:$0xff] }
 0x1db   : > { %v6264_v59 = vpop.f32.mrf.mxu0  ;;  %v6266_v18 = vpop.f32.mrf.mxu1  ;;  %v6332_v43 = vadd.f32 %v6197_v31, %v2017_v57  ;;  %v6338_v30 = vadd.f32 %v6661_v28, %v2019_v61  ;;  %v2022_v41 = vadd.f32 %v6663_v56, %v6662_v19  ;;  %v6665_v31 = vld [vmem:[#allocation19_spill] sm:$0xff]  ;;  %v6669_v61 = vld [vmem:[#allocation20_spill] sm:$0xff] }
 0x1dd   : > { %v6276_v42 = vpop.f32.mrf.mxu0  ;;  %v4639_v12 = vpop.f32.mrf.mxu1  ;;  %v6355_v44 = vadd.f32 %v6668_v32, %v2022_v41  ;;  %v6671_v41 = vld [vmem:[#allocation5_spill] sm:$0xff] }
 0x1de   : > { %v2617_v1 = vadd.f32 %v4639_v12, %v2311_v14  ;;  %v2021_v14 = vadd.f32 %v6665_v31, %v6664_v40 }
 0x1df   : > { %v4719_v50 = vpop.f32.mrf.mxu0  ;;  %v2457_v46 = vpop.f32.mrf.mxu1 }
 0x1e0   : > { %v2923_v15 = vadd.f32 %v4719_v50, %v2617_v1  ;;  %v2616_v25 = vadd.f32 %v2457_v46, %v2310_v29  ;;  %v6666_v29 = vld [vmem:[#allocation4_spill] sm:$0xff] }
 0x1e1   : > { %v2763_v13 = vpop.f32.mrf.mxu0  ;;  %v4642_v26 = vpop.f32.mrf.mxu1  ;;  %v2024_v9 = vadd.f32 %v6667_v36, %v6666_v29 }
 0x1e2   : > { %v2962_v49 = vmul.f32 %v6290_v53, %v2923_v15  ;;  %v2922_v21 = vadd.f32 %v2763_v13, %v2616_v25  ;;  %v2619_v17 = vadd.f32 %v4642_v26, %v2313_v38  ;;  %v6361_v13 = vadd.f32 %v6669_v61, %v2021_v14 }
 0x1e3   : > { %v4722_v35 = vpop.f32.mrf.mxu0  ;;  %v2467_v33 = vpop.f32.mrf.mxu1 }
 0x1e4   : > { %v3001_v55 = vadd.f32 %v6310_v23, %v2962_v49  ;;  %v2961_v10 = vmul.f32 %v6290_v53, %v2922_v21  ;;  %v2925_v39 = vadd.f32 %v4722_v35, %v2619_v17  ;;  %v2618_v63 = vadd.f32 %v2467_v33, %v2312_v8 }
 0x1e5   : > { %v2773_v52 = vpop.f32.mrf.mxu0  ;;  %v4645_v60 = vpop.f32.mrf.mxu1 }
 0x1e6   : > { %vm3033_vm0 = vcmp.gt.f32.partialorder %v3001_v55, 0.0  ;;  %v3065_v11 = vmul.f32 0.1, %v3001_v55  ;;  %v3000_v16 = vadd.f32 %v6310_v23, %v2961_v10  ;;  %v2964_v3 = vmul.f32 %v6290_v53, %v2925_v39 }
 0x1e7   : > { %v2924_v38 = vadd.f32 %v2773_v52, %v2618_v63  ;;  %v2621_v8 = vadd.f32 %v4645_v60, %v2315_v4  ;;  %v4725_v45 = vpop.f32.mrf.mxu0  ;;  %v2477_v12 = vpop.f32.mrf.mxu1  ;;  %v6672_v52 = vld [vmem:[#allocation23_spill] sm:$0xff] }
 0x1e8   : > { %v3097_v0 = vsel %vm3033_vm0, %v3001_v55, %v3065_v11  ;;  %vm3032_vm1 = vcmp.gt.f32.partialorder %v3000_v16, 0.0  ;;  %v3064_v1 = vmul.f32 0.1, %v3000_v16  ;;  %v3003_v58 = vadd.f32 %v6310_v23, %v2964_v3 }
 0x1e9   : > { %3129 = vst [vmem:[%s6345_s20 + $0x8] sm:$0xff] %v3097_v0  ;;  %v2963_v51 = vmul.f32 %v6290_v53, %v2924_v38  ;;  %v2927_v50 = vadd.f32 %v4725_v45, %v2621_v8  ;;  %v2620_v46 = vadd.f32 %v2477_v12, %v2314_v48  ;;  %v2783_v15 = vpop.f32.mrf.mxu0  ;;  %v4648_v25 = vpop.f32.mrf.mxu1  ;;  %v6670_v48 = vld [vmem:[#allocation22_spill] sm:$0xff]  ;;  %v2023_v60 = vadd.f32 %v6672_v52, %v6671_v41  ;;  %v6674_v12 = vld [vmem:[#allocation25_spill] sm:$0xff] }
 0x1ea   : > { %v3096_v4 = vsel %vm3032_vm1, %v3000_v16, %v3064_v1  ;;  %vm3035_vm2 = vcmp.gt.f32.partialorder %v3003_v58, 0.0  ;;  %v3067_v57 = vmul.f32 0.1, %v3003_v58  ;;  %v2623_v54 = vadd.f32 %v4648_v25, %v6280_v37  ;;  %v6673_v45 = vld [vmem:[#allocation6_spill] sm:$0xff]  ;;  %v6676_v25 = vld [vmem:[#allocation27_spill] sm:$0xff] }
 0x1eb   : > { %3128 = vst [vmem:[%s6345_s20] sm:$0xff] %v3096_v4  ;;  %v3002_v26 = vadd.f32 %v6310_v23, %v2963_v51  ;;  %v2966_v49 = vmul.f32 %v6290_v53, %v2927_v50  ;;  %v2926_v21 = vadd.f32 %v2783_v15, %v2620_v46  ;;  %v4728_v17 = vpop.f32.mrf.mxu0  ;;  %v2487_v35 = vpop.f32.mrf.mxu1  ;;  %v6367_v33 = vadd.f32 %v6670_v48, %v2024_v9  ;;  %v6675_v15 = vld [vmem:[#allocation7_spill] sm:$0xff] }
 0x1ec   : > { %v3099_v55 = vsel %vm3035_vm2, %v3003_v58, %v3067_v57  ;;  %v2929_v10 = vadd.f32 %v4728_v17, %v2623_v54  ;;  %v2622_v39 = vadd.f32 %v2487_v35, %v6293_v34  ;;  %v2026_v0 = vadd.f32 %v6674_v12, %v6673_v45  ;;  %v6677_v35 = vld [vmem:[#allocation24_spill] sm:$0xff]  ;;  %v6681_v45 = vld [vmem:[#allocation29_spill] sm:$0xff] }
 0x1ed   : > { %3131 = vst [vmem:[%s6345_s20 + $0x18] sm:$0xff] %v3099_v55  ;;  %vm3034_vm3 = vcmp.gt.f32.partialorder %v3002_v26, 0.0  ;;  %v3066_v37 = vmul.f32 0.1, %v3002_v26  ;;  %v3005_v63 = vadd.f32 %v6310_v23, %v2966_v49  ;;  %v2965_v28 = vmul.f32 %v6290_v53, %v2926_v21  ;;  %v2793_v19 = vpop.f32.mrf.mxu0  ;;  %v4651_v56 = vpop.f32.mrf.mxu1 }
 0x1ee   : > { %v2968_v11 = vmul.f32 %v6290_v53, %v2929_v10  ;;  %v2928_v16 = vadd.f32 %v2793_v19, %v2622_v39  ;;  %v2625_v3 = vadd.f32 %v4651_v56, %v6296_v24  ;;  %v6393_v48 = vadd.f32 %v6677_v35, %v2023_v60  ;;  %v6678_v56 = vld [vmem:[#allocation26_spill] sm:$0xff] }
 0x1ef   : > { %v3098_v40 = vsel %vm3034_vm3, %v3002_v26, %v3066_v37  ;;  %vm3037_vm4 = vcmp.gt.f32.partialorder %v3005_v63, 0.0  ;;  %v3069_v34 = vmul.f32 0.1, %v3005_v63  ;;  %v3004_v31 = vadd.f32 %v6310_v23, %v2965_v28  ;;  %v4731_v14 = vpop.f32.mrf.mxu0  ;;  %v2497_v29 = vpop.f32.mrf.mxu1 }
 0x1f0   : > { %3130 = vst [vmem:[%s6345_s20 + $0x10] sm:$0xff] %v3098_v40  ;;  %v3007_v36 = vadd.f32 %v6310_v23, %v2968_v11  ;;  %v2967_v9 = vmul.f32 %v6290_v53, %v2928_v16  ;;  %v2931_v38 = vadd.f32 %v4731_v14, %v2625_v3  ;;  %v2624_v8 = vadd.f32 %v2497_v29, %v6299_v5 }
 0x1f1   : > { %v3101_v24 = vsel %vm3037_vm4, %v3005_v63, %v3069_v34  ;;  %vm3036_vm5 = vcmp.gt.f32.partialorder %v3004_v31, 0.0  ;;  %v3068_v1 = vmul.f32 0.1, %v3004_v31  ;;  %v2803_v58 = vpop.f32.mrf.mxu0  ;;  %v4654_v32 = vpop.f32.mrf.mxu1  ;;  %v2025_v5 = vadd.f32 %v6676_v25, %v6675_v15 }
 0x1f2   : > { %3133 = vst [vmem:[%s6345_s20 + $0x28] sm:$0xff] %v3101_v24  ;;  %vm3039_vm6 = vcmp.gt.f32.partialorder %v3007_v36, 0.0  ;;  %v3071_v51 = vmul.f32 0.1, %v3007_v36  ;;  %v3006_v50 = vadd.f32 %v6310_v23, %v2967_v9  ;;  %v2970_v46 = vmul.f32 %v6290_v53, %v2931_v38 }
 0x1f3   : > { %v3100_v4 = vsel %vm3036_vm5, %v3004_v31, %v3068_v1  ;;  %v2930_v57 = vadd.f32 %v2803_v58, %v2624_v8  ;;  %v2627_v54 = vadd.f32 %v4654_v32, %v6313_v27  ;;  %v4734_v61 = vpop.f32.mrf.mxu0  ;;  %v2507_v26 = vpop.f32.mrf.mxu1  ;;  %v6400_v41 = vadd.f32 %v6678_v56, %v2026_v0  ;;  %v6680_v8 = vld [vmem:[#allocation8_spill] sm:$0xff] }
 0x1f4   : > { %3132 = vst [vmem:[%s6345_s20 + $0x20] sm:$0xff] %v3100_v4  ;;  %v3103_v49 = vsel %vm3039_vm6, %v3007_v36, %v3071_v51  ;;  %vm3038_vm7 = vcmp.gt.f32.partialorder %v3006_v50, 0.0  ;;  %v3070_v21 = vmul.f32 0.1, %v3006_v50  ;;  %v3009_v17 = vadd.f32 %v6310_v23, %v2970_v46  ;;  %v6682_v4 = vld [vmem:[#allocation9_spill] sm:$0xff] }
 0x1f5   : > { %3135 = vst [vmem:[%s6345_s20 + $0x38] sm:$0xff] %v3103_v49  ;;  %v2969_v55 = vmul.f32 %v6290_v53, %v2930_v57  ;;  %v2933_v10 = vadd.f32 %v4734_v61, %v2627_v54  ;;  %v2626_v39 = vadd.f32 %v2507_v26, %v6317_v20  ;;  %v2813_v37 = vpop.f32.mrf.mxu0  ;;  %v4657_v27 = vpop.f32.mrf.mxu1  ;;  %v6679_v20 = vld [vmem:[#allocation28_spill] sm:$0xff]  ;;  %v2028_v12 = vadd.f32 %v6681_v45, %v6680_v8  ;;  %v6683_v57 = vld [vmem:[#allocation31_spill] sm:$0xff] }
 0x1f6   : > { %v3102_v63 = vsel %vm3038_vm7, %v3006_v50, %v3070_v21  ;;  %vm3041_vm8 = vcmp.gt.f32.partialorder %v3009_v17, 0.0  ;;  %v3073_v28 = vmul.f32 0.1, %v3009_v17  ;;  %v2629_v19 = vadd.f32 %v4657_v27, %v6320_v62 }
 0x1f7   : > { %3134 = vst [vmem:[%s6345_s20 + $0x30] sm:$0xff] %v3102_v63  ;;  %v3008_v52 = vadd.f32 %v6310_v23, %v2969_v55  ;;  %v2972_v60 = vmul.f32 %v6290_v53, %v2933_v10  ;;  %v2932_v11 = vadd.f32 %v2813_v37, %v2626_v39  ;;  %v4737_v16 = vpop.f32.mrf.mxu0  ;;  %v2517_v3 = vpop.f32.mrf.mxu1  ;;  %v6406_v40 = vadd.f32 %v6679_v20, %v2025_v5  ;;  %v6684_v55 = vld [vmem:[#allocation10_spill] sm:$0xff]  ;;  %v6685_v10 = vld [vmem:[#allocation33_spill] sm:$0xff] }
 0x1f8   : > { %v3105_v34 = vsel %vm3041_vm8, %v3009_v17, %v3073_v28  ;;  %v2935_v31 = vadd.f32 %v4737_v16, %v2629_v19  ;;  %v2628_v14 = vadd.f32 %v2517_v3, %v6323_v47  ;;  %v2027_v54 = vadd.f32 %v6683_v57, %v6682_v4 }
 0x1f9   : > { %3137 = vst [vmem:[%s6345_s20 + $0x48] sm:$0xff] %v3105_v34  ;;  %vm3040_vm9 = vcmp.gt.f32.partialorder %v3008_v52, 0.0  ;;  %v3072_v62 = vmul.f32 0.1, %v3008_v52  ;;  %v3011_v29 = vadd.f32 %v6310_v23, %v2972_v60  ;;  %v2971_v36 = vmul.f32 %v6290_v53, %v2932_v11  ;;  %v2823_v9 = vpop.f32.mrf.mxu0  ;;  %v4660_v38 = vpop.f32.mrf.mxu1  ;;  %v6686_v60 = vld [vmem:[#allocation30_spill] sm:$0xff] }
 0x1fa   : > { %v2974_v0 = vmul.f32 %v6290_v53, %v2935_v31  ;;  %v2934_v24 = vadd.f32 %v2823_v9, %v2628_v14  ;;  %v2631_v1 = vadd.f32 %v4660_v38, %v6326_v22  ;;  %v6432_v11 = vadd.f32 %v6686_v60, %v2028_v12 }
 0x1fb   : > { %v3104_v58 = vsel %vm3040_vm9, %v3008_v52, %v3072_v62  ;;  %vm3043_vm10 = vcmp.gt.f32.partialorder %v3011_v29, 0.0  ;;  %v3075_v47 = vmul.f32 0.1, %v3011_v29  ;;  %v3010_v32 = vadd.f32 %v6310_v23, %v2971_v36  ;;  %v4740_v51 = vpop.f32.mrf.mxu0  ;;  %v2527_v50 = vpop.f32.mrf.mxu1 }
 0x1fc   : > { %3136 = vst [vmem:[%s6345_s20 + $0x40] sm:$0xff] %v3104_v58  ;;  %v3013_v46 = vadd.f32 %v6310_v23, %v2974_v0  ;;  %v2973_v15 = vmul.f32 %v6290_v53, %v2934_v24  ;;  %v2937_v25 = vadd.f32 %v4740_v51, %v2631_v1  ;;  %v2630_v5 = vadd.f32 %v2527_v50, %v6332_v43 }
 0x1fd   : > { %v3107_v22 = vsel %vm3043_vm10, %v3011_v29, %v3075_v47  ;;  %vm3042_vm11 = vcmp.gt.f32.partialorder %v3010_v32, 0.0  ;;  %v3074_v61 = vmul.f32 0.1, %v3010_v32  ;;  %v2833_v26 = vpop.f32.mrf.mxu0  ;;  %v4663_v49 = vpop.f32.mrf.mxu1  ;;  %v2030_v43 = vadd.f32 %v6685_v10, %v6684_v55  ;;  %v6687_v29 = vld [vmem:[#allocation32_spill] sm:$0xff]  ;;  %v6692_v10 = vld [vmem:[#allocation37_spill] sm:$0xff] }
 0x1fe   : > { %3139 = vst [vmem:[%s6345_s20 + $0x58] sm:$0xff] %v3107_v22  ;;  %vm3045_vm12 = vcmp.gt.f32.partialorder %v3013_v46, 0.0  ;;  %v3077_v21 = vmul.f32 0.1, %v3013_v46  ;;  %v3012_v17 = vadd.f32 %v6310_v23, %v2973_v15  ;;  %v2976_v35 = vmul.f32 %v6290_v53, %v2937_v25  ;;  %v6690_v15 = vld [vmem:[#allocation35_spill] sm:$0xff]  ;;  %v6691_v55 = vld [vmem:[#allocation12_spill] sm:$0xff] }
 0x1ff   : > { %v3106_v39 = vsel %vm3042_vm11, %v3010_v32, %v3074_v61  ;;  %v2936_v37 = vadd.f32 %v2833_v26, %v2630_v5  ;;  %v2633_v27 = vadd.f32 %v4663_v49, %v6335_v2  ;;  %v4743_v63 = vpop.f32.mrf.mxu0  ;;  %v2537_v28 = vpop.f32.mrf.mxu1  ;;  %v6439_v36 = vadd.f32 %v6687_v29, %v2027_v54 }
 0x200   : > { %3138 = vst [vmem:[%s6345_s20 + $0x50] sm:$0xff] %v3106_v39  ;;  %v3109_v19 = vsel %vm3045_vm12, %v3013_v46, %v3077_v21  ;;  %vm3044_vm13 = vcmp.gt.f32.partialorder %v3012_v17, 0.0  ;;  %v3076_v56 = vmul.f32 0.1, %v3012_v17  ;;  %v3015_v52 = vadd.f32 %v6310_v23, %v2976_v35  ;;  %v6689_v46 = vld [vmem:[#allocation11_spill] sm:$0xff] }
 0x201   : > { %3141 = vst [vmem:[%s6345_s20 + $0x68] sm:$0xff] %v3109_v19  ;;  %v2975_v16 = vmul.f32 %v6290_v53, %v2936_v37  ;;  %v2939_v3 = vadd.f32 %v4743_v63, %v2633_v27  ;;  %v2632_v20 = vadd.f32 %v2537_v28, %v6338_v30  ;;  %v2843_v34 = vpop.f32.mrf.mxu0  ;;  %v4666_v2 = vpop.f32.mrf.mxu1  ;;  %v6688_v30 = vld [vmem:[#allocation34_spill] sm:$0xff]  ;;  %v2029_v25 = vadd.f32 %v6690_v15, %v6689_v46 }
 0x202   : > { %v3108_v31 = vsel %vm3044_vm13, %v3012_v17, %v3076_v56  ;;  %vm3047_vm14 = vcmp.gt.f32.partialorder %v3015_v52, 0.0  ;;  %v3079_v14 = vmul.f32 0.1, %v3015_v52  ;;  %v2635_v62 = vadd.f32 %v4666_v2, %v6355_v44  ;;  %v6693_v56 = vld [vmem:[#allocation13_spill] sm:$0xff] }
 0x203   : > { %3140 = vst [vmem:[%s6345_s20 + $0x60] sm:$0xff] %v3108_v31  ;;  %v3014_v9 = vadd.f32 %v6310_v23, %v2975_v16  ;;  %v2978_v38 = vmul.f32 %v6290_v53, %v2939_v3  ;;  %v2938_v8 = vadd.f32 %v2843_v34, %v2632_v20  ;;  %v4746_v45 = vpop.f32.mrf.mxu0  ;;  %v2547_v12 = vpop.f32.mrf.mxu1  ;;  %v6445_v0 = vadd.f32 %v6688_v30, %v2030_v43 }
 0x204   : > { %v3111_v24 = vsel %vm3047_vm14, %v3015_v52, %v3079_v14  ;;  %v2941_v1 = vadd.f32 %v4746_v45, %v2635_v62  ;;  %v2634_v58 = vadd.f32 %v2547_v12, %v6361_v13  ;;  %v2032_v43 = vadd.f32 %v6692_v10, %v6691_v55  ;;  %v6694_v52 = vld [vmem:[#allocation39_spill] sm:$0xff]  ;;  %v6695_v62 = vld [vmem:[#allocation36_spill] sm:$0xff] }
 0x205   : > { %3143 = vst [vmem:[%s6345_s20 + $0x78] sm:$0xff] %v3111_v24  ;;  %vm3046_vm15 = vcmp.gt.f32.partialorder %v3014_v9, 0.0  ;;  %v3078_v44 = vmul.f32 0.1, %v3014_v9  ;;  %v3017_v47 = vadd.f32 %v6310_v23, %v2978_v38  ;;  %v2977_v32 = vmul.f32 %v6290_v53, %v2938_v8  ;;  %v2853_v51 = vpop.f32.mrf.mxu0  ;;  %v4669_v50 = vpop.f32.mrf.mxu1 }
 0x206   : > { %v2980_v5 = vmul.f32 %v6290_v53, %v2941_v1  ;;  %v2940_v4 = vadd.f32 %v2853_v51, %v2634_v58  ;;  %v2637_v57 = vadd.f32 %v4669_v50, %v6367_v33  ;;  %v2336_v29 = vadd.f32 %v6695_v62, %v2029_v25  ;;  %v6696_v1 = vld [vmem:[#allocation38_spill] sm:$0xff] }
 0x207   : > { %v3110_v54 = vsel %vm3046_vm15, %v3014_v9, %v3078_v44  ;;  %vm3049_vm0 = vcmp.gt.f32.partialorder %v3017_v47, 0.0  ;;  %v3081_v13 = vmul.f32 0.1, %v3017_v47  ;;  %v3016_v22 = vadd.f32 %v6310_v23, %v2977_v32  ;;  %v4749_v61 = vpop.f32.mrf.mxu0  ;;  %v2557_v26 = vpop.f32.mrf.mxu1 }
 0x208   : > { %3142 = vst [vmem:[%s6345_s20 + $0x70] sm:$0xff] %v3110_v54  ;;  %v3019_v49 = vadd.f32 %v6310_v23, %v2980_v5  ;;  %v2979_v21 = vmul.f32 %v6290_v53, %v2940_v4  ;;  %v2943_v17 = vadd.f32 %v4749_v61, %v2637_v57  ;;  %v2636_v35 = vadd.f32 %v2557_v26, %v6393_v48 }
 0x209   : > { %v3113_v33 = vsel %vm3049_vm0, %v3017_v47, %v3081_v13  ;;  %vm3048_vm1 = vcmp.gt.f32.partialorder %v3016_v22, 0.0  ;;  %v3080_v39 = vmul.f32 0.1, %v3016_v22  ;;  %v2863_v37 = vpop.f32.mrf.mxu0  ;;  %v4672_v27 = vpop.f32.mrf.mxu1  ;;  %v2031_v48 = vadd.f32 %v6694_v52, %v6693_v56  ;;  %v6697_v13 = vld [vmem:[#allocation14_spill] sm:$0xff] }
 0x20a   : > { %3145 = vst [vmem:[%s6345_s20 + $0x88] sm:$0xff] %v3113_v33  ;;  %vm3051_vm2 = vcmp.gt.f32.partialorder %v3019_v49, 0.0  ;;  %v3083_v63 = vmul.f32 0.1, %v3019_v49  ;;  %v3018_v28 = vadd.f32 %v6310_v23, %v2979_v21  ;;  %v2982_v19 = vmul.f32 %v6290_v53, %v2943_v17  ;;  %v6698_v33 = vld [vmem:[#allocation15_spill] sm:$0xff] }
 0x20b   : > { %v3112_v60 = vsel %vm3048_vm1, %v3016_v22, %v3080_v39  ;;  %v2942_v16 = vadd.f32 %v2863_v37, %v2636_v35  ;;  %v2639_v3 = vadd.f32 %v4672_v27, %v6400_v41  ;;  %v4752_v20 = vpop.f32.mrf.mxu0  ;;  %v2567_v34 = vpop.f32.mrf.mxu1  ;;  %v2339_v58 = vadd.f32 %v6696_v1, %v2032_v43 }
 0x20c   : > { %3144 = vst [vmem:[%s6345_s20 + $0x80] sm:$0xff] %v3112_v60  ;;  %v3115_v2 = vsel %vm3051_vm2, %v3019_v49, %v3083_v63  ;;  %vm3050_vm3 = vcmp.gt.f32.partialorder %v3018_v28, 0.0  ;;  %v3082_v31 = vmul.f32 0.1, %v3018_v28  ;;  %v3021_v14 = vadd.f32 %v6310_v23, %v2982_v19 }
 0x20d   : > { %3147 = vst [vmem:[%s6345_s20 + $0x98] sm:$0xff] %v3115_v2  ;;  %v2981_v9 = vmul.f32 %v6290_v53, %v2942_v16  ;;  %v2945_v38 = vadd.f32 %v4752_v20, %v2639_v3  ;;  %v2638_v8 = vadd.f32 %v2567_v34, %v6406_v40  ;;  %v2873_v45 = vpop.f32.mrf.mxu0  ;;  %v4675_v12 = vpop.f32.mrf.mxu1  ;;  %v2338_v40 = vadd.f32 %v6258_v6, %v2031_v48 }
 0x20e   : > { %v3114_v41 = vsel %vm3050_vm3, %v3018_v28, %v3082_v31  ;;  %vm3053_vm4 = vcmp.gt.f32.partialorder %v3021_v14, 0.0  ;;  %v3085_v30 = vmul.f32 0.1, %v3021_v14  ;;  %v2641_v24 = vadd.f32 %v4675_v12, %v6432_v11 }
 0x20f   : > { %3146 = vst [vmem:[%s6345_s20 + $0x90] sm:$0xff] %v3114_v41  ;;  %v3020_v44 = vadd.f32 %v6310_v23, %v2981_v9  ;;  %v2984_v47 = vmul.f32 %v6290_v53, %v2945_v38  ;;  %v2944_v32 = vadd.f32 %v2873_v45, %v2638_v8  ;;  %v4755_v51 = vpop.f32.mrf.mxu0  ;;  %v2577_v50 = vpop.f32.mrf.mxu1  ;;  %v2034_v22 = vadd.f32 %v6260_v7, %v6697_v13 }
 0x210   : > { %v3117_v46 = vsel %vm3053_vm4, %v3021_v14, %v3085_v30  ;;  %v2947_v15 = vadd.f32 %v4755_v51, %v2641_v24  ;;  %v2640_v25 = vadd.f32 %v2577_v50, %v6439_v36  ;;  %v2033_v39 = vadd.f32 %v6266_v18, %v6698_v33 }
 0x211   : > { %3149 = vst [vmem:[%s6345_s20 + $0xa8] sm:$0xff] %v3117_v46  ;;  %vm3052_vm5 = vcmp.gt.f32.partialorder %v3020_v44, 0.0  ;;  %v3084_v11 = vmul.f32 0.1, %v3020_v44  ;;  %v3023_v5 = vadd.f32 %v6310_v23, %v2984_v47  ;;  %v2983_v4 = vmul.f32 %v6290_v53, %v2944_v32  ;;  %v2883_v57 = vpop.f32.mrf.mxu0  ;;  %v4678_v54 = vpop.f32.mrf.mxu1 }
 0x212   : > { %v2986_v61 = vmul.f32 %v6290_v53, %v2947_v15  ;;  %v2946_v6 = vadd.f32 %v2883_v57, %v2640_v25  ;;  %v2643_v26 = vadd.f32 %v4678_v54, %v6445_v0  ;;  %v2341_v52 = vadd.f32 %v6264_v59, %v2034_v22 }
 0x213   : > { %v3116_v49 = vsel %vm3052_vm5, %v3020_v44, %v3084_v11  ;;  %vm3055_vm6 = vcmp.gt.f32.partialorder %v3023_v5, 0.0  ;;  %v3087_v36 = vmul.f32 0.1, %v3023_v5  ;;  %v3022_v21 = vadd.f32 %v6310_v23, %v2983_v4  ;;  %v4758_v17 = vpop.f32.mrf.mxu0  ;;  %v2587_v35 = vpop.f32.mrf.mxu1 }
 0x214   : > { %3148 = vst [vmem:[%s6345_s20 + $0xa0] sm:$0xff] %v3116_v49  ;;  %v3025_v55 = vadd.f32 %v6310_v23, %v2986_v61  ;;  %v2985_v10 = vmul.f32 %v6290_v53, %v2946_v6  ;;  %v2949_v43 = vadd.f32 %v4758_v17, %v2643_v26  ;;  %v2642_v7 = vadd.f32 %v2587_v35, %v2336_v29 }
 0x215   : > { %v3119_v37 = vsel %vm3055_vm6, %v3023_v5, %v3087_v36  ;;  %vm3054_vm7 = vcmp.gt.f32.partialorder %v3022_v21, 0.0  ;;  %v3086_v0 = vmul.f32 0.1, %v3022_v21  ;;  %v2893_v27 = vpop.f32.mrf.mxu0  ;;  %v4681_v63 = vpop.f32.mrf.mxu1  ;;  %v2340_v31 = vadd.f32 %v6276_v42, %v2033_v39 }
 0x216   : > { %3151 = vst [vmem:[%s6345_s20 + $0xb8] sm:$0xff] %v3119_v37  ;;  %vm3057_vm8 = vcmp.gt.f32.partialorder %v3025_v55, 0.0  ;;  %v3089_v28 = vmul.f32 0.1, %v3025_v55  ;;  %v3024_v19 = vadd.f32 %v6310_v23, %v2985_v10  ;;  %v2988_v56 = vmul.f32 %v6290_v53, %v2949_v43 }
 0x217   : > { %v3118_v48 = vsel %vm3054_vm7, %v3022_v21, %v3086_v0  ;;  %v2948_v60 = vadd.f32 %v2893_v27, %v2642_v7  ;;  %v2645_v16 = vadd.f32 %v4681_v63, %v2339_v58  ;;  %v4761_v18 = vpop.f32.mrf.mxu0  ;;  %v2597_v3 = vpop.f32.mrf.mxu1 }
 0x218   : > { %3150 = vst [vmem:[%s6345_s20 + $0xb0] sm:$0xff] %v3118_v48  ;;  %v3121_v20 = vsel %vm3057_vm8, %v3025_v55, %v3089_v28  ;;  %vm3056_vm9 = vcmp.gt.f32.partialorder %v3024_v19, 0.0  ;;  %v3088_v34 = vmul.f32 0.1, %v3024_v19  ;;  %v3027_v2 = vadd.f32 %v6310_v23, %v2988_v56 }
 0x219   : > { %3153 = vst [vmem:[%s6345_s20 + $0xc8] sm:$0xff] %v3121_v20  ;;  %v2987_v14 = vmul.f32 %v6290_v53, %v2948_v60  ;;  %v2951_v62 = vadd.f32 %v4761_v18, %v2645_v16  ;;  %v2644_v29 = vadd.f32 %v2597_v3, %v2338_v40  ;;  %v2903_v59 = vpop.f32.mrf.mxu0  ;;  %v4684_v9 = vpop.f32.mrf.mxu1 }
 0x21a   : > { %v3120_v38 = vsel %vm3056_vm9, %v3024_v19, %v3088_v34  ;;  %vm3059_vm10 = vcmp.gt.f32.partialorder %v3027_v2, 0.0  ;;  %v3091_v8 = vmul.f32 0.1, %v3027_v2  ;;  %v2647_v45 = vadd.f32 %v4684_v9, %v2341_v52 }
 0x21b   : > { %3152 = vst [vmem:[%s6345_s20 + $0xc0] sm:$0xff] %v3120_v38  ;;  %v3026_v12 = vadd.f32 %v6310_v23, %v2987_v14  ;;  %v2990_v41 = vmul.f32 %v6290_v53, %v2951_v62  ;;  %v2950_v30 = vadd.f32 %v2903_v59, %v2644_v29  ;;  %v4764_v24 = vpop.f32.mrf.mxu0  ;;  %v2607_v42 = vpop.f32.mrf.mxu1 }
 0x21c   : > { %v3123_v1 = vsel %vm3059_vm10, %v3027_v2, %v3091_v8  ;;  %v2953_v58 = vadd.f32 %v4764_v24, %v2647_v45  ;;  %v2646_v44 = vadd.f32 %v2607_v42, %v2340_v31 }
 0x21d   : > { %3155 = vst [vmem:[%s6345_s20 + $0xd8] sm:$0xff] %v3123_v1  ;;  %vm3058_vm11 = vcmp.gt.f32.partialorder %v3026_v12, 0.0  ;;  %v3090_v47 = vmul.f32 0.1, %v3026_v12  ;;  %v3029_v32 = vadd.f32 %v6310_v23, %v2990_v41  ;;  %v2989_v51 = vmul.f32 %v6290_v53, %v2950_v30  ;;  %v2913_v50 = vpop.f32.mrf.mxu0 }
 0x21e   : > { %v2992_v40 = vmul.f32 %v6290_v53, %v2953_v58  ;;  %v2952_v46 = vadd.f32 %v2913_v50, %v2646_v44 }
 0x21f   : > { %v3122_v15 = vsel %vm3058_vm11, %v3026_v12, %v3090_v47  ;;  %vm3061_vm12 = vcmp.gt.f32.partialorder %v3029_v32, 0.0  ;;  %v3093_v25 = vmul.f32 0.1, %v3029_v32  ;;  %v3028_v11 = vadd.f32 %v6310_v23, %v2989_v51 }
 0x220   : > { %3154 = vst [vmem:[%s6345_s20 + $0xd0] sm:$0xff] %v3122_v15  ;;  %v3031_v5 = vadd.f32 %v6310_v23, %v2992_v40  ;;  %v2991_v4 = vmul.f32 %v6290_v53, %v2952_v46 }
 0x221   : > { %v3125_v57 = vsel %vm3061_vm12, %v3029_v32, %v3093_v25  ;;  %vm3060_vm13 = vcmp.gt.f32.partialorder %v3028_v11, 0.0  ;;  %v3092_v54 = vmul.f32 0.1, %v3028_v11 }
 0x222   : > { %3157 = vst [vmem:[%s6345_s20 + $0xe8] sm:$0xff] %v3125_v57  ;;  %vm3063_vm14 = vcmp.gt.f32.partialorder %v3031_v5, 0.0  ;;  %v3095_v13 = vmul.f32 0.1, %v3031_v5  ;;  %v3030_v22 = vadd.f32 %v6310_v23, %v2991_v4 }
 0x223   : > { %v3124_v61 = vsel %vm3060_vm13, %v3028_v11, %v3092_v54 }
 0x224   : > { %3156 = vst [vmem:[%s6345_s20 + $0xe0] sm:$0xff] %v3124_v61  ;;  %v3127_v6 = vsel %vm3063_vm14, %v3031_v5, %v3095_v13  ;;  %vm3062_vm15 = vcmp.gt.f32.partialorder %v3030_v22, 0.0  ;;  %v3094_v26 = vmul.f32 0.1, %v3030_v22 }
 0x225   : > { %3159 = vst [vmem:[%s6345_s20 + $0xf8] sm:$0xff] %v3127_v6 }
 0x226   : > { %v3126_v49 = vsel %vm3062_vm15, %v3030_v22, %v3094_v26 }
 0x227   : > { %3158 = vst [vmem:[%s6345_s20 + $0xf0] sm:$0xff] %v3126_v49 }
 0x228 PF: > { %s14_s17 = sadd.s32 1, %s4844_s17   ;;  %s6699_s15 = smov %s4840_s16 }
 0x229   : > { %p11_p5 = scmp.ge.s32.totalorder %s14_s17, 4   ;;  %s6700_s16 = smov %s6702_s18 }
 0x22b   :  { %13 = sbr.rel (!%p11_p5) target bundleno = 2 (0x2), region = 85 }

</bundles_post_ra>
